<compile_context>
chip_gen: v7x
topology: tpu7x:2x2x1
jax: 0.10.0
libtpu: 0.0.40
codegen_flags: <defaults>
</compile_context>

<pallas_src>
import functools

import jax
import jax.numpy as jnp
from jax.experimental import pallas as pl
from jax.experimental.pallas import tpu as pltpu


# ----------------------------------------------------------------------------
# Pallas kernel: one decoder step per (batch-chunk, time-step) grid point.
# ----------------------------------------------------------------------------
def _decoder_step_kernel(
    # per-step / per-chunk inputs
    pre_a_ref,      # (1, Bc, 4Q) f32  prenet(frame) @ W_ih_a[:P] + b_a (hoisted)
    enc_ref,        # (Bc, T_in, E) bf16 encoder outputs (resident per chunk)
    mask_ref,       # (Bc, T_in)  f32  attention mask (1 valid / 0 pad)
    # resident weights, single-buffered, bf16 (MXU operands)
    w_ih_a_c_ref,   # (E, 4Q)
    w_hh_a_ref,     # (Q, 4Q)
    w_query_ref,    # (Q, A)
    w_inputs_ref,   # (E, A)
    w_loc_lin_ref,  # (NF, A)
    w_ih_d_q_ref,   # (Q, 4D)
    w_ih_d_c_ref,   # (E, 4D)
    w_hh_d_ref,     # (D, 4D)
    w_proj_h_ref,   # (D, Fr)
    w_proj_c_ref,   # (E, Fr)
    # resident small weights, f32 (VPU operands / biases)
    w_loc_w_ref,    # (K, NF)  location conv taps, channel 0 (attention weights)
    w_loc_c_ref,    # (K, NF)  location conv taps, channel 1 (cumulative)
    w_v_ref,        # (1, A)   energy projection v (row vector)
    b_d_ref,        # (1, 4D)
    b_proj_ref,     # (1, Fr)
    w_stop_h_ref,   # (1, D)
    w_stop_o_ref,   # (1, Fr)
    # SMEM scalars
    b_v_ref,        # (1,)
    b_stop_ref,     # (1,)
    # outputs (VMEM-resident across the time axis; written back once per chunk)
    out_ref,        # (T_steps, Bc, Fr)
    stop_ref,       # (T_steps, Bc, 1)
    align_ref,      # (T_steps, Bc, T_in)
    # scratch (recurrent state, persists across the time axis)
    query_sc,       # (Bc, Q)
    att_cell_sc,    # (Bc, Q)
    dec_h_sc,       # (Bc, D)
    dec_c_sc,       # (Bc, D)
    ctx_sc,         # (Bc, E)
    attn_w_sc,      # (Bc, T_in + 2*pad)  zero-padded on both sides
    attn_cum_sc,    # (Bc, T_in + 2*pad)
    proc_in_sc,     # (Bc, T_in, A)
    *, conv_pad,
):
    t = pl.program_id(1)
    Bc, T_in, E = enc_ref.shape
    Q = query_sc.shape[1]
    D = dec_h_sc.shape[1]
    A = w_query_ref.shape[1]
    NF = w_loc_lin_ref.shape[0]
    K = w_loc_w_ref.shape[0]
    pad = conv_pad
    f32 = jnp.float32
    bf16 = jnp.bfloat16

    # ---- _init_states + attention.init_states + preprocess_inputs (per chunk)
    @pl.when(t == 0)
    def _init():
        query_sc[...] = jnp.zeros_like(query_sc)
        att_cell_sc[...] = jnp.zeros_like(att_cell_sc)
        dec_h_sc[...] = jnp.zeros_like(dec_h_sc)
        dec_c_sc[...] = jnp.zeros_like(dec_c_sc)
        ctx_sc[...] = jnp.zeros_like(ctx_sc)
        attn_w_sc[...] = jnp.zeros_like(attn_w_sc)
        attn_cum_sc[...] = jnp.zeros_like(attn_cum_sc)
        enc = enc_ref[...]                                       # (Bc, T_in, E)
        proc = jnp.dot(enc.reshape(Bc * T_in, E), w_inputs_ref[...],
                       preferred_element_type=f32)
        proc_in_sc[...] = proc.reshape(Bc, T_in, A)

    # ---- attention RNN (LSTMCell); prenet / W_ih[:P] / biases hoisted --------
    ctx = ctx_sc[...]
    q_prev = query_sc[...]
    gates = (pre_a_ref[0]
             + jnp.dot(ctx.astype(bf16), w_ih_a_c_ref[...],
                       preferred_element_type=f32)
             + jnp.dot(q_prev.astype(bf16), w_hh_a_ref[...],
                       preferred_element_type=f32))
    i_g = jax.nn.sigmoid(gates[:, 0 * Q:1 * Q])
    f_g = jax.nn.sigmoid(gates[:, 1 * Q:2 * Q])
    g_g = jnp.tanh(gates[:, 2 * Q:3 * Q])
    o_g = jax.nn.sigmoid(gates[:, 3 * Q:4 * Q])
    c_att = f_g * att_cell_sc[...] + i_g * g_g
    query = o_g * jnp.tanh(c_att)
    att_cell_sc[...] = c_att
    query_sc[...] = query

    # ---- location-sensitive attention ----------------------------------------
    proc_q = jnp.dot(query.astype(bf16), w_query_ref[...],
                     preferred_element_type=f32)                 # (Bc, A)

    # banded location Conv1d: K shifted windows of the zero-padded attention /
    # cumulative-attention scratch (no dense (2*T_in, T_in*NF) band matrix).
    w_loc_w = w_loc_w_ref[...]                                   # (K, NF)
    w_loc_c = w_loc_c_ref[...]
    loc_feat = jnp.zeros((Bc, T_in, NF), f32)
    for k in range(K):
        if k + T_in <= pad or k >= pad + T_in:
            continue                     # window lies entirely in the zero border
        sw = attn_w_sc[:, k:k + T_in]                            # (Bc, T_in)
        sc = attn_cum_sc[:, k:k + T_in]
        loc_feat = (loc_feat
                    + sw[:, :, None] * w_loc_w[k][None, None, :]
                    + sc[:, :, None] * w_loc_c[k][None, None, :])
    loc = jnp.dot(loc_feat.reshape(Bc * T_in, NF).astype(bf16),
                  w_loc_lin_ref[...],
                  preferred_element_type=f32).reshape(Bc, T_in, A)

    ener = jnp.tanh(proc_q[:, None, :] + loc + proc_in_sc[...])  # (Bc, T_in, A)
    # N=1 energy projection as VPU multiply + lane reduction (no tiny matmul);
    # b_v is an SMEM scalar.
    e = jnp.sum(ener * w_v_ref[...][None], axis=-1) + b_v_ref[0]  # (Bc, T_in)
    e = jnp.where(mask_ref[...] > 0.5, e, -1e30)                  # keep fill in f32
    e = e - jnp.max(e, axis=-1, keepdims=True)
    p = jnp.exp(e)
    align = p / jnp.sum(p, axis=-1, keepdims=True)                # softmax

    attn_w_sc[:, pad:pad + T_in] = align
    attn_cum_sc[:, pad:pad + T_in] = attn_cum_sc[:, pad:pad + T_in] + align

    # attention context as an MXU batched matmul (bmm(align, enc))
    ctx = jnp.einsum('bqt,bte->bqe', align[:, None, :].astype(bf16),
                     enc_ref[...], preferred_element_type=f32)[:, 0]
    ctx_sc[...] = ctx

    # ---- decoder RNN (LSTMCell), concat removed via split weights ------------
    q16 = query.astype(bf16)
    c16 = ctx.astype(bf16)
    gates_d = (jnp.dot(q16, w_ih_d_q_ref[...], preferred_element_type=f32)
               + jnp.dot(c16, w_ih_d_c_ref[...], preferred_element_type=f32)
               + jnp.dot(dec_h_sc[...].astype(bf16), w_hh_d_ref[...],
                         preferred_element_type=f32)
               + b_d_ref[...])
    i_d = jax.nn.sigmoid(gates_d[:, 0 * D:1 * D])
    f_d = jax.nn.sigmoid(gates_d[:, 1 * D:2 * D])
    g_d = jnp.tanh(gates_d[:, 2 * D:3 * D])
    o_d = jax.nn.sigmoid(gates_d[:, 3 * D:4 * D])
    dc = f_d * dec_c_sc[...] + i_d * g_d
    dh = o_d * jnp.tanh(dc)
    dec_c_sc[...] = dc
    dec_h_sc[...] = dh

    # ---- linear projection + stopnet ------------------------------------------
    dec_out = (jnp.dot(dh.astype(bf16), w_proj_h_ref[...],
                       preferred_element_type=f32)
               + jnp.dot(c16, w_proj_c_ref[...], preferred_element_type=f32)
               + b_proj_ref[...])                                 # (Bc, Fr)
    stop = (jnp.sum(dh * w_stop_h_ref[...], axis=-1, keepdims=True)
            + jnp.sum(dec_out * w_stop_o_ref[...], axis=-1, keepdims=True)
            + b_stop_ref[0])                                      # (Bc, 1)

    out_ref[t] = dec_out          # resident output block: no per-step DMA
    stop_ref[t] = stop
    align_ref[t] = align


# ----------------------------------------------------------------------------
# Teacher-forcing glue shared by the kernel wrapper and the pure-JAX reference.
# ----------------------------------------------------------------------------
def _teacher_frames(memories, frame_channels, r):
    B, T_mel, F = memories.shape
    T_steps = T_mel // r
    mem_r = memories.reshape(B, T_steps, F * r)
    mem_r = jnp.transpose(mem_r, (1, 0, 2))                     # (T_steps, B, F*r)
    go = jnp.zeros((1, B, F * r), memories.dtype)               # get_go_frame
    mem_cat = jnp.concatenate([go, mem_r], axis=0)              # (T_steps+1, B, F*r)
    return mem_cat[:T_steps, :, F * (r - 1):]                   # _update_memory


def _hoisted_prenet_gates(params, frames):
    """Prenet + teacher-dependent half of the attention-LSTM input matmul,
    hoisted out of the sequential decoder loop (one big MXU-friendly matmul).
    TODO(synk): prenet dropout (active even at inference in TTS) is omitted.
    """
    h1 = jnp.maximum(jnp.dot(frames, params["w_pre1"]), 0.0)
    mem = jnp.maximum(jnp.dot(h1, params["w_pre2"]), 0.0)
    return jnp.dot(mem, params["w_ih_a_m"]) + params["b_a"]     # (T_steps, B, 4Q)


# ----------------------------------------------------------------------------
# Parameter setup (plain JAX glue, PyTorch-compatible layouts).
# ----------------------------------------------------------------------------
def init_params(key, cfg):
    E = cfg["in_channels"]; F = cfg["frame_channels"]; r = cfg["r"]
    Q = cfg["query_dim"]; D = cfg["decoder_rnn_dim"]; P = cfg["prenet_dim"]
    A = cfg["attn_dim"]; NF = cfg["loc_filters"]; K = cfg["loc_kernel"]
    Fr = F * r
    keys = jax.random.split(key, 18)

    def w(k, shape, scale=0.1):
        return scale * jax.random.normal(k, shape, jnp.float32)

    w_ih_a = w(keys[2], (P + E, 4 * Q))
    w_ih_d = w(keys[11], (Q + E, 4 * D))
    w_proj = w(keys[14], (D + E, Fr))
    w_stop = w(keys[16], (D + Fr, 1))
    w_conv = w(keys[7], (NF, 2, K))          # PyTorch Conv1d layout (out, in, k)

    return dict(
        w_pre1=w(keys[0], (F, P)),
        w_pre2=w(keys[1], (P, P)),
        w_ih_a_m=w_ih_a[:P],                 # teacher-memory half (hoisted)
        w_ih_a_c=w_ih_a[P:],                 # context half (in kernel)
        w_hh_a=w(keys[3], (Q, 4 * Q)),
        b_a=w(keys[4], (1, 4 * Q)),          # b_ih + b_hh pre-summed
        w_query=w(keys[5], (Q, A)),
        w_inputs=w(keys[6], (E, A)),
        w_loc_w=jnp.transpose(w_conv[:, 0, :]),   # (K, NF) taps, channel 0
        w_loc_c=jnp.transpose(w_conv[:, 1, :]),   # (K, NF) taps, channel 1
        w_loc_lin=w(keys[8], (NF, A)),
        w_v=jnp.transpose(w(keys[9], (A, 1))),    # stored as (1, A)
        b_v=w(keys[10], (1, 1)),
        w_ih_d_q=w_ih_d[:Q],
        w_ih_d_c=w_ih_d[Q:],
        w_hh_d=w(keys[12], (D, 4 * D)),
        b_d=w(keys[13], (1, 4 * D)),         # b_ih + b_hh pre-summed
        w_proj_h=w_proj[:D],
        w_proj_c=w_proj[D:],
        b_proj=w(keys[15], (1, Fr)),
        w_stop_h=jnp.transpose(w_stop[:D]),       # (1, D)
        w_stop_o=jnp.transpose(w_stop[D:]),       # (1, Fr)
        b_stop=w(keys[17], (1, 1)),
    )


# ----------------------------------------------------------------------------
# Wrapper: teacher-forcing forward pass.
# ----------------------------------------------------------------------------
def decoder_forward(params, enc_inputs, memories, mask, cfg, batch_chunks=2):
    B, T_in, E = enc_inputs.shape
    F_ch = cfg["frame_channels"]; r = cfg["r"]
    Q = cfg["query_dim"]; D = cfg["decoder_rnn_dim"]; A = cfg["attn_dim"]
    K = cfg["loc_kernel"]
    pad = (K - 1) // 2
    T_pad = T_in + 2 * pad
    T_steps = memories.shape[1] // r
    Fr = F_ch * r

    # ---- hoisted teacher-forced compute (prenet + W_ih_a[:P] + b_a) ---------
    frames = _teacher_frames(memories.astype(jnp.float32), F_ch, r)
    pre_a = _hoisted_prenet_gates(params, frames)               # (T_steps, B, 4Q)

    # ---- batch padding / chunking (sublane multiple; 2 chunks feed the two
    #      TensorCores on v7x via the "parallel" grid axis) --------------------
    n_chunks = max(1, int(batch_chunks))
    Bc = -(-B // n_chunks)
    Bc = max(8, -(-Bc // 8) * 8)
    B_pad = Bc * n_chunks

    def pad_b(x, axis, value=0.0):
        widths = [(0, 0)] * x.ndim
        widths[axis] = (0, B_pad - B)
        return jnp.pad(x, widths, constant_values=value)

    pre_a_p = pad_b(pre_a, 1)
    enc_p = pad_b(enc_inputs.astype(jnp.float32), 0).astype(jnp.bfloat16)
    mask_p = pad_b(mask.astype(jnp.float32), 0, value=1.0)

    # ---- weights: bf16 MXU operands, f32 VPU-side weights, SMEM scalars -----
    bf16 = jnp.bfloat16
    w_bf16 = [params[k].astype(bf16) for k in
              ("w_ih_a_c", "w_hh_a", "w_query", "w_inputs", "w_loc_lin",
               "w_ih_d_q", "w_ih_d_c", "w_hh_d", "w_proj_h", "w_proj_c")]
    w_f32 = [params[k].astype(jnp.float32) for k in
             ("w_loc_w", "w_loc_c", "w_v", "b_d", "b_proj",
              "w_stop_h", "w_stop_o")]
    b_v = params["b_v"].reshape(1).astype(jnp.float32)
    b_stop = params["b_stop"].reshape(1).astype(jnp.float32)

    def resident_spec(p):     # constant block index -> single-buffered weight
        return pl.BlockSpec(p.shape, lambda c, t: (0,) * p.ndim,
                            pipeline_mode=pl.Buffered(1))

    smem_spec = pl.BlockSpec(memory_space=pltpu.MemorySpace.SMEM)

    in_specs = (
        [pl.BlockSpec((1, Bc, 4 * Q), lambda c, t: (t, c, 0)),   # pre_a (per step)
         pl.BlockSpec((Bc, T_in, E), lambda c, t: (c, 0, 0)),    # encoder outputs
         pl.BlockSpec((Bc, T_in), lambda c, t: (c, 0))]          # mask
        + [resident_spec(p) for p in w_bf16]
        + [resident_spec(p) for p in w_f32]
        + [smem_spec, smem_spec]                                 # b_v, b_stop
    )

    out_shape = (
        jax.ShapeDtypeStruct((T_steps, B_pad, Fr), jnp.float32),
        jax.ShapeDtypeStruct((T_steps, B_pad, 1), jnp.float32),
        jax.ShapeDtypeStruct((T_steps, B_pad, T_in), jnp.float32),
    )
    out_specs = (
        pl.BlockSpec((T_steps, Bc, Fr), lambda c, t: (0, c, 0)),
        pl.BlockSpec((T_steps, Bc, 1), lambda c, t: (0, c, 0)),
        pl.BlockSpec((T_steps, Bc, T_in), lambda c, t: (0, c, 0)),
    )
    scratch_shapes = [
        pltpu.VMEM((Bc, Q), jnp.float32),          # attention RNN hidden (query)
        pltpu.VMEM((Bc, Q), jnp.float32),          # attention RNN cell
        pltpu.VMEM((Bc, D), jnp.float32),          # decoder RNN hidden
        pltpu.VMEM((Bc, D), jnp.float32),          # decoder RNN cell
        pltpu.VMEM((Bc, E), jnp.float32),          # attention context
        pltpu.VMEM((Bc, T_pad), jnp.float32),      # attention weights (padded)
        pltpu.VMEM((Bc, T_pad), jnp.float32),      # cumulative attention (padded)
        pltpu.VMEM((Bc, T_in, A), jnp.float32),    # processed encoder inputs
    ]

    # explicit scoped-VMEM budget (resident weights + scratch + per-step tiles)
    def _nbytes(x):
        return x.size * x.dtype.itemsize
    weight_bytes = sum(_nbytes(p) for p in w_bf16 + w_f32)
    scratch_bytes = 4 * Bc * (2 * Q + 2 * D + E + 2 * T_pad + T_in * A)
    out_bytes = 2 * 4 * T_steps * Bc * (Fr + 1 + T_in)
    step_bytes = 2 * (4 * Bc * 4 * Q + 2 * Bc * T_in * E + 4 * Bc * T_in)
    vmem_limit = int(min(max(2 * (weight_bytes + scratch_bytes + out_bytes
                                  + step_bytes) + (4 << 20), 16 << 20), 96 << 20))

    kernel = functools.partial(_decoder_step_kernel, conv_pad=pad)
    out_seq, stop_seq, align_seq = pl.pallas_call(
        kernel,
        out_shape=out_shape,
        grid_spec=pltpu.PrefetchScalarGridSpec(
            num_scalar_prefetch=0,
            grid=(n_chunks, T_steps),
            in_specs=in_specs,
            out_specs=out_specs,
            scratch_shapes=scratch_shapes,
        ),
        compiler_params=pltpu.CompilerParams(
            dimension_semantics=("parallel", "arbitrary"),
            vmem_limit_bytes=vmem_limit,
        ),
    )(pre_a_p, enc_p, mask_p, *w_bf16, *w_f32, b_v, b_stop)

    # ---- _parse_outputs (+ strip batch padding) ------------------------------
    out_seq = out_seq[:, :B]
    stop_seq = stop_seq[:, :B]
    align_seq = align_seq[:, :B]
    outputs = jnp.transpose(out_seq, (1, 0, 2)).reshape(B, -1, F_ch)
    outputs = jnp.transpose(outputs, (0, 2, 1))                  # (B, F, T_mel)
    stop_tokens = jnp.transpose(stop_seq[:, :, 0], (1, 0))       # (B, T_steps)
    alignments = jnp.transpose(align_seq, (1, 0, 2))             # (B, T_steps, T_in)
    return outputs, alignments, stop_tokens


# ----------------------------------------------------------------------------
# Pure-JAX reference (mirrors the kernel math, eval mode) for validation.
# ----------------------------------------------------------------------------
def decoder_forward_ref(params, enc_inputs, memories, mask, cfg):
    B, T_in, E = enc_inputs.shape
    F_ch = cfg["frame_channels"]; r = cfg["r"]
    Q = cfg["query_dim"]; D = cfg["decoder_rnn_dim"]; A = cfg["attn_dim"]
    NF = cfg["loc_filters"]; K = cfg["loc_kernel"]
    pad = (K - 1) // 2
    T_steps = memories.shape[1] // r
    bf16, f32 = jnp.bfloat16, jnp.float32
    c = lambda k: params[k].astype(bf16)

    frames = _teacher_frames(memories.astype(f32), F_ch, r)
    pre_a = _hoisted_prenet_gates(params, frames)
    enc16 = enc_inputs.astype(bf16)
    proc_in = jnp.dot(enc16.reshape(B * T_in, E), c("w_inputs"),
                      preferred_element_type=f32).reshape(B, T_in, A)

    query = jnp.zeros((B, Q), f32); att_cell = jnp.zeros((B, Q), f32)
    dec_h = jnp.zeros((B, D), f32); dec_c = jnp.zeros((B, D), f32)
    ctx = jnp.zeros((B, E), f32)
    attn_w = jnp.zeros((B, T_in), f32); attn_cum = jnp.zeros((B, T_in), f32)

    outs, stops, aligns = [], [], []
    for t in range(T_steps):
        gates = (pre_a[t]
                 + jnp.dot(ctx.astype(bf16), c("w_ih_a_c"), preferred_element_type=f32)
                 + jnp.dot(query.astype(bf16), c("w_hh_a"), preferred_element_type=f32))
        i_g = jax.nn.sigmoid(gates[:, :Q]); f_g = jax.nn.sigmoid(gates[:, Q:2 * Q])
        g_g = jnp.tanh(gates[:, 2 * Q:3 * Q]); o_g = jax.nn.sigmoid(gates[:, 3 * Q:])
        att_cell = f_g * att_cell + i_g * g_g
        query = o_g * jnp.tanh(att_cell)

        proc_q = jnp.dot(query.astype(bf16), c("w_query"), preferred_element_type=f32)
        pw = jnp.pad(attn_w, ((0, 0), (pad, pad)))
        pc = jnp.pad(attn_cum, ((0, 0), (pad, pad)))
        loc_feat = jnp.zeros((B, T_in, NF), f32)
        for k in range(K):
            loc_feat = (loc_feat
                        + pw[:, k:k + T_in, None] * params["w_loc_w"][k][None, None, :]
                        + pc[:, k:k + T_in, None] * params["w_loc_c"][k][None, None, :])
        loc = jnp.dot(loc_feat.reshape(B * T_in, NF).astype(bf16), c("w_loc_lin"),
                      preferred_element_type=f32).reshape(B, T_in, A)
        ener = jnp.tanh(proc_q[:, None, :] + loc + proc_in)
        e = jnp.sum(ener * params["w_v"][None], axis=-1) + params["b_v"][0, 0]
        e = jnp.where(mask > 0.5, e, -1e30)
        e = e - jnp.max(e, axis=-1, keepdims=True)
        p = jnp.exp(e)
        align = p / jnp.sum(p, axis=-1, keepdims=True)
        attn_w = align
        attn_cum = attn_cum + align
        ctx = jnp.einsum('bqt,bte->bqe', align[:, None, :].astype(bf16), enc16,
                         preferred_element_type=f32)[:, 0]

        gates_d = (jnp.dot(query.astype(bf16), c("w_ih_d_q"), preferred_element_type=f32)
                   + jnp.dot(ctx.astype(bf16), c("w_ih_d_c"), preferred_element_type=f32)
                   + jnp.dot(dec_h.astype(bf16), c("w_hh_d"), preferred_element_type=f32)
                   + params["b_d"])
        i_d = jax.nn.sigmoid(gates_d[:, :D]); f_d = jax.nn.sigmoid(gates_d[:, D:2 * D])
        g_d = jnp.tanh(gates_d[:, 2 * D:3 * D]); o_d = jax.nn.sigmoid(gates_d[:, 3 * D:])
        dec_c = f_d * dec_c + i_d * g_d
        dec_h = o_d * jnp.tanh(dec_c)

        dec_out = (jnp.dot(dec_h.astype(bf16), c("w_proj_h"), preferred_element_type=f32)
                   + jnp.dot(ctx.astype(bf16), c("w_proj_c"), preferred_element_type=f32)
                   + params["b_proj"])
        stop = (jnp.sum(dec_h * params["w_stop_h"], axis=-1, keepdims=True)
                + jnp.sum(dec_out * params["w_stop_o"], axis=-1, keepdims=True)
                + params["b_stop"][0, 0])
        outs.append(dec_out); stops.append(stop); aligns.append(align)

    out_seq = jnp.stack(outs); stop_seq = jnp.stack(stops); align_seq = jnp.stack(aligns)
    outputs = jnp.transpose(out_seq, (1, 0, 2)).reshape(B, -1, F_ch)
    outputs = jnp.transpose(outputs, (0, 2, 1))
    stop_tokens = jnp.transpose(stop_seq[:, :, 0], (1, 0))
    alignments = jnp.transpose(align_seq, (1, 0, 2))
    return outputs, alignments, stop_tokens


# ----------------------------------------------------------------------------
if __name__ == "__main__":
    cfg = dict(
        in_channels=32,      # encoder embedding dim
        frame_channels=4,    # mel channels
        r=2,                 # reduction rate
        # real module: query_dim=decoder_rnn_dim=1024, prenet_dim=256, attn_dim=128
        query_dim=128, decoder_rnn_dim=128, prenet_dim=128, attn_dim=128,
        loc_filters=32, loc_kernel=31,
    )
    B, T_in, T_mel = 2, 8, 12

    key = jax.random.PRNGKey(0)
    k_enc, k_mem, k_par = jax.random.split(key, 3)
    enc_inputs = jax.random.normal(k_enc, (B, T_in, cfg["in_channels"]), jnp.float32)
    memories = jax.random.normal(k_mem, (B, T_mel, cfg["frame_channels"]), jnp.float32)
    mask = jnp.ones((B, T_in), jnp.float32)

    params = init_params(k_par, cfg)

    outputs, alignments, stop_tokens = decoder_forward(
        params, enc_inputs, memories, mask, cfg, batch_chunks=2)
    jax.block_until_ready((outputs, alignments, stop_tokens))

    T_steps = T_mel // cfg["r"]
    assert outputs.shape == (B, cfg["frame_channels"], T_mel)
    assert alignments.shape == (B, T_steps, T_in)
    assert stop_tokens.shape == (B, T_steps)
    assert bool(jnp.all(jnp.isfinite(outputs)))
    assert bool(jnp.allclose(jnp.sum(alignments, axis=-1), 1.0, atol=1e-4))

    # validate against a plain-JAX mirror of the same (eval-mode) math
    ref_out, ref_align, ref_stop = decoder_forward_ref(
        params, enc_inputs, memories, mask, cfg)
    assert bool(jnp.allclose(outputs, ref_out, rtol=3e-2, atol=3e-2))
    assert bool(jnp.allclose(alignments, ref_align, rtol=3e-2, atol=3e-2))
    assert bool(jnp.allclose(stop_tokens, ref_stop, rtol=3e-2, atol=3e-2))

    print("KERNEL_OK")
</pallas_src>

<mosaic_0001>
module attributes {stable_mosaic.version = 11 : i64} {
  func.func @_decoder_step_kernel(%arg0: i32, %arg1: i32, %arg2: memref<1x8x512xf32, #tpu.memory_space<vmem>>, %arg3: memref<8x8x32xbf16, #tpu.memory_space<vmem>>, %arg4: memref<8x8xf32, #tpu.memory_space<vmem>>, %arg5: memref<32x512xbf16, #tpu.memory_space<vmem>>, %arg6: memref<128x512xbf16, #tpu.memory_space<vmem>>, %arg7: memref<128x128xbf16, #tpu.memory_space<vmem>>, %arg8: memref<32x128xbf16, #tpu.memory_space<vmem>>, %arg9: memref<32x128xbf16, #tpu.memory_space<vmem>>, %arg10: memref<128x512xbf16, #tpu.memory_space<vmem>>, %arg11: memref<32x512xbf16, #tpu.memory_space<vmem>>, %arg12: memref<128x512xbf16, #tpu.memory_space<vmem>>, %arg13: memref<128x8xbf16, #tpu.memory_space<vmem>>, %arg14: memref<32x8xbf16, #tpu.memory_space<vmem>>, %arg15: memref<31x32xf32, #tpu.memory_space<vmem>>, %arg16: memref<31x32xf32, #tpu.memory_space<vmem>>, %arg17: memref<1x128xf32, #tpu.memory_space<vmem>>, %arg18: memref<1x512xf32, #tpu.memory_space<vmem>>, %arg19: memref<1x8xf32, #tpu.memory_space<vmem>>, %arg20: memref<1x128xf32, #tpu.memory_space<vmem>>, %arg21: memref<1x8xf32, #tpu.memory_space<vmem>>, %arg22: memref<1xf32, #tpu.memory_space<smem>>, %arg23: memref<1xf32, #tpu.memory_space<smem>>, %arg24: memref<6x8x8xf32, #tpu.memory_space<vmem>>, %arg25: memref<6x8x1xf32, #tpu.memory_space<vmem>>, %arg26: memref<6x8x8xf32, #tpu.memory_space<vmem>>, %arg27: memref<8x128xf32, #tpu.memory_space<vmem>>, %arg28: memref<8x128xf32, #tpu.memory_space<vmem>>, %arg29: memref<8x128xf32, #tpu.memory_space<vmem>>, %arg30: memref<8x128xf32, #tpu.memory_space<vmem>>, %arg31: memref<8x32xf32, #tpu.memory_space<vmem>>, %arg32: memref<8x38xf32, #tpu.memory_space<vmem>>, %arg33: memref<8x38xf32, #tpu.memory_space<vmem>>, %arg34: memref<8x8x128xf32, #tpu.memory_space<vmem>>) attributes {dimension_semantics = [#tpu.dimension_semantics<parallel>, #tpu.dimension_semantics<arbitrary>], iteration_bounds = array<i64: 2, 6>, scalar_prefetch = 0 : i64, scratch_operands = 8 : i64, tpu.core_type = #tpu.core_type<tc>, window_params = [{transform_indices = @transform_0, window_bounds = array<i64: 1, 8, 512>}, {transform_indices = @transform_1, window_bounds = array<i64: 8, 8, 32>}, {transform_indices = @transform_2, window_bounds = array<i64: 8, 8>}, {pipeline_mode = #tpu.pipeline_mode<synchronous>, transform_indices = @transform_3, window_bounds = array<i64: 32, 512>}, {pipeline_mode = #tpu.pipeline_mode<synchronous>, transform_indices = @transform_4, window_bounds = array<i64: 128, 512>}, {pipeline_mode = #tpu.pipeline_mode<synchronous>, transform_indices = @transform_5, window_bounds = array<i64: 128, 128>}, {pipeline_mode = #tpu.pipeline_mode<synchronous>, transform_indices = @transform_6, window_bounds = array<i64: 32, 128>}, {pipeline_mode = #tpu.pipeline_mode<synchronous>, transform_indices = @transform_7, window_bounds = array<i64: 32, 128>}, {pipeline_mode = #tpu.pipeline_mode<synchronous>, transform_indices = @transform_8, window_bounds = array<i64: 128, 512>}, {pipeline_mode = #tpu.pipeline_mode<synchronous>, transform_indices = @transform_9, window_bounds = array<i64: 32, 512>}, {pipeline_mode = #tpu.pipeline_mode<synchronous>, transform_indices = @transform_10, window_bounds = array<i64: 128, 512>}, {pipeline_mode = #tpu.pipeline_mode<synchronous>, transform_indices = @transform_11, window_bounds = array<i64: 128, 8>}, {pipeline_mode = #tpu.pipeline_mode<synchronous>, transform_indices = @transform_12, window_bounds = array<i64: 32, 8>}, {pipeline_mode = #tpu.pipeline_mode<synchronous>, transform_indices = @transform_13, window_bounds = array<i64: 31, 32>}, {pipeline_mode = #tpu.pipeline_mode<synchronous>, transform_indices = @transform_14, window_bounds = array<i64: 31, 32>}, {pipeline_mode = #tpu.pipeline_mode<synchronous>, transform_indices = @transform_15, window_bounds = array<i64: 1, 128>}, {pipeline_mode = #tpu.pipeline_mode<synchronous>, transform_indices = @transform_16, window_bounds = array<i64: 1, 512>}, {pipeline_mode = #tpu.pipeline_mode<synchronous>, transform_indices = @transform_17, window_bounds = array<i64: 1, 8>}, {pipeline_mode = #tpu.pipeline_mode<synchronous>, transform_indices = @transform_18, window_bounds = array<i64: 1, 128>}, {pipeline_mode = #tpu.pipeline_mode<synchronous>, transform_indices = @transform_19, window_bounds = array<i64: 1, 8>}, {transform_indices = @transform_20, window_bounds = array<i64: 1>}, {transform_indices = @transform_21, window_bounds = array<i64: 1>}, {transform_indices = @transform_22, window_bounds = array<i64: 6, 8, 8>}, {transform_indices = @transform_23, window_bounds = array<i64: 6, 8, 1>}, {transform_indices = @transform_24, window_bounds = array<i64: 6, 8, 8>}]} {
    %c0_i32 = arith.constant 0 : i32
    %0 = arith.cmpi eq, %arg1, %c0_i32 : i32
    %1 = arith.extui %0 : i1 to i32
    %c0_i32_0 = arith.constant 0 : i32
    %2 = arith.cmpi ne, %1, %c0_i32_0 : i32
    scf.if %2 {
      %cst_145 = arith.constant 0.000000e+00 : f32
      %440 = vector.broadcast %cst_145 : f32 to vector<8x128xf32>
      %c0_146 = arith.constant 0 : index
      %c0_147 = arith.constant 0 : index
      %441 = vector.load %arg27[%c0_146, %c0_147] : memref<8x128xf32, #tpu.memory_space<vmem>>, vector<8x128xf32>
      tpu.vector_store %arg27[%c0_146, %c0_147], %440 {strides = array<i32>} : memref<8x128xf32, #tpu.memory_space<vmem>>, vector<8x128xf32>,
      %cst_148 = arith.constant 0.000000e+00 : f32
      %442 = vector.broadcast %cst_148 : f32 to vector<8x128xf32>
      %c0_149 = arith.constant 0 : index
      %c0_150 = arith.constant 0 : index
      %443 = vector.load %arg28[%c0_149, %c0_150] : memref<8x128xf32, #tpu.memory_space<vmem>>, vector<8x128xf32>
      tpu.vector_store %arg28[%c0_149, %c0_150], %442 {strides = array<i32>} : memref<8x128xf32, #tpu.memory_space<vmem>>, vector<8x128xf32>,
      %cst_151 = arith.constant 0.000000e+00 : f32
      %444 = vector.broadcast %cst_151 : f32 to vector<8x128xf32>
      %c0_152 = arith.constant 0 : index
      %c0_153 = arith.constant 0 : index
      %445 = vector.load %arg29[%c0_152, %c0_153] : memref<8x128xf32, #tpu.memory_space<vmem>>, vector<8x128xf32>
      tpu.vector_store %arg29[%c0_152, %c0_153], %444 {strides = array<i32>} : memref<8x128xf32, #tpu.memory_space<vmem>>, vector<8x128xf32>,
      %cst_154 = arith.constant 0.000000e+00 : f32
      %446 = vector.broadcast %cst_154 : f32 to vector<8x128xf32>
      %c0_155 = arith.constant 0 : index
      %c0_156 = arith.constant 0 : index
      %447 = vector.load %arg30[%c0_155, %c0_156] : memref<8x128xf32, #tpu.memory_space<vmem>>, vector<8x128xf32>
      tpu.vector_store %arg30[%c0_155, %c0_156], %446 {strides = array<i32>} : memref<8x128xf32, #tpu.memory_space<vmem>>, vector<8x128xf32>,
      %cst_157 = arith.constant 0.000000e+00 : f32
      %448 = vector.broadcast %cst_157 : f32 to vector<8x32xf32>
      %c0_158 = arith.constant 0 : index
      %c0_159 = arith.constant 0 : index
      %449 = vector.load %arg31[%c0_158, %c0_159] : memref<8x32xf32, #tpu.memory_space<vmem>>, vector<8x32xf32>
      tpu.vector_store %arg31[%c0_158, %c0_159], %448 {strides = array<i32>} : memref<8x32xf32, #tpu.memory_space<vmem>>, vector<8x32xf32>,
      %cst_160 = arith.constant 0.000000e+00 : f32
      %450 = vector.broadcast %cst_160 : f32 to vector<8x38xf32>
      %c0_161 = arith.constant 0 : index
      %c0_162 = arith.constant 0 : index
      %451 = vector.load %arg32[%c0_161, %c0_162] : memref<8x38xf32, #tpu.memory_space<vmem>>, vector<8x38xf32>
      tpu.vector_store %arg32[%c0_161, %c0_162], %450 {strides = array<i32>} : memref<8x38xf32, #tpu.memory_space<vmem>>, vector<8x38xf32>,
      %cst_163 = arith.constant 0.000000e+00 : f32
      %452 = vector.broadcast %cst_163 : f32 to vector<8x38xf32>
      %c0_164 = arith.constant 0 : index
      %c0_165 = arith.constant 0 : index
      %453 = vector.load %arg33[%c0_164, %c0_165] : memref<8x38xf32, #tpu.memory_space<vmem>>, vector<8x38xf32>
      tpu.vector_store %arg33[%c0_164, %c0_165], %452 {strides = array<i32>} : memref<8x38xf32, #tpu.memory_space<vmem>>, vector<8x38xf32>,
      %c0_166 = arith.constant 0 : index
      %c0_167 = arith.constant 0 : index
      %c0_168 = arith.constant 0 : index
      %454 = vector.load %arg3[%c0_166, %c0_167, %c0_168] : memref<8x8x32xbf16, #tpu.memory_space<vmem>>, vector<8x8x32xbf16>
      %455 = vector.shape_cast %454 : vector<8x8x32xbf16> to vector<64x32xbf16>
      %c0_169 = arith.constant 0 : index
      %c0_170 = arith.constant 0 : index
      %456 = vector.load %arg8[%c0_169, %c0_170] : memref<32x128xbf16, #tpu.memory_space<vmem>>, vector<32x128xbf16>
      %cst_171 = arith.constant dense<0.000000e+00> : vector<64x128xf32>
      %457 = tpu.matmul %455, %456, %cst_171 {dimension_numbers = #tpu.dot_dimension_numbers<[1], [0], [0], [1], [0, 0, 1, 1], [], []>} : vector<64x32xbf16>, vector<32x128xbf16>, vector<64x128xf32> -> vector<64x128xf32>
      %458 = vector.shape_cast %457 : vector<64x128xf32> to vector<8x8x128xf32>
      %c0_172 = arith.constant 0 : index
      %c0_173 = arith.constant 0 : index
      %c0_174 = arith.constant 0 : index
      %459 = vector.load %arg34[%c0_172, %c0_173, %c0_174] : memref<8x8x128xf32, #tpu.memory_space<vmem>>, vector<8x8x128xf32>
      tpu.vector_store %arg34[%c0_172, %c0_173, %c0_174], %458 {strides = array<i32>} : memref<8x8x128xf32, #tpu.memory_space<vmem>>, vector<8x8x128xf32>,
    } else {
    }
    %c0 = arith.constant 0 : index
    %c0_1 = arith.constant 0 : index
    %3 = vector.load %arg31[%c0, %c0_1] : memref<8x32xf32, #tpu.memory_space<vmem>>, vector<8x32xf32>
    %c0_2 = arith.constant 0 : index
    %c0_3 = arith.constant 0 : index
    %4 = vector.load %arg27[%c0_2, %c0_3] : memref<8x128xf32, #tpu.memory_space<vmem>>, vector<8x128xf32>
    %c0_4 = arith.constant 0 : index
    %c0_5 = arith.constant 0 : index
    %c0_6 = arith.constant 0 : index
    %5 = vector.load %arg2[%c0_4, %c0_5, %c0_6] : memref<1x8x512xf32, #tpu.memory_space<vmem>>, vector<1x8x512xf32>
    %6 = vector.shape_cast %5 : vector<1x8x512xf32> to vector<8x512xf32>
    %7 = arith.truncf %3 : vector<8x32xf32> to vector<8x32xbf16>
    %c0_7 = arith.constant 0 : index
    %c0_8 = arith.constant 0 : index
    %8 = vector.load %arg5[%c0_7, %c0_8] : memref<32x512xbf16, #tpu.memory_space<vmem>>, vector<32x512xbf16>
    %cst = arith.constant dense<0.000000e+00> : vector<8x512xf32>
    %9 = tpu.matmul %7, %8, %cst {dimension_numbers = #tpu.dot_dimension_numbers<[1], [0], [0], [1], [0, 0, 1, 1], [], []>} : vector<8x32xbf16>, vector<32x512xbf16>, vector<8x512xf32> -> vector<8x512xf32>
    %10 = arith.addf %6, %9 : vector<8x512xf32>
    %11 = arith.truncf %4 : vector<8x128xf32> to vector<8x128xbf16>
    %c0_9 = arith.constant 0 : index
    %c0_10 = arith.constant 0 : index
    %12 = vector.load %arg6[%c0_9, %c0_10] : memref<128x512xbf16, #tpu.memory_space<vmem>>, vector<128x512xbf16>
    %cst_11 = arith.constant dense<0.000000e+00> : vector<8x512xf32>
    %13 = tpu.matmul %11, %12, %cst_11 {dimension_numbers = #tpu.dot_dimension_numbers<[1], [0], [0], [1], [0, 0, 1, 1], [], []>} : vector<8x128xbf16>, vector<128x512xbf16>, vector<8x512xf32> -> vector<8x512xf32>
    %14 = arith.addf %10, %13 : vector<8x512xf32>
    %15 = vector.extract_strided_slice %14 {offsets = [0, 0], sizes = [8, 128], strides = [1, 1]} : vector<8x512xf32> to vector<8x128xf32>
    %16 = arith.negf %15 : vector<8x128xf32>
    %17 = math.exp %16 : vector<8x128xf32>
    %cst_12 = arith.constant 1.000000e+00 : f32
    %18 = vector.broadcast %cst_12 : f32 to vector<8x128xf32>
    %19 = arith.addf %18, %17 : vector<8x128xf32>
    %20 = arith.divf %18, %19 : vector<8x128xf32>
    %21 = vector.extract_strided_slice %14 {offsets = [0, 128], sizes = [8, 128], strides = [1, 1]} : vector<8x512xf32> to vector<8x128xf32>
    %22 = arith.negf %21 : vector<8x128xf32>
    %23 = math.exp %22 : vector<8x128xf32>
    %cst_13 = arith.constant 1.000000e+00 : f32
    %24 = vector.broadcast %cst_13 : f32 to vector<8x128xf32>
    %25 = arith.addf %24, %23 : vector<8x128xf32>
    %26 = arith.divf %24, %25 : vector<8x128xf32>
    %27 = vector.extract_strided_slice %14 {offsets = [0, 256], sizes = [8, 128], strides = [1, 1]} : vector<8x512xf32> to vector<8x128xf32>
    %28 = math.tanh %27 : vector<8x128xf32>
    %29 = vector.extract_strided_slice %14 {offsets = [0, 384], sizes = [8, 128], strides = [1, 1]} : vector<8x512xf32> to vector<8x128xf32>
    %30 = arith.negf %29 : vector<8x128xf32>
    %31 = math.exp %30 : vector<8x128xf32>
    %cst_14 = arith.constant 1.000000e+00 : f32
    %32 = vector.broadcast %cst_14 : f32 to vector<8x128xf32>
    %33 = arith.addf %32, %31 : vector<8x128xf32>
    %34 = arith.divf %32, %33 : vector<8x128xf32>
    %c0_15 = arith.constant 0 : index
    %c0_16 = arith.constant 0 : index
    %35 = vector.load %arg28[%c0_15, %c0_16] : memref<8x128xf32, #tpu.memory_space<vmem>>, vector<8x128xf32>
    %36 = arith.mulf %26, %35 : vector<8x128xf32>
    %37 = arith.mulf %20, %28 : vector<8x128xf32>
    %38 = arith.addf %36, %37 : vector<8x128xf32>
    %39 = math.tanh %38 : vector<8x128xf32>
    %40 = arith.mulf %34, %39 : vector<8x128xf32>
    %c0_17 = arith.constant 0 : index
    %c0_18 = arith.constant 0 : index
    %41 = vector.load %arg28[%c0_17, %c0_18] : memref<8x128xf32, #tpu.memory_space<vmem>>, vector<8x128xf32>
    tpu.vector_store %arg28[%c0_17, %c0_18], %38 {strides = array<i32>} : memref<8x128xf32, #tpu.memory_space<vmem>>, vector<8x128xf32>,
    %c0_19 = arith.constant 0 : index
    %c0_20 = arith.constant 0 : index
    %42 = vector.load %arg27[%c0_19, %c0_20] : memref<8x128xf32, #tpu.memory_space<vmem>>, vector<8x128xf32>
    tpu.vector_store %arg27[%c0_19, %c0_20], %40 {strides = array<i32>} : memref<8x128xf32, #tpu.memory_space<vmem>>, vector<8x128xf32>,
    %43 = arith.truncf %40 : vector<8x128xf32> to vector<8x128xbf16>
    %c0_21 = arith.constant 0 : index
    %c0_22 = arith.constant 0 : index
    %44 = vector.load %arg7[%c0_21, %c0_22] : memref<128x128xbf16, #tpu.memory_space<vmem>>, vector<128x128xbf16>
    %cst_23 = arith.constant dense<0.000000e+00> : vector<8x128xf32>
    %45 = tpu.matmul %43, %44, %cst_23 {dimension_numbers = #tpu.dot_dimension_numbers<[1], [0], [0], [1], [0, 0, 1, 1], [], []>} : vector<8x128xbf16>, vector<128x128xbf16>, vector<8x128xf32> -> vector<8x128xf32>
    %c0_24 = arith.constant 0 : index
    %c0_25 = arith.constant 0 : index
    %46 = vector.load %arg15[%c0_24, %c0_25] : memref<31x32xf32, #tpu.memory_space<vmem>>, vector<31x32xf32>
    %c0_26 = arith.constant 0 : index
    %c0_27 = arith.constant 0 : index
    %47 = vector.load %arg16[%c0_26, %c0_27] : memref<31x32xf32, #tpu.memory_space<vmem>>, vector<31x32xf32>
    %cst_28 = arith.constant 0.000000e+00 : f32
    %48 = vector.broadcast %cst_28 : f32 to vector<8x8x32xf32>
    %c0_29 = arith.constant 0 : index
    %c8 = arith.constant 8 : index
    %49 = vector.load %arg32[%c0_29, %c8] : memref<8x38xf32, #tpu.memory_space<vmem>>, vector<8x8xf32>
    %c0_30 = arith.constant 0 : index
    %c8_31 = arith.constant 8 : index
    %50 = vector.load %arg33[%c0_30, %c8_31] : memref<8x38xf32, #tpu.memory_space<vmem>>, vector<8x8xf32>
    %51 = vector.shape_cast %49 : vector<8x8xf32> to vector<8x8x1xf32>
    %52 = vector.extract_strided_slice %46 {offsets = [8, 0], sizes = [1, 32], strides = [1, 1]} : vector<31x32xf32> to vector<1x32xf32>
    %53 = vector.shape_cast %52 : vector<1x32xf32> to vector<32xf32>
    %54 = vector.shape_cast %53 : vector<32xf32> to vector<1x1x32xf32>
    %55 = vector.broadcast %51 : vector<8x8x1xf32> to vector<8x8x32xf32>
    %56 = vector.broadcast %54 : vector<1x1x32xf32> to vector<8x8x32xf32>
    %57 = arith.mulf %55, %56 : vector<8x8x32xf32>
    %58 = arith.addf %48, %57 : vector<8x8x32xf32>
    %59 = vector.shape_cast %50 : vector<8x8xf32> to vector<8x8x1xf32>
    %60 = vector.extract_strided_slice %47 {offsets = [8, 0], sizes = [1, 32], strides = [1, 1]} : vector<31x32xf32> to vector<1x32xf32>
    %61 = vector.shape_cast %60 : vector<1x32xf32> to vector<32xf32>
    %62 = vector.shape_cast %61 : vector<32xf32> to vector<1x1x32xf32>
    %63 = vector.broadcast %59 : vector<8x8x1xf32> to vector<8x8x32xf32>
    %64 = vector.broadcast %62 : vector<1x1x32xf32> to vector<8x8x32xf32>
    %65 = arith.mulf %63, %64 : vector<8x8x32xf32>
    %66 = arith.addf %58, %65 : vector<8x8x32xf32>
    %c0_32 = arith.constant 0 : index
    %c9 = arith.constant 9 : index
    %67 = vector.load %arg32[%c0_32, %c9] : memref<8x38xf32, #tpu.memory_space<vmem>>, vector<8x8xf32>
    %c0_33 = arith.constant 0 : index
    %c9_34 = arith.constant 9 : index
    %68 = vector.load %arg33[%c0_33, %c9_34] : memref<8x38xf32, #tpu.memory_space<vmem>>, vector<8x8xf32>
    %69 = vector.shape_cast %67 : vector<8x8xf32> to vector<8x8x1xf32>
    %70 = vector.extract_strided_slice %46 {offsets = [9, 0], sizes = [1, 32], strides = [1, 1]} : vector<31x32xf32> to vector<1x32xf32>
    %71 = vector.shape_cast %70 : vector<1x32xf32> to vector<32xf32>
    %72 = vector.shape_cast %71 : vector<32xf32> to vector<1x1x32xf32>
    %73 = vector.broadcast %69 : vector<8x8x1xf32> to vector<8x8x32xf32>
    %74 = vector.broadcast %72 : vector<1x1x32xf32> to vector<8x8x32xf32>
    %75 = arith.mulf %73, %74 : vector<8x8x32xf32>
    %76 = arith.addf %66, %75 : vector<8x8x32xf32>
    %77 = vector.shape_cast %68 : vector<8x8xf32> to vector<8x8x1xf32>
    %78 = vector.extract_strided_slice %47 {offsets = [9, 0], sizes = [1, 32], strides = [1, 1]} : vector<31x32xf32> to vector<1x32xf32>
    %79 = vector.shape_cast %78 : vector<1x32xf32> to vector<32xf32>
    %80 = vector.shape_cast %79 : vector<32xf32> to vector<1x1x32xf32>
    %81 = vector.broadcast %77 : vector<8x8x1xf32> to vector<8x8x32xf32>
    %82 = vector.broadcast %80 : vector<1x1x32xf32> to vector<8x8x32xf32>
    %83 = arith.mulf %81, %82 : vector<8x8x32xf32>
    %84 = arith.addf %76, %83 : vector<8x8x32xf32>
    %c0_35 = arith.constant 0 : index
    %c10 = arith.constant 10 : index
    %85 = vector.load %arg32[%c0_35, %c10] : memref<8x38xf32, #tpu.memory_space<vmem>>, vector<8x8xf32>
    %c0_36 = arith.constant 0 : index
    %c10_37 = arith.constant 10 : index
    %86 = vector.load %arg33[%c0_36, %c10_37] : memref<8x38xf32, #tpu.memory_space<vmem>>, vector<8x8xf32>
    %87 = vector.shape_cast %85 : vector<8x8xf32> to vector<8x8x1xf32>
    %88 = vector.extract_strided_slice %46 {offsets = [10, 0], sizes = [1, 32], strides = [1, 1]} : vector<31x32xf32> to vector<1x32xf32>
    %89 = vector.shape_cast %88 : vector<1x32xf32> to vector<32xf32>
    %90 = vector.shape_cast %89 : vector<32xf32> to vector<1x1x32xf32>
    %91 = vector.broadcast %87 : vector<8x8x1xf32> to vector<8x8x32xf32>
    %92 = vector.broadcast %90 : vector<1x1x32xf32> to vector<8x8x32xf32>
    %93 = arith.mulf %91, %92 : vector<8x8x32xf32>
    %94 = arith.addf %84, %93 : vector<8x8x32xf32>
    %95 = vector.shape_cast %86 : vector<8x8xf32> to vector<8x8x1xf32>
    %96 = vector.extract_strided_slice %47 {offsets = [10, 0], sizes = [1, 32], strides = [1, 1]} : vector<31x32xf32> to vector<1x32xf32>
    %97 = vector.shape_cast %96 : vector<1x32xf32> to vector<32xf32>
    %98 = vector.shape_cast %97 : vector<32xf32> to vector<1x1x32xf32>
    %99 = vector.broadcast %95 : vector<8x8x1xf32> to vector<8x8x32xf32>
    %100 = vector.broadcast %98 : vector<1x1x32xf32> to vector<8x8x32xf32>
    %101 = arith.mulf %99, %100 : vector<8x8x32xf32>
    %102 = arith.addf %94, %101 : vector<8x8x32xf32>
    %c0_38 = arith.constant 0 : index
    %c11 = arith.constant 11 : index
    %103 = vector.load %arg32[%c0_38, %c11] : memref<8x38xf32, #tpu.memory_space<vmem>>, vector<8x8xf32>
    %c0_39 = arith.constant 0 : index
    %c11_40 = arith.constant 11 : index
    %104 = vector.load %arg33[%c0_39, %c11_40] : memref<8x38xf32, #tpu.memory_space<vmem>>, vector<8x8xf32>
    %105 = vector.shape_cast %103 : vector<8x8xf32> to vector<8x8x1xf32>
    %106 = vector.extract_strided_slice %46 {offsets = [11, 0], sizes = [1, 32], strides = [1, 1]} : vector<31x32xf32> to vector<1x32xf32>
    %107 = vector.shape_cast %106 : vector<1x32xf32> to vector<32xf32>
    %108 = vector.shape_cast %107 : vector<32xf32> to vector<1x1x32xf32>
    %109 = vector.broadcast %105 : vector<8x8x1xf32> to vector<8x8x32xf32>
    %110 = vector.broadcast %108 : vector<1x1x32xf32> to vector<8x8x32xf32>
    %111 = arith.mulf %109, %110 : vector<8x8x32xf32>
    %112 = arith.addf %102, %111 : vector<8x8x32xf32>
    %113 = vector.shape_cast %104 : vector<8x8xf32> to vector<8x8x1xf32>
    %114 = vector.extract_strided_slice %47 {offsets = [11, 0], sizes = [1, 32], strides = [1, 1]} : vector<31x32xf32> to vector<1x32xf32>
    %115 = vector.shape_cast %114 : vector<1x32xf32> to vector<32xf32>
    %116 = vector.shape_cast %115 : vector<32xf32> to vector<1x1x32xf32>
    %117 = vector.broadcast %113 : vector<8x8x1xf32> to vector<8x8x32xf32>
    %118 = vector.broadcast %116 : vector<1x1x32xf32> to vector<8x8x32xf32>
    %119 = arith.mulf %117, %118 : vector<8x8x32xf32>
    %120 = arith.addf %112, %119 : vector<8x8x32xf32>
    %c0_41 = arith.constant 0 : index
    %c12 = arith.constant 12 : index
    %121 = vector.load %arg32[%c0_41, %c12] : memref<8x38xf32, #tpu.memory_space<vmem>>, vector<8x8xf32>
    %c0_42 = arith.constant 0 : index
    %c12_43 = arith.constant 12 : index
    %122 = vector.load %arg33[%c0_42, %c12_43] : memref<8x38xf32, #tpu.memory_space<vmem>>, vector<8x8xf32>
    %123 = vector.shape_cast %121 : vector<8x8xf32> to vector<8x8x1xf32>
    %124 = vector.extract_strided_slice %46 {offsets = [12, 0], sizes = [1, 32], strides = [1, 1]} : vector<31x32xf32> to vector<1x32xf32>
    %125 = vector.shape_cast %124 : vector<1x32xf32> to vector<32xf32>
    %126 = vector.shape_cast %125 : vector<32xf32> to vector<1x1x32xf32>
    %127 = vector.broadcast %123 : vector<8x8x1xf32> to vector<8x8x32xf32>
    %128 = vector.broadcast %126 : vector<1x1x32xf32> to vector<8x8x32xf32>
    %129 = arith.mulf %127, %128 : vector<8x8x32xf32>
    %130 = arith.addf %120, %129 : vector<8x8x32xf32>
    %131 = vector.shape_cast %122 : vector<8x8xf32> to vector<8x8x1xf32>
    %132 = vector.extract_strided_slice %47 {offsets = [12, 0], sizes = [1, 32], strides = [1, 1]} : vector<31x32xf32> to vector<1x32xf32>
    %133 = vector.shape_cast %132 : vector<1x32xf32> to vector<32xf32>
    %134 = vector.shape_cast %133 : vector<32xf32> to vector<1x1x32xf32>
    %135 = vector.broadcast %131 : vector<8x8x1xf32> to vector<8x8x32xf32>
    %136 = vector.broadcast %134 : vector<1x1x32xf32> to vector<8x8x32xf32>
    %137 = arith.mulf %135, %136 : vector<8x8x32xf32>
    %138 = arith.addf %130, %137 : vector<8x8x32xf32>
    %c0_44 = arith.constant 0 : index
    %c13 = arith.constant 13 : index
    %139 = vector.load %arg32[%c0_44, %c13] : memref<8x38xf32, #tpu.memory_space<vmem>>, vector<8x8xf32>
    %c0_45 = arith.constant 0 : index
    %c13_46 = arith.constant 13 : index
    %140 = vector.load %arg33[%c0_45, %c13_46] : memref<8x38xf32, #tpu.memory_space<vmem>>, vector<8x8xf32>
    %141 = vector.shape_cast %139 : vector<8x8xf32> to vector<8x8x1xf32>
    %142 = vector.extract_strided_slice %46 {offsets = [13, 0], sizes = [1, 32], strides = [1, 1]} : vector<31x32xf32> to vector<1x32xf32>
    %143 = vector.shape_cast %142 : vector<1x32xf32> to vector<32xf32>
    %144 = vector.shape_cast %143 : vector<32xf32> to vector<1x1x32xf32>
    %145 = vector.broadcast %141 : vector<8x8x1xf32> to vector<8x8x32xf32>
    %146 = vector.broadcast %144 : vector<1x1x32xf32> to vector<8x8x32xf32>
    %147 = arith.mulf %145, %146 : vector<8x8x32xf32>
    %148 = arith.addf %138, %147 : vector<8x8x32xf32>
    %149 = vector.shape_cast %140 : vector<8x8xf32> to vector<8x8x1xf32>
    %150 = vector.extract_strided_slice %47 {offsets = [13, 0], sizes = [1, 32], strides = [1, 1]} : vector<31x32xf32> to vector<1x32xf32>
    %151 = vector.shape_cast %150 : vector<1x32xf32> to vector<32xf32>
    %152 = vector.shape_cast %151 : vector<32xf32> to vector<1x1x32xf32>
    %153 = vector.broadcast %149 : vector<8x8x1xf32> to vector<8x8x32xf32>
    %154 = vector.broadcast %152 : vector<1x1x32xf32> to vector<8x8x32xf32>
    %155 = arith.mulf %153, %154 : vector<8x8x32xf32>
    %156 = arith.addf %148, %155 : vector<8x8x32xf32>
    %c0_47 = arith.constant 0 : index
    %c14 = arith.constant 14 : index
    %157 = vector.load %arg32[%c0_47, %c14] : memref<8x38xf32, #tpu.memory_space<vmem>>, vector<8x8xf32>
    %c0_48 = arith.constant 0 : index
    %c14_49 = arith.constant 14 : index
    %158 = vector.load %arg33[%c0_48, %c14_49] : memref<8x38xf32, #tpu.memory_space<vmem>>, vector<8x8xf32>
    %159 = vector.shape_cast %157 : vector<8x8xf32> to vector<8x8x1xf32>
    %160 = vector.extract_strided_slice %46 {offsets = [14, 0], sizes = [1, 32], strides = [1, 1]} : vector<31x32xf32> to vector<1x32xf32>
    %161 = vector.shape_cast %160 : vector<1x32xf32> to vector<32xf32>
    %162 = vector.shape_cast %161 : vector<32xf32> to vector<1x1x32xf32>
    %163 = vector.broadcast %159 : vector<8x8x1xf32> to vector<8x8x32xf32>
    %164 = vector.broadcast %162 : vector<1x1x32xf32> to vector<8x8x32xf32>
    %165 = arith.mulf %163, %164 : vector<8x8x32xf32>
    %166 = arith.addf %156, %165 : vector<8x8x32xf32>
    %167 = vector.shape_cast %158 : vector<8x8xf32> to vector<8x8x1xf32>
    %168 = vector.extract_strided_slice %47 {offsets = [14, 0], sizes = [1, 32], strides = [1, 1]} : vector<31x32xf32> to vector<1x32xf32>
    %169 = vector.shape_cast %168 : vector<1x32xf32> to vector<32xf32>
    %170 = vector.shape_cast %169 : vector<32xf32> to vector<1x1x32xf32>
    %171 = vector.broadcast %167 : vector<8x8x1xf32> to vector<8x8x32xf32>
    %172 = vector.broadcast %170 : vector<1x1x32xf32> to vector<8x8x32xf32>
    %173 = arith.mulf %171, %172 : vector<8x8x32xf32>
    %174 = arith.addf %166, %173 : vector<8x8x32xf32>
    %c0_50 = arith.constant 0 : index
    %c15 = arith.constant 15 : index
    %175 = vector.load %arg32[%c0_50, %c15] : memref<8x38xf32, #tpu.memory_space<vmem>>, vector<8x8xf32>
    %c0_51 = arith.constant 0 : index
    %c15_52 = arith.constant 15 : index
    %176 = vector.load %arg33[%c0_51, %c15_52] : memref<8x38xf32, #tpu.memory_space<vmem>>, vector<8x8xf32>
    %177 = vector.shape_cast %175 : vector<8x8xf32> to vector<8x8x1xf32>
    %178 = vector.extract_strided_slice %46 {offsets = [15, 0], sizes = [1, 32], strides = [1, 1]} : vector<31x32xf32> to vector<1x32xf32>
    %179 = vector.shape_cast %178 : vector<1x32xf32> to vector<32xf32>
    %180 = vector.shape_cast %179 : vector<32xf32> to vector<1x1x32xf32>
    %181 = vector.broadcast %177 : vector<8x8x1xf32> to vector<8x8x32xf32>
    %182 = vector.broadcast %180 : vector<1x1x32xf32> to vector<8x8x32xf32>
    %183 = arith.mulf %181, %182 : vector<8x8x32xf32>
    %184 = arith.addf %174, %183 : vector<8x8x32xf32>
    %185 = vector.shape_cast %176 : vector<8x8xf32> to vector<8x8x1xf32>
    %186 = vector.extract_strided_slice %47 {offsets = [15, 0], sizes = [1, 32], strides = [1, 1]} : vector<31x32xf32> to vector<1x32xf32>
    %187 = vector.shape_cast %186 : vector<1x32xf32> to vector<32xf32>
    %188 = vector.shape_cast %187 : vector<32xf32> to vector<1x1x32xf32>
    %189 = vector.broadcast %185 : vector<8x8x1xf32> to vector<8x8x32xf32>
    %190 = vector.broadcast %188 : vector<1x1x32xf32> to vector<8x8x32xf32>
    %191 = arith.mulf %189, %190 : vector<8x8x32xf32>
    %192 = arith.addf %184, %191 : vector<8x8x32xf32>
    %c0_53 = arith.constant 0 : index
    %c16 = arith.constant 16 : index
    %193 = vector.load %arg32[%c0_53, %c16] : memref<8x38xf32, #tpu.memory_space<vmem>>, vector<8x8xf32>
    %c0_54 = arith.constant 0 : index
    %c16_55 = arith.constant 16 : index
    %194 = vector.load %arg33[%c0_54, %c16_55] : memref<8x38xf32, #tpu.memory_space<vmem>>, vector<8x8xf32>
    %195 = vector.shape_cast %193 : vector<8x8xf32> to vector<8x8x1xf32>
    %196 = vector.extract_strided_slice %46 {offsets = [16, 0], sizes = [1, 32], strides = [1, 1]} : vector<31x32xf32> to vector<1x32xf32>
    %197 = vector.shape_cast %196 : vector<1x32xf32> to vector<32xf32>
    %198 = vector.shape_cast %197 : vector<32xf32> to vector<1x1x32xf32>
    %199 = vector.broadcast %195 : vector<8x8x1xf32> to vector<8x8x32xf32>
    %200 = vector.broadcast %198 : vector<1x1x32xf32> to vector<8x8x32xf32>
    %201 = arith.mulf %199, %200 : vector<8x8x32xf32>
    %202 = arith.addf %192, %201 : vector<8x8x32xf32>
    %203 = vector.shape_cast %194 : vector<8x8xf32> to vector<8x8x1xf32>
    %204 = vector.extract_strided_slice %47 {offsets = [16, 0], sizes = [1, 32], strides = [1, 1]} : vector<31x32xf32> to vector<1x32xf32>
    %205 = vector.shape_cast %204 : vector<1x32xf32> to vector<32xf32>
    %206 = vector.shape_cast %205 : vector<32xf32> to vector<1x1x32xf32>
    %207 = vector.broadcast %203 : vector<8x8x1xf32> to vector<8x8x32xf32>
    %208 = vector.broadcast %206 : vector<1x1x32xf32> to vector<8x8x32xf32>
    %209 = arith.mulf %207, %208 : vector<8x8x32xf32>
    %210 = arith.addf %202, %209 : vector<8x8x32xf32>
    %c0_56 = arith.constant 0 : index
    %c17 = arith.constant 17 : index
    %211 = vector.load %arg32[%c0_56, %c17] : memref<8x38xf32, #tpu.memory_space<vmem>>, vector<8x8xf32>
    %c0_57 = arith.constant 0 : index
    %c17_58 = arith.constant 17 : index
    %212 = vector.load %arg33[%c0_57, %c17_58] : memref<8x38xf32, #tpu.memory_space<vmem>>, vector<8x8xf32>
    %213 = vector.shape_cast %211 : vector<8x8xf32> to vector<8x8x1xf32>
    %214 = vector.extract_strided_slice %46 {offsets = [17, 0], sizes = [1, 32], strides = [1, 1]} : vector<31x32xf32> to vector<1x32xf32>
    %215 = vector.shape_cast %214 : vector<1x32xf32> to vector<32xf32>
    %216 = vector.shape_cast %215 : vector<32xf32> to vector<1x1x32xf32>
    %217 = vector.broadcast %213 : vector<8x8x1xf32> to vector<8x8x32xf32>
    %218 = vector.broadcast %216 : vector<1x1x32xf32> to vector<8x8x32xf32>
    %219 = arith.mulf %217, %218 : vector<8x8x32xf32>
    %220 = arith.addf %210, %219 : vector<8x8x32xf32>
    %221 = vector.shape_cast %212 : vector<8x8xf32> to vector<8x8x1xf32>
    %222 = vector.extract_strided_slice %47 {offsets = [17, 0], sizes = [1, 32], strides = [1, 1]} : vector<31x32xf32> to vector<1x32xf32>
    %223 = vector.shape_cast %222 : vector<1x32xf32> to vector<32xf32>
    %224 = vector.shape_cast %223 : vector<32xf32> to vector<1x1x32xf32>
    %225 = vector.broadcast %221 : vector<8x8x1xf32> to vector<8x8x32xf32>
    %226 = vector.broadcast %224 : vector<1x1x32xf32> to vector<8x8x32xf32>
    %227 = arith.mulf %225, %226 : vector<8x8x32xf32>
    %228 = arith.addf %220, %227 : vector<8x8x32xf32>
    %c0_59 = arith.constant 0 : index
    %c18 = arith.constant 18 : index
    %229 = vector.load %arg32[%c0_59, %c18] : memref<8x38xf32, #tpu.memory_space<vmem>>, vector<8x8xf32>
    %c0_60 = arith.constant 0 : index
    %c18_61 = arith.constant 18 : index
    %230 = vector.load %arg33[%c0_60, %c18_61] : memref<8x38xf32, #tpu.memory_space<vmem>>, vector<8x8xf32>
    %231 = vector.shape_cast %229 : vector<8x8xf32> to vector<8x8x1xf32>
    %232 = vector.extract_strided_slice %46 {offsets = [18, 0], sizes = [1, 32], strides = [1, 1]} : vector<31x32xf32> to vector<1x32xf32>
    %233 = vector.shape_cast %232 : vector<1x32xf32> to vector<32xf32>
    %234 = vector.shape_cast %233 : vector<32xf32> to vector<1x1x32xf32>
    %235 = vector.broadcast %231 : vector<8x8x1xf32> to vector<8x8x32xf32>
    %236 = vector.broadcast %234 : vector<1x1x32xf32> to vector<8x8x32xf32>
    %237 = arith.mulf %235, %236 : vector<8x8x32xf32>
    %238 = arith.addf %228, %237 : vector<8x8x32xf32>
    %239 = vector.shape_cast %230 : vector<8x8xf32> to vector<8x8x1xf32>
    %240 = vector.extract_strided_slice %47 {offsets = [18, 0], sizes = [1, 32], strides = [1, 1]} : vector<31x32xf32> to vector<1x32xf32>
    %241 = vector.shape_cast %240 : vector<1x32xf32> to vector<32xf32>
    %242 = vector.shape_cast %241 : vector<32xf32> to vector<1x1x32xf32>
    %243 = vector.broadcast %239 : vector<8x8x1xf32> to vector<8x8x32xf32>
    %244 = vector.broadcast %242 : vector<1x1x32xf32> to vector<8x8x32xf32>
    %245 = arith.mulf %243, %244 : vector<8x8x32xf32>
    %246 = arith.addf %238, %245 : vector<8x8x32xf32>
    %c0_62 = arith.constant 0 : index
    %c19 = arith.constant 19 : index
    %247 = vector.load %arg32[%c0_62, %c19] : memref<8x38xf32, #tpu.memory_space<vmem>>, vector<8x8xf32>
    %c0_63 = arith.constant 0 : index
    %c19_64 = arith.constant 19 : index
    %248 = vector.load %arg33[%c0_63, %c19_64] : memref<8x38xf32, #tpu.memory_space<vmem>>, vector<8x8xf32>
    %249 = vector.shape_cast %247 : vector<8x8xf32> to vector<8x8x1xf32>
    %250 = vector.extract_strided_slice %46 {offsets = [19, 0], sizes = [1, 32], strides = [1, 1]} : vector<31x32xf32> to vector<1x32xf32>
    %251 = vector.shape_cast %250 : vector<1x32xf32> to vector<32xf32>
    %252 = vector.shape_cast %251 : vector<32xf32> to vector<1x1x32xf32>
    %253 = vector.broadcast %249 : vector<8x8x1xf32> to vector<8x8x32xf32>
    %254 = vector.broadcast %252 : vector<1x1x32xf32> to vector<8x8x32xf32>
    %255 = arith.mulf %253, %254 : vector<8x8x32xf32>
    %256 = arith.addf %246, %255 : vector<8x8x32xf32>
    %257 = vector.shape_cast %248 : vector<8x8xf32> to vector<8x8x1xf32>
    %258 = vector.extract_strided_slice %47 {offsets = [19, 0], sizes = [1, 32], strides = [1, 1]} : vector<31x32xf32> to vector<1x32xf32>
    %259 = vector.shape_cast %258 : vector<1x32xf32> to vector<32xf32>
    %260 = vector.shape_cast %259 : vector<32xf32> to vector<1x1x32xf32>
    %261 = vector.broadcast %257 : vector<8x8x1xf32> to vector<8x8x32xf32>
    %262 = vector.broadcast %260 : vector<1x1x32xf32> to vector<8x8x32xf32>
    %263 = arith.mulf %261, %262 : vector<8x8x32xf32>
    %264 = arith.addf %256, %263 : vector<8x8x32xf32>
    %c0_65 = arith.constant 0 : index
    %c20 = arith.constant 20 : index
    %265 = vector.load %arg32[%c0_65, %c20] : memref<8x38xf32, #tpu.memory_space<vmem>>, vector<8x8xf32>
    %c0_66 = arith.constant 0 : index
    %c20_67 = arith.constant 20 : index
    %266 = vector.load %arg33[%c0_66, %c20_67] : memref<8x38xf32, #tpu.memory_space<vmem>>, vector<8x8xf32>
    %267 = vector.shape_cast %265 : vector<8x8xf32> to vector<8x8x1xf32>
    %268 = vector.extract_strided_slice %46 {offsets = [20, 0], sizes = [1, 32], strides = [1, 1]} : vector<31x32xf32> to vector<1x32xf32>
    %269 = vector.shape_cast %268 : vector<1x32xf32> to vector<32xf32>
    %270 = vector.shape_cast %269 : vector<32xf32> to vector<1x1x32xf32>
    %271 = vector.broadcast %267 : vector<8x8x1xf32> to vector<8x8x32xf32>
    %272 = vector.broadcast %270 : vector<1x1x32xf32> to vector<8x8x32xf32>
    %273 = arith.mulf %271, %272 : vector<8x8x32xf32>
    %274 = arith.addf %264, %273 : vector<8x8x32xf32>
    %275 = vector.shape_cast %266 : vector<8x8xf32> to vector<8x8x1xf32>
    %276 = vector.extract_strided_slice %47 {offsets = [20, 0], sizes = [1, 32], strides = [1, 1]} : vector<31x32xf32> to vector<1x32xf32>
    %277 = vector.shape_cast %276 : vector<1x32xf32> to vector<32xf32>
    %278 = vector.shape_cast %277 : vector<32xf32> to vector<1x1x32xf32>
    %279 = vector.broadcast %275 : vector<8x8x1xf32> to vector<8x8x32xf32>
    %280 = vector.broadcast %278 : vector<1x1x32xf32> to vector<8x8x32xf32>
    %281 = arith.mulf %279, %280 : vector<8x8x32xf32>
    %282 = arith.addf %274, %281 : vector<8x8x32xf32>
    %c0_68 = arith.constant 0 : index
    %c21 = arith.constant 21 : index
    %283 = vector.load %arg32[%c0_68, %c21] : memref<8x38xf32, #tpu.memory_space<vmem>>, vector<8x8xf32>
    %c0_69 = arith.constant 0 : index
    %c21_70 = arith.constant 21 : index
    %284 = vector.load %arg33[%c0_69, %c21_70] : memref<8x38xf32, #tpu.memory_space<vmem>>, vector<8x8xf32>
    %285 = vector.shape_cast %283 : vector<8x8xf32> to vector<8x8x1xf32>
    %286 = vector.extract_strided_slice %46 {offsets = [21, 0], sizes = [1, 32], strides = [1, 1]} : vector<31x32xf32> to vector<1x32xf32>
    %287 = vector.shape_cast %286 : vector<1x32xf32> to vector<32xf32>
    %288 = vector.shape_cast %287 : vector<32xf32> to vector<1x1x32xf32>
    %289 = vector.broadcast %285 : vector<8x8x1xf32> to vector<8x8x32xf32>
    %290 = vector.broadcast %288 : vector<1x1x32xf32> to vector<8x8x32xf32>
    %291 = arith.mulf %289, %290 : vector<8x8x32xf32>
    %292 = arith.addf %282, %291 : vector<8x8x32xf32>
    %293 = vector.shape_cast %284 : vector<8x8xf32> to vector<8x8x1xf32>
    %294 = vector.extract_strided_slice %47 {offsets = [21, 0], sizes = [1, 32], strides = [1, 1]} : vector<31x32xf32> to vector<1x32xf32>
    %295 = vector.shape_cast %294 : vector<1x32xf32> to vector<32xf32>
    %296 = vector.shape_cast %295 : vector<32xf32> to vector<1x1x32xf32>
    %297 = vector.broadcast %293 : vector<8x8x1xf32> to vector<8x8x32xf32>
    %298 = vector.broadcast %296 : vector<1x1x32xf32> to vector<8x8x32xf32>
    %299 = arith.mulf %297, %298 : vector<8x8x32xf32>
    %300 = arith.addf %292, %299 : vector<8x8x32xf32>
    %c0_71 = arith.constant 0 : index
    %c22 = arith.constant 22 : index
    %301 = vector.load %arg32[%c0_71, %c22] : memref<8x38xf32, #tpu.memory_space<vmem>>, vector<8x8xf32>
    %c0_72 = arith.constant 0 : index
    %c22_73 = arith.constant 22 : index
    %302 = vector.load %arg33[%c0_72, %c22_73] : memref<8x38xf32, #tpu.memory_space<vmem>>, vector<8x8xf32>
    %303 = vector.shape_cast %301 : vector<8x8xf32> to vector<8x8x1xf32>
    %304 = vector.extract_strided_slice %46 {offsets = [22, 0], sizes = [1, 32], strides = [1, 1]} : vector<31x32xf32> to vector<1x32xf32>
    %305 = vector.shape_cast %304 : vector<1x32xf32> to vector<32xf32>
    %306 = vector.shape_cast %305 : vector<32xf32> to vector<1x1x32xf32>
    %307 = vector.broadcast %303 : vector<8x8x1xf32> to vector<8x8x32xf32>
    %308 = vector.broadcast %306 : vector<1x1x32xf32> to vector<8x8x32xf32>
    %309 = arith.mulf %307, %308 : vector<8x8x32xf32>
    %310 = arith.addf %300, %309 : vector<8x8x32xf32>
    %311 = vector.shape_cast %302 : vector<8x8xf32> to vector<8x8x1xf32>
    %312 = vector.extract_strided_slice %47 {offsets = [22, 0], sizes = [1, 32], strides = [1, 1]} : vector<31x32xf32> to vector<1x32xf32>
    %313 = vector.shape_cast %312 : vector<1x32xf32> to vector<32xf32>
    %314 = vector.shape_cast %313 : vector<32xf32> to vector<1x1x32xf32>
    %315 = vector.broadcast %311 : vector<8x8x1xf32> to vector<8x8x32xf32>
    %316 = vector.broadcast %314 : vector<1x1x32xf32> to vector<8x8x32xf32>
    %317 = arith.mulf %315, %316 : vector<8x8x32xf32>
    %318 = arith.addf %310, %317 : vector<8x8x32xf32>
    %319 = vector.shape_cast %318 : vector<8x8x32xf32> to vector<64x32xf32>
    %320 = arith.truncf %319 : vector<64x32xf32> to vector<64x32xbf16>
    %c0_74 = arith.constant 0 : index
    %c0_75 = arith.constant 0 : index
    %321 = vector.load %arg9[%c0_74, %c0_75] : memref<32x128xbf16, #tpu.memory_space<vmem>>, vector<32x128xbf16>
    %cst_76 = arith.constant dense<0.000000e+00> : vector<64x128xf32>
    %322 = tpu.matmul %320, %321, %cst_76 {dimension_numbers = #tpu.dot_dimension_numbers<[1], [0], [0], [1], [0, 0, 1, 1], [], []>} : vector<64x32xbf16>, vector<32x128xbf16>, vector<64x128xf32> -> vector<64x128xf32>
    %323 = vector.shape_cast %322 : vector<64x128xf32> to vector<8x8x128xf32>
    %324 = vector.shape_cast %45 : vector<8x128xf32> to vector<8x1x128xf32>
    %325 = vector.broadcast %324 : vector<8x1x128xf32> to vector<8x8x128xf32>
    %326 = arith.addf %325, %323 : vector<8x8x128xf32>
    %c0_77 = arith.constant 0 : index
    %c0_78 = arith.constant 0 : index
    %c0_79 = arith.constant 0 : index
    %327 = vector.load %arg34[%c0_77, %c0_78, %c0_79] : memref<8x8x128xf32, #tpu.memory_space<vmem>>, vector<8x8x128xf32>
    %328 = arith.addf %326, %327 : vector<8x8x128xf32>
    %329 = math.tanh %328 : vector<8x8x128xf32>
    %c0_80 = arith.constant 0 : index
    %c0_81 = arith.constant 0 : index
    %330 = vector.load %arg17[%c0_80, %c0_81] : memref<1x128xf32, #tpu.memory_space<vmem>>, vector<1x128xf32>
    %331 = vector.shape_cast %330 : vector<1x128xf32> to vector<1x1x128xf32>
    %332 = vector.broadcast %331 : vector<1x1x128xf32> to vector<8x8x128xf32>
    %333 = arith.mulf %329, %332 : vector<8x8x128xf32>
    %cst_82 = arith.constant dense<0.000000e+00> : vector<8x8xf32>
    %334 = vector.multi_reduction <add>, %333, %cst_82 [2] : vector<8x8x128xf32> to vector<8x8xf32>
    %c0_83 = arith.constant 0 : index
    %335 = memref.load %arg22[%c0_83] : memref<1xf32, #tpu.memory_space<smem>>
    %336 = vector.broadcast %335 : f32 to vector<8x8xf32>
    %337 = arith.addf %334, %336 : vector<8x8xf32>
    %c0_84 = arith.constant 0 : index
    %c0_85 = arith.constant 0 : index
    %338 = vector.load %arg4[%c0_84, %c0_85] : memref<8x8xf32, #tpu.memory_space<vmem>>, vector<8x8xf32>
    %cst_86 = arith.constant 5.000000e-01 : f32
    %339 = vector.broadcast %cst_86 : f32 to vector<8x8xf32>
    %340 = arith.cmpf ogt, %338, %339 : vector<8x8xf32>
    %cst_87 = arith.constant -1.000000e+30 : f32
    %341 = vector.broadcast %cst_87 : f32 to vector<8x8xf32>
    %342 = arith.select %340, %337, %341 : vector<8x8xi1>, vector<8x8xf32>
    %cst_88 = arith.constant dense<0xFF800000> : vector<8xf32>
    %343 = vector.multi_reduction <maximumf>, %342, %cst_88 [1] : vector<8x8xf32> to vector<8xf32>
    %344 = vector.shape_cast %343 : vector<8xf32> to vector<8x1xf32>
    %345 = vector.broadcast %344 : vector<8x1xf32> to vector<8x8xf32>
    %346 = arith.subf %342, %345 : vector<8x8xf32>
    %347 = math.exp %346 : vector<8x8xf32>
    %cst_89 = arith.constant dense<0.000000e+00> : vector<8xf32>
    %348 = vector.multi_reduction <add>, %347, %cst_89 [1] : vector<8x8xf32> to vector<8xf32>
    %349 = vector.shape_cast %348 : vector<8xf32> to vector<8x1xf32>
    %350 = vector.broadcast %349 : vector<8x1xf32> to vector<8x8xf32>
    %351 = arith.divf %347, %350 : vector<8x8xf32>
    %c0_90 = arith.constant 0 : index
    %c15_91 = arith.constant 15 : index
    %352 = vector.load %arg32[%c0_90, %c15_91] : memref<8x38xf32, #tpu.memory_space<vmem>>, vector<8x8xf32>
    tpu.vector_store %arg32[%c0_90, %c15_91], %351 {strides = array<i32>} : memref<8x38xf32, #tpu.memory_space<vmem>>, vector<8x8xf32>,
    %c0_92 = arith.constant 0 : index
    %c15_93 = arith.constant 15 : index
    %353 = vector.load %arg33[%c0_92, %c15_93] : memref<8x38xf32, #tpu.memory_space<vmem>>, vector<8x8xf32>
    %354 = arith.addf %353, %351 : vector<8x8xf32>
    %c0_94 = arith.constant 0 : index
    %c15_95 = arith.constant 15 : index
    %355 = vector.load %arg33[%c0_94, %c15_95] : memref<8x38xf32, #tpu.memory_space<vmem>>, vector<8x8xf32>
    tpu.vector_store %arg33[%c0_94, %c15_95], %354 {strides = array<i32>} : memref<8x38xf32, #tpu.memory_space<vmem>>, vector<8x8xf32>,
    %356 = vector.shape_cast %351 : vector<8x8xf32> to vector<8x1x8xf32>
    %357 = arith.truncf %356 : vector<8x1x8xf32> to vector<8x1x8xbf16>
    %c0_96 = arith.constant 0 : index
    %c0_97 = arith.constant 0 : index
    %c0_98 = arith.constant 0 : index
    %358 = vector.load %arg3[%c0_96, %c0_97, %c0_98] : memref<8x8x32xbf16, #tpu.memory_space<vmem>>, vector<8x8x32xbf16>
    "tpu.trace_start"() <{level = 10 : i32, message = "bqt,bte->bqe"}> : () -> ()
    %cst_99 = arith.constant dense<0.000000e+00> : vector<8x1x32xf32>
    %359 = tpu.matmul %357, %358, %cst_99 {dimension_numbers = #tpu.dot_dimension_numbers<[2], [1], [1], [2], [0, 0, 0, 1, 1, 2], [0], [0]>} : vector<8x1x8xbf16>, vector<8x8x32xbf16>, vector<8x1x32xf32> -> vector<8x1x32xf32>
    "tpu.trace_stop"() : () -> ()
    %360 = vector.shape_cast %359 : vector<8x1x32xf32> to vector<8x32xf32>
    %c0_100 = arith.constant 0 : index
    %c0_101 = arith.constant 0 : index
    %361 = vector.load %arg31[%c0_100, %c0_101] : memref<8x32xf32, #tpu.memory_space<vmem>>, vector<8x32xf32>
    tpu.vector_store %arg31[%c0_100, %c0_101], %360 {strides = array<i32>} : memref<8x32xf32, #tpu.memory_space<vmem>>, vector<8x32xf32>,
    %362 = arith.truncf %40 : vector<8x128xf32> to vector<8x128xbf16>
    %363 = arith.truncf %360 : vector<8x32xf32> to vector<8x32xbf16>
    %c0_102 = arith.constant 0 : index
    %c0_103 = arith.constant 0 : index
    %364 = vector.load %arg10[%c0_102, %c0_103] : memref<128x512xbf16, #tpu.memory_space<vmem>>, vector<128x512xbf16>
    %cst_104 = arith.constant dense<0.000000e+00> : vector<8x512xf32>
    %365 = tpu.matmul %362, %364, %cst_104 {dimension_numbers = #tpu.dot_dimension_numbers<[1], [0], [0], [1], [0, 0, 1, 1], [], []>} : vector<8x128xbf16>, vector<128x512xbf16>, vector<8x512xf32> -> vector<8x512xf32>
    %c0_105 = arith.constant 0 : index
    %c0_106 = arith.constant 0 : index
    %366 = vector.load %arg11[%c0_105, %c0_106] : memref<32x512xbf16, #tpu.memory_space<vmem>>, vector<32x512xbf16>
    %cst_107 = arith.constant dense<0.000000e+00> : vector<8x512xf32>
    %367 = tpu.matmul %363, %366, %cst_107 {dimension_numbers = #tpu.dot_dimension_numbers<[1], [0], [0], [1], [0, 0, 1, 1], [], []>} : vector<8x32xbf16>, vector<32x512xbf16>, vector<8x512xf32> -> vector<8x512xf32>
    %368 = arith.addf %365, %367 : vector<8x512xf32>
    %c0_108 = arith.constant 0 : index
    %c0_109 = arith.constant 0 : index
    %369 = vector.load %arg29[%c0_108, %c0_109] : memref<8x128xf32, #tpu.memory_space<vmem>>, vector<8x128xf32>
    %370 = arith.truncf %369 : vector<8x128xf32> to vector<8x128xbf16>
    %c0_110 = arith.constant 0 : index
    %c0_111 = arith.constant 0 : index
    %371 = vector.load %arg12[%c0_110, %c0_111] : memref<128x512xbf16, #tpu.memory_space<vmem>>, vector<128x512xbf16>
    %cst_112 = arith.constant dense<0.000000e+00> : vector<8x512xf32>
    %372 = tpu.matmul %370, %371, %cst_112 {dimension_numbers = #tpu.dot_dimension_numbers<[1], [0], [0], [1], [0, 0, 1, 1], [], []>} : vector<8x128xbf16>, vector<128x512xbf16>, vector<8x512xf32> -> vector<8x512xf32>
    %373 = arith.addf %368, %372 : vector<8x512xf32>
    %c0_113 = arith.constant 0 : index
    %c0_114 = arith.constant 0 : index
    %374 = vector.load %arg18[%c0_113, %c0_114] : memref<1x512xf32, #tpu.memory_space<vmem>>, vector<1x512xf32>
    %375 = vector.broadcast %374 : vector<1x512xf32> to vector<8x512xf32>
    %376 = arith.addf %373, %375 : vector<8x512xf32>
    %377 = vector.extract_strided_slice %376 {offsets = [0, 0], sizes = [8, 128], strides = [1, 1]} : vector<8x512xf32> to vector<8x128xf32>
    %378 = arith.negf %377 : vector<8x128xf32>
    %379 = math.exp %378 : vector<8x128xf32>
    %cst_115 = arith.constant 1.000000e+00 : f32
    %380 = vector.broadcast %cst_115 : f32 to vector<8x128xf32>
    %381 = arith.addf %380, %379 : vector<8x128xf32>
    %382 = arith.divf %380, %381 : vector<8x128xf32>
    %383 = vector.extract_strided_slice %376 {offsets = [0, 128], sizes = [8, 128], strides = [1, 1]} : vector<8x512xf32> to vector<8x128xf32>
    %384 = arith.negf %383 : vector<8x128xf32>
    %385 = math.exp %384 : vector<8x128xf32>
    %cst_116 = arith.constant 1.000000e+00 : f32
    %386 = vector.broadcast %cst_116 : f32 to vector<8x128xf32>
    %387 = arith.addf %386, %385 : vector<8x128xf32>
    %388 = arith.divf %386, %387 : vector<8x128xf32>
    %389 = vector.extract_strided_slice %376 {offsets = [0, 256], sizes = [8, 128], strides = [1, 1]} : vector<8x512xf32> to vector<8x128xf32>
    %390 = math.tanh %389 : vector<8x128xf32>
    %391 = vector.extract_strided_slice %376 {offsets = [0, 384], sizes = [8, 128], strides = [1, 1]} : vector<8x512xf32> to vector<8x128xf32>
    %392 = arith.negf %391 : vector<8x128xf32>
    %393 = math.exp %392 : vector<8x128xf32>
    %cst_117 = arith.constant 1.000000e+00 : f32
    %394 = vector.broadcast %cst_117 : f32 to vector<8x128xf32>
    %395 = arith.addf %394, %393 : vector<8x128xf32>
    %396 = arith.divf %394, %395 : vector<8x128xf32>
    %c0_118 = arith.constant 0 : index
    %c0_119 = arith.constant 0 : index
    %397 = vector.load %arg30[%c0_118, %c0_119] : memref<8x128xf32, #tpu.memory_space<vmem>>, vector<8x128xf32>
    %398 = arith.mulf %388, %397 : vector<8x128xf32>
    %399 = arith.mulf %382, %390 : vector<8x128xf32>
    %400 = arith.addf %398, %399 : vector<8x128xf32>
    %401 = math.tanh %400 : vector<8x128xf32>
    %402 = arith.mulf %396, %401 : vector<8x128xf32>
    %c0_120 = arith.constant 0 : index
    %c0_121 = arith.constant 0 : index
    %403 = vector.load %arg30[%c0_120, %c0_121] : memref<8x128xf32, #tpu.memory_space<vmem>>, vector<8x128xf32>
    tpu.vector_store %arg30[%c0_120, %c0_121], %400 {strides = array<i32>} : memref<8x128xf32, #tpu.memory_space<vmem>>, vector<8x128xf32>,
    %c0_122 = arith.constant 0 : index
    %c0_123 = arith.constant 0 : index
    %404 = vector.load %arg29[%c0_122, %c0_123] : memref<8x128xf32, #tpu.memory_space<vmem>>, vector<8x128xf32>
    tpu.vector_store %arg29[%c0_122, %c0_123], %402 {strides = array<i32>} : memref<8x128xf32, #tpu.memory_space<vmem>>, vector<8x128xf32>,
    %405 = arith.truncf %402 : vector<8x128xf32> to vector<8x128xbf16>
    %c0_124 = arith.constant 0 : index
    %c0_125 = arith.constant 0 : index
    %406 = vector.load %arg13[%c0_124, %c0_125] : memref<128x8xbf16, #tpu.memory_space<vmem>>, vector<128x8xbf16>
    %cst_126 = arith.constant dense<0.000000e+00> : vector<8x8xf32>
    %407 = tpu.matmul %405, %406, %cst_126 {dimension_numbers = #tpu.dot_dimension_numbers<[1], [0], [0], [1], [0, 0, 1, 1], [], []>} : vector<8x128xbf16>, vector<128x8xbf16>, vector<8x8xf32> -> vector<8x8xf32>
    %c0_127 = arith.constant 0 : index
    %c0_128 = arith.constant 0 : index
    %408 = vector.load %arg14[%c0_127, %c0_128] : memref<32x8xbf16, #tpu.memory_space<vmem>>, vector<32x8xbf16>
    %cst_129 = arith.constant dense<0.000000e+00> : vector<8x8xf32>
    %409 = tpu.matmul %363, %408, %cst_129 {dimension_numbers = #tpu.dot_dimension_numbers<[1], [0], [0], [1], [0, 0, 1, 1], [], []>} : vector<8x32xbf16>, vector<32x8xbf16>, vector<8x8xf32> -> vector<8x8xf32>
    %410 = arith.addf %407, %409 : vector<8x8xf32>
    %c0_130 = arith.constant 0 : index
    %c0_131 = arith.constant 0 : index
    %411 = vector.load %arg19[%c0_130, %c0_131] : memref<1x8xf32, #tpu.memory_space<vmem>>, vector<1x8xf32>
    %412 = vector.broadcast %411 : vector<1x8xf32> to vector<8x8xf32>
    %413 = arith.addf %410, %412 : vector<8x8xf32>
    %c0_132 = arith.constant 0 : index
    %c0_133 = arith.constant 0 : index
    %414 = vector.load %arg20[%c0_132, %c0_133] : memref<1x128xf32, #tpu.memory_space<vmem>>, vector<1x128xf32>
    %415 = vector.broadcast %414 : vector<1x128xf32> to vector<8x128xf32>
    %416 = arith.mulf %402, %415 : vector<8x128xf32>
    %cst_134 = arith.constant dense<0.000000e+00> : vector<8xf32>
    %417 = vector.multi_reduction <add>, %416, %cst_134 [1] : vector<8x128xf32> to vector<8xf32>
    %418 = vector.shape_cast %417 : vector<8xf32> to vector<8x1xf32>
    %c0_135 = arith.constant 0 : index
    %c0_136 = arith.constant 0 : index
    %419 = vector.load %arg21[%c0_135, %c0_136] : memref<1x8xf32, #tpu.memory_space<vmem>>, vector<1x8xf32>
    %420 = vector.broadcast %419 : vector<1x8xf32> to vector<8x8xf32>
    %421 = arith.mulf %413, %420 : vector<8x8xf32>
    %cst_137 = arith.constant dense<0.000000e+00> : vector<8xf32>
    %422 = vector.multi_reduction <add>, %421, %cst_137 [1] : vector<8x8xf32> to vector<8xf32>
    %423 = vector.shape_cast %422 : vector<8xf32> to vector<8x1xf32>
    %424 = arith.addf %418, %423 : vector<8x1xf32>
    %c0_138 = arith.constant 0 : index
    %425 = memref.load %arg23[%c0_138] : memref<1xf32, #tpu.memory_space<smem>>
    %426 = vector.broadcast %425 : f32 to vector<8x1xf32>
    %427 = arith.addf %424, %426 : vector<8x1xf32>
    %428 = arith.index_cast %arg1 : i32 to index
    %c0_139 = arith.constant 0 : index
    %c0_140 = arith.constant 0 : index
    %429 = vector.load %arg24[%428, %c0_139, %c0_140] : memref<6x8x8xf32, #tpu.memory_space<vmem>>, vector<1x8x8xf32>
    %430 = vector.shape_cast %429 : vector<1x8x8xf32> to vector<8x8xf32>
    %431 = vector.shape_cast %413 : vector<8x8xf32> to vector<1x8x8xf32>
    tpu.vector_store %arg24[%428, %c0_139, %c0_140], %431 {strides = array<i32>} : memref<6x8x8xf32, #tpu.memory_space<vmem>>, vector<1x8x8xf32>,
    %432 = arith.index_cast %arg1 : i32 to index
    %c0_141 = arith.constant 0 : index
    %c0_142 = arith.constant 0 : index
    %433 = vector.load %arg25[%432, %c0_141, %c0_142] : memref<6x8x1xf32, #tpu.memory_space<vmem>>, vector<1x8x1xf32>
    %434 = vector.shape_cast %433 : vector<1x8x1xf32> to vector<8x1xf32>
    %435 = vector.shape_cast %427 : vector<8x1xf32> to vector<1x8x1xf32>
    tpu.vector_store %arg25[%432, %c0_141, %c0_142], %435 {strides = array<i32>} : memref<6x8x1xf32, #tpu.memory_space<vmem>>, vector<1x8x1xf32>,
    %436 = arith.index_cast %arg1 : i32 to index
    %c0_143 = arith.constant 0 : index
    %c0_144 = arith.constant 0 : index
    %437 = vector.load %arg26[%436, %c0_143, %c0_144] : memref<6x8x8xf32, #tpu.memory_space<vmem>>, vector<1x8x8xf32>
    %438 = vector.shape_cast %437 : vector<1x8x8xf32> to vector<8x8xf32>
    %439 = vector.shape_cast %351 : vector<8x8xf32> to vector<1x8x8xf32>
    tpu.vector_store %arg26[%436, %c0_143, %c0_144], %439 {strides = array<i32>} : memref<6x8x8xf32, #tpu.memory_space<vmem>>, vector<1x8x8xf32>,
    return
  }
  func.func @transform_0(%arg0: i32, %arg1: i32) -> (i32, i32, i32) {
    %c0_i32 = arith.constant 0 : i32
    %c0_i32_0 = arith.constant 0 : i32
    return %arg1, %arg0, %c0_i32 : i32, i32, i32
  }
  func.func @transform_1(%arg0: i32, %arg1: i32) -> (i32, i32, i32) {
    %c0_i32 = arith.constant 0 : i32
    %c0_i32_0 = arith.constant 0 : i32
    %c0_i32_1 = arith.constant 0 : i32
    return %arg0, %c0_i32, %c0_i32_0 : i32, i32, i32
  }
  func.func @transform_2(%arg0: i32, %arg1: i32) -> (i32, i32) {
    %c0_i32 = arith.constant 0 : i32
    %c0_i32_0 = arith.constant 0 : i32
    return %arg0, %c0_i32 : i32, i32
  }
  func.func @transform_3(%arg0: i32, %arg1: i32) -> (i32, i32) {
    %c0_i32 = arith.constant 0 : i32
    %c0_i32_0 = arith.constant 0 : i32
    %c0_i32_1 = arith.constant 0 : i32
    return %c0_i32, %c0_i32_0 : i32, i32
  }
  func.func @transform_4(%arg0: i32, %arg1: i32) -> (i32, i32) {
    %c0_i32 = arith.constant 0 : i32
    %c0_i32_0 = arith.constant 0 : i32
    %c0_i32_1 = arith.constant 0 : i32
    return %c0_i32, %c0_i32_0 : i32, i32
  }
  func.func @transform_5(%arg0: i32, %arg1: i32) -> (i32, i32) {
    %c0_i32 = arith.constant 0 : i32
    %c0_i32_0 = arith.constant 0 : i32
    %c0_i32_1 = arith.constant 0 : i32
    return %c0_i32, %c0_i32_0 : i32, i32
  }
  func.func @transform_6(%arg0: i32, %arg1: i32) -> (i32, i32) {
    %c0_i32 = arith.constant 0 : i32
    %c0_i32_0 = arith.constant 0 : i32
    %c0_i32_1 = arith.constant 0 : i32
    return %c0_i32, %c0_i32_0 : i32, i32
  }
  func.func @transform_7(%arg0: i32, %arg1: i32) -> (i32, i32) {
    %c0_i32 = arith.constant 0 : i32
    %c0_i32_0 = arith.constant 0 : i32
    %c0_i32_1 = arith.constant 0 : i32
    return %c0_i32, %c0_i32_0 : i32, i32
  }
  func.func @transform_8(%arg0: i32, %arg1: i32) -> (i32, i32) {
    %c0_i32 = arith.constant 0 : i32
    %c0_i32_0 = arith.constant 0 : i32
    %c0_i32_1 = arith.constant 0 : i32
    return %c0_i32, %c0_i32_0 : i32, i32
  }
  func.func @transform_9(%arg0: i32, %arg1: i32) -> (i32, i32) {
    %c0_i32 = arith.constant 0 : i32
    %c0_i32_0 = arith.constant 0 : i32
    %c0_i32_1 = arith.constant 0 : i32
    return %c0_i32, %c0_i32_0 : i32, i32
  }
  func.func @transform_10(%arg0: i32, %arg1: i32) -> (i32, i32) {
    %c0_i32 = arith.constant 0 : i32
    %c0_i32_0 = arith.constant 0 : i32
    %c0_i32_1 = arith.constant 0 : i32
    return %c0_i32, %c0_i32_0 : i32, i32
  }
  func.func @transform_11(%arg0: i32, %arg1: i32) -> (i32, i32) {
    %c0_i32 = arith.constant 0 : i32
    %c0_i32_0 = arith.constant 0 : i32
    %c0_i32_1 = arith.constant 0 : i32
    return %c0_i32, %c0_i32_0 : i32, i32
  }
  func.func @transform_12(%arg0: i32, %arg1: i32) -> (i32, i32) {
    %c0_i32 = arith.constant 0 : i32
    %c0_i32_0 = arith.constant 0 : i32
    %c0_i32_1 = arith.constant 0 : i32
    return %c0_i32, %c0_i32_0 : i32, i32
  }
  func.func @transform_13(%arg0: i32, %arg1: i32) -> (i32, i32) {
    %c0_i32 = arith.constant 0 : i32
    %c0_i32_0 = arith.constant 0 : i32
    %c0_i32_1 = arith.constant 0 : i32
    return %c0_i32, %c0_i32_0 : i32, i32
  }
  func.func @transform_14(%arg0: i32, %arg1: i32) -> (i32, i32) {
    %c0_i32 = arith.constant 0 : i32
    %c0_i32_0 = arith.constant 0 : i32
    %c0_i32_1 = arith.constant 0 : i32
    return %c0_i32, %c0_i32_0 : i32, i32
  }
  func.func @transform_15(%arg0: i32, %arg1: i32) -> (i32, i32) {
    %c0_i32 = arith.constant 0 : i32
    %c0_i32_0 = arith.constant 0 : i32
    %c0_i32_1 = arith.constant 0 : i32
    return %c0_i32, %c0_i32_0 : i32, i32
  }
  func.func @transform_16(%arg0: i32, %arg1: i32) -> (i32, i32) {
    %c0_i32 = arith.constant 0 : i32
    %c0_i32_0 = arith.constant 0 : i32
    %c0_i32_1 = arith.constant 0 : i32
    return %c0_i32, %c0_i32_0 : i32, i32
  }
  func.func @transform_17(%arg0: i32, %arg1: i32) -> (i32, i32) {
    %c0_i32 = arith.constant 0 : i32
    %c0_i32_0 = arith.constant 0 : i32
    %c0_i32_1 = arith.constant 0 : i32
    return %c0_i32, %c0_i32_0 : i32, i32
  }
  func.func @transform_18(%arg0: i32, %arg1: i32) -> (i32, i32) {
    %c0_i32 = arith.constant 0 : i32
    %c0_i32_0 = arith.constant 0 : i32
    %c0_i32_1 = arith.constant 0 : i32
    return %c0_i32, %c0_i32_0 : i32, i32
  }
  func.func @transform_19(%arg0: i32, %arg1: i32) -> (i32, i32) {
    %c0_i32 = arith.constant 0 : i32
    %c0_i32_0 = arith.constant 0 : i32
    %c0_i32_1 = arith.constant 0 : i32
    return %c0_i32, %c0_i32_0 : i32, i32
  }
  func.func @transform_20(%arg0: i32, %arg1: i32) -> i32 {
    %c0_i32 = arith.constant 0 : i32
    %c0_i32_0 = arith.constant 0 : i32
    return %c0_i32 : i32
  }
  func.func @transform_21(%arg0: i32, %arg1: i32) -> i32 {
    %c0_i32 = arith.constant 0 : i32
    %c0_i32_0 = arith.constant 0 : i32
    return %c0_i32 : i32
  }
  func.func @transform_22(%arg0: i32, %arg1: i32) -> (i32, i32, i32) {
    %c0_i32 = arith.constant 0 : i32
    %c0_i32_0 = arith.constant 0 : i32
    %c0_i32_1 = arith.constant 0 : i32
    return %c0_i32, %arg0, %c0_i32_0 : i32, i32, i32
  }
  func.func @transform_23(%arg0: i32, %arg1: i32) -> (i32, i32, i32) {
    %c0_i32 = arith.constant 0 : i32
    %c0_i32_0 = arith.constant 0 : i32
    %c0_i32_1 = arith.constant 0 : i32
    return %c0_i32, %arg0, %c0_i32_0 : i32, i32, i32
  }
  func.func @transform_24(%arg0: i32, %arg1: i32) -> (i32, i32, i32) {
    %c0_i32 = arith.constant 0 : i32
    %c0_i32_0 = arith.constant 0 : i32
    %c0_i32_1 = arith.constant 0 : i32
    return %c0_i32, %arg0, %c0_i32_0 : i32, i32, i32
  }
}

</mosaic_0001>

<bundles_post_ra>
// kernel: tpu_custom_call.1
= control target key start
LH: loop header
LB: loop body
LE: loop exit
PB: predicated region body
PF: predicated region fallthrough
CT: control target
= control target key end

     0   :  { %s8721_s0 = inlined_call_operand.hbm [shape: f32[6,16,512], index: 0, kind: input, shape index: {}]   ;;  %s8722_s1 = inlined_call_operand.vmem [shape: bf16[16,8,32], index: 1, kind: input, shape index: {}]   ;;  %s8723_s2 = inlined_call_operand.vmem [shape: f32[16,8], index: 2, kind: input, shape index: {}]   ;;  %s8724_s3 = inlined_call_operand.vmem [shape: bf16[32,512], index: 3, kind: input, shape index: {}]   ;;  %s8725_s4 = inlined_call_operand.hbm [shape: bf16[128,512], index: 4, kind: input, shape index: {}]   ;;  %s8726_s5 = inlined_call_operand.hbm [shape: bf16[128,128], index: 5, kind: input, shape index: {}]   ;;  %s8727_s6 = inlined_call_operand.hbm [shape: bf16[32,128], index: 6, kind: input, shape index: {}]   ;;  %s8728_s7 = inlined_call_operand.hbm [shape: bf16[32,128], index: 7, kind: input, shape index: {}]   ;;  %s8729_s8 = inlined_call_operand.hbm [shape: bf16[128,512], index: 8, kind: input, shape index: {}]   ;;  %s8730_s9 = inlined_call_operand.hbm [shape: bf16[32,512], index: 9, kind: input, shape index: {}]   ;;  %s8731_s10 = inlined_call_operand.hbm [shape: bf16[128,512], index: 10, kind: input, shape index: {}]   ;;  %s8732_s11 = inlined_call_operand.vmem [shape: bf16[128,8], index: 11, kind: input, shape index: {}]   ;;  %s8733_s12 = inlined_call_operand.vmem [shape: bf16[32,8], index: 12, kind: input, shape index: {}]   ;;  %s8734_s13 = inlined_call_operand.vmem [shape: f32[31,32], index: 13, kind: input, shape index: {}]   ;;  %s8735_s14 = inlined_call_operand.hbm [shape: f32[31,32], index: 14, kind: input, shape index: {}]   ;;  %s8736_s15 = inlined_call_operand.vmem [shape: f32[1,128], index: 15, kind: input, shape index: {}]   ;;  %s8737_s16 = inlined_call_operand.vmem [shape: f32[1,512], index: 16, kind: input, shape index: {}]   ;;  %s8738_s17 = inlined_call_operand.vmem [shape: f32[1,8], index: 17, kind: input, shape index: {}]   ;;  %s8739_s18 = inlined_call_operand.vmem [shape: f32[1,128], index: 18, kind: input, shape index: {}]   ;;  %s8740_s19 = inlined_call_operand.vmem [shape: f32[1,8], index: 19, kind: input, shape index: {}]   ;;  %s8741_s20 = inlined_call_operand.<no memory space> [shape: f32[1], index: 20, kind: input, shape index: {}]   ;;  %s8742_s21 = inlined_call_operand.<no memory space> [shape: f32[1], index: 21, kind: input, shape index: {}]   ;;  %s8743_s22 = inlined_call_operand.vmem [shape: f32[6,16,8], index: 22, kind: output, shape index: {0}]   ;;  %s8744_s23 = inlined_call_operand.vmem [shape: f32[6,16,1], index: 23, kind: output, shape index: {1}]   ;;  %s8745_s24 = inlined_call_operand.vmem [shape: f32[6,16,8], index: 24, kind: output, shape index: {2}]  }
   0x1   :  { %8831 = sst [smem:[#allocation153_spill]] %s8721_s0 }
   0x2   :  { %8832 = sst [smem:[#allocation154_spill]] %s8722_s1 }
   0x3   :  { %8833 = sst [smem:[#allocation155_spill]] %s8723_s2 }
   0x4   :  { %8834 = sst [smem:[#allocation156_spill]] %s8724_s3 }
   0x5   :  { %8835 = sst [smem:[#allocation157_spill]] %s8725_s4 }
   0x6   :  { %8836 = sst [smem:[#allocation158_spill]] %s8726_s5 }
   0x7   :  { %8837 = sst [smem:[#allocation159_spill]] %s8727_s6 }
   0x8   :  { %8838 = sst [smem:[#allocation160_spill]] %s8728_s7 }
   0x9   :  { %8839 = sst [smem:[#allocation161_spill]] %s8729_s8 }
   0xa   :  { %8840 = sst [smem:[#allocation162_spill]] %s8730_s9 }
   0xb   :  { %8841 = sst [smem:[#allocation163_spill]] %s8731_s10 }
   0xc   :  { %8842 = sst [smem:[#allocation164_spill]] %s8732_s11 }
   0xd   :  { %8843 = sst [smem:[#allocation165_spill]] %s8733_s12 }
   0xe   :  { %8844 = sst [smem:[#allocation166_spill]] %s8734_s13 }
   0xf   :  { %8845 = sst [smem:[#allocation167_spill]] %s8735_s14 }
  0x10   :  { %8846 = sst [smem:[#allocation168_spill]] %s8736_s15 }
  0x11   :  { %8847 = sst [smem:[#allocation169_spill]] %s8737_s16 }
  0x12   :  { %8848 = sst [smem:[#allocation170_spill]] %s8738_s17 }
  0x13   :  { %8849 = sst [smem:[#allocation171_spill]] %s8739_s18 }
  0x14   :  { %8850 = sst [smem:[#allocation172_spill]] %s8740_s19 }
  0x15   :  { %8851 = sst [smem:[#allocation173_spill]] %s8743_s22 }
  0x16   :  { %8852 = sst [smem:[#allocation174_spill]] %s8744_s23 }
  0x17   :  { %8853 = sst [smem:[#allocation175_spill]] %s8745_s24 }
  0x18   :  { %30 = sst [smem:[#allocation10]] %s8741_s20 }
  0x19   :  { %31 = sst [smem:[#allocation11]] %s8742_s21 }
  0x1a   :  { %32 = vsyncpa [#allocation13], 0 }
  0x1b   :  { %34 = vsyncpa [#allocation13 + $0x1], 0 }
  0x1c   :  { %35 = vsyncpa [#allocation15], 0 }
  0x1d   :  { %36 = vsyncpa [#allocation18], 0 }
  0x1e   :  { %37 = vsyncpa [#allocation21], 0 }
  0x1f   :  { %38 = vsyncpa [#allocation24], 0  ;;  %s6795_s6 = smov 0   ;;  %s6797_s2 = smov 0  }
  0x20   :  { %s6799_s29 = smov 0   ;;  %s6801_s0 = smov 0  }
  0x21   :  { %s6803_s7 = smov 0   ;;  %s6805_s20 = smov 0  }
  0x22   :  { %s6807_s30 = smov 0   ;;  %s6809_s21 = smov 0  }
  0x23   :  { %s6811_s3 = smov 0   ;;  %s6813_s25 = smov 0  }
  0x24 LB: > { %8854 = sst [smem:[#allocation34_spill]] %s6625_s20  ;;  %s8753_s8 = sadd.s32 4294967295, %s6641_s25   ;;  %s6641_s25 = sphi %s6813_s25, %s44_s25   ;;  %s6637_s3 = sphi %s6811_s3, %s9194_s3   ;;  %s6633_s21 = sphi %s6809_s21, %s9193_s21   ;;  %s6629_s30 = sphi %s6807_s30, %s9192_s30   ;;  %s6625_s20 = sphi %s6805_s20, %s9191_s20   ;;  %s6621_s7 = sphi %s6803_s7, %s9190_s7   ;;  %s6617_s0 = sphi %s6801_s0, %s9189_s0   ;;  %s6613_s29 = sphi %s6799_s29, %s9188_s29   ;;  %s6609_s2 = sphi %s6797_s2, %s9187_s2   ;;  %s6605_s6 = sphi %s6795_s6, %s9186_s6  }
  0x25   : > { %8855 = sst [smem:[#allocation35_spill]] %s6629_s30  ;;  %p5476_p0 = scmp.ge.s32.totalorder %s6641_s25, 1 }
  0x26   : > { %p6849_p1 = scmp.eq.s32.totalorder %s8753_s8, 0  ;;  %p618_p2 = scmp.lt.s32.totalorder %s6641_s25, 13 }
  0x27   : > { %s6643_s5 = smov [#allocation14]   ;;  %s6644_s28 = smov [#allocation17]  }
  0x28   : > { %s8856_s4 = scalar_select %p6849_p1, 1, 0 }
  0x29   : > { %p6854_p3 = pnand %p5476_p0, %p618_p2  ;;  %s633_s26 = sshll.u32 %s6643_s5, 4  ;;  %s634_s26 = int_to_ptr.vmem [resolvable:$true] %s633_s26 }
  0x2a   : > { %s659_s8 = sshll.u32 %s6644_s28, 4  ;;  %s8860_s22 = sld [smem:[#allocation157_spill]]  ;;  %s660_s8 = int_to_ptr.vmem [resolvable:$true] %s659_s8 }
  0x2b   : > { %s8857_s1 = scalar_select %p6854_p3, 1, 0 }
  0x2c   : > { %p5897_p4 = pneg %p6854_p3 }
  0x2d   : > { %8858 = sst [smem:[#allocation36_spill]] %s8857_s1 }
  0x2e   : > { %p6862_p5 = pnand %p5897_p4, %p6849_p1 }
  0x30   : > { %s6289_s19 = scalar_lea.hbm %s8860_s22, 4096  ;;  %p6874_p7 = pneg %p6862_p5 }
  0x31   : > { %p6290_p6 = scmp.ne.s32.totalorder %s8860_s22, %s6289_s19  ;;  %p6296_p10 = scmp.lt.u32.totalorder %s6289_s19, %s8860_s22 }
  0x33   : > { %p6292_p8 = pnand %p6874_p7, %p6290_p6 }
  0x35   : > { %p6293_p9 = pneg %p6292_p8 }
  0x37   : > { %p6298_p11 = pnand %p6296_p10, %p6293_p9 }
  0x39   : > { %6301 = shalt.err (!%p6298_p11)
}
  0x3a   : > { %s6302_s23 = scalar_lea.vmem %s634_s26, 4096  ;;  %p6310_p2 = scmp.lt.s32.totalorder %s634_s26, %s634_s26 }
  0x3b   : > { %p6303_p12 = scmp.ne.s32.totalorder %s634_s26, %s6302_s23  ;;  %p6311_p4 = scmp.lt.s32.totalorder %s6302_s23, %s6302_s23 }
  0x3d   : > { %p6305_p13 = pnand %p6303_p12, %p6874_p7  ;;  %p6312_p3 = por %p6311_p4, %p6310_p2 }
  0x3f   : > { %p6306_p0 = pneg %p6305_p13 }
  0x41   : > { %p6313_p1 = pnand %p6312_p3, %p6306_p0 }
  0x43   : > { %6316 = shalt.err (!%p6313_p1)
}
  0x44   : > { %s8762_s17 = smov 256   ;;  %s8769_s18 = smov 16  }
  0x45   : > { %5900 = dma.hbm_to_vmem [thread:$0]  (!%p6862_p5), %s8860_s22, 4096, %s634_s26, [#allocation15], %s8762_s17, %s8762_s17, %s8769_s18  }
  0x46   : > { %s6647_s19 = smov [#allocation20]   ;;  %s8862_s12 = sld [smem:[#allocation159_spill]] }
  0x47   : > { %s685_s24 = sshll.u32 %s6647_s19, 4  ;;  %s686_s24 = int_to_ptr.vmem [resolvable:$true] %s685_s24 }
  0x4c   : > { %s6317_s15 = scalar_lea.hbm %s8862_s12, 256 }
  0x4d   : > { %p6318_p1 = scmp.ne.s32.totalorder %s8862_s12, %s6317_s15  ;;  %p6324_p8 = scmp.lt.u32.totalorder %s6317_s15, %s8862_s12 }
  0x4f   : > { %p6320_p3 = pnand %p6318_p1, %p6874_p7 }
  0x51   : > { %p6321_p6 = pneg %p6320_p3 }
  0x53   : > { %p6326_p9 = pnand %p6324_p8, %p6321_p6 }
  0x55   : > { %6329 = shalt.err (!%p6326_p9)
}
  0x56   : > { %s6330_s26 = scalar_lea.vmem %s660_s8, 256  ;;  %p6338_p13 = scmp.lt.s32.totalorder %s660_s8, %s660_s8 }
  0x57   : > { %p6331_p10 = scmp.ne.s32.totalorder %s660_s8, %s6330_s26  ;;  %p6339_p0 = scmp.lt.s32.totalorder %s6330_s26, %s6330_s26 }
  0x59   : > { %p6333_p11 = pnand %p6331_p10, %p6874_p7  ;;  %p6340_p2 = por %p6339_p0, %p6338_p13 }
  0x5b   : > { %p6334_p12 = pneg %p6333_p11 }
  0x5d   : > { %p6341_p4 = pnand %p6340_p2, %p6334_p12 }
  0x5f   : > { %6344 = shalt.err (!%p6341_p4)
}
  0x60   : > { %s8764_s13 = smov 64   ;;  %s8766_s20 = smov 4  }
  0x61   : > { %5906 = dma.hbm_to_vmem [thread:$0]  (!%p6862_p5), %s8862_s12, 256, %s660_s8, [#allocation18], %s8764_s13, %s8764_s13, %s8766_s20  }
  0x62   : > { %s8863_s16 = sld [smem:[#allocation161_spill]] }
  0x68   : > { %s6345_s19 = scalar_lea.hbm %s8863_s16, 4096 }
  0x69   : > { %p6346_p1 = scmp.ne.s32.totalorder %s8863_s16, %s6345_s19  ;;  %p6352_p8 = scmp.lt.u32.totalorder %s6345_s19, %s8863_s16 }
  0x6b   : > { %p6348_p3 = pnand %p6346_p1, %p6874_p7 }
  0x6d   : > { %p6349_p6 = pneg %p6348_p3 }
  0x6f   : > { %p6354_p9 = pnand %p6352_p8, %p6349_p6 }
  0x71   : > { %6357 = shalt.err (!%p6354_p9)
}
  0x72   : > { %s6358_s15 = scalar_lea.vmem %s686_s24, 4096  ;;  %p6366_p13 = scmp.lt.s32.totalorder %s686_s24, %s686_s24 }
  0x73   : > { %p6359_p10 = scmp.ne.s32.totalorder %s686_s24, %s6358_s15  ;;  %p6367_p0 = scmp.lt.s32.totalorder %s6358_s15, %s6358_s15 }
  0x75   : > { %p6361_p11 = pnand %p6359_p10, %p6874_p7  ;;  %p6368_p2 = por %p6367_p0, %p6366_p13 }
  0x77   : > { %p6362_p12 = pneg %p6361_p11 }
  0x79   : > { %p6369_p4 = pnand %p6368_p2, %p6362_p12 }
  0x7b   : > { %6372 = shalt.err (!%p6369_p4)
}
  0x7c   : > { %s8864_s8 = smov 256   ;;  %s6650_s1 = smov [#allocation23]  }
  0x7d   : > { %5912 = dma.hbm_to_vmem [thread:$0]  (!%p6862_p5), %s8863_s16, 4096, %s686_s24, [#allocation21], %s8864_s8, %s8864_s8, %s8769_s18  }
  0x7e   : > { %s711_s11 = sshll.u32 %s6650_s1, 4  ;;  %s6651_s19 = smov [#allocation16]   ;;  %s712_s11 = int_to_ptr.vmem [resolvable:$true] %s711_s11 }
  0x7f   : > { %s646_s28 = sshll.u32 %s6651_s19, 4  ;;  %s8865_s10 = sld [smem:[#allocation163_spill]]  ;;  %s647_s28 = int_to_ptr.vmem [resolvable:$true] %s646_s28 }
  0x85   : > { %s6373_s15 = scalar_lea.hbm %s8865_s10, 4096 }
  0x86   : > { %p6374_p1 = scmp.ne.s32.totalorder %s8865_s10, %s6373_s15  ;;  %p6380_p8 = scmp.lt.u32.totalorder %s6373_s15, %s8865_s10 }
  0x88   : > { %p6376_p3 = pnand %p6374_p1, %p6874_p7 }
  0x8a   : > { %p6377_p6 = pneg %p6376_p3 }
  0x8c   : > { %p6382_p9 = pnand %p6380_p8, %p6377_p6 }
  0x8e   : > { %6385 = shalt.err (!%p6382_p9)
}
  0x8f   : > { %s6386_s24 = scalar_lea.vmem %s712_s11, 4096  ;;  %p6394_p13 = scmp.lt.s32.totalorder %s712_s11, %s712_s11 }
  0x90   : > { %p6387_p10 = scmp.ne.s32.totalorder %s712_s11, %s6386_s24  ;;  %p6395_p0 = scmp.lt.s32.totalorder %s6386_s24, %s6386_s24 }
  0x92   : > { %p6389_p11 = pnand %p6387_p10, %p6874_p7  ;;  %p6396_p2 = por %p6395_p0, %p6394_p13 }
  0x94   : > { %p6390_p12 = pneg %p6389_p11 }
  0x96   : > { %p6397_p4 = pnand %p6396_p2, %p6390_p12 }
  0x98   : > { %6400 = shalt.err (!%p6397_p4)
}
  0x99   : > { %5918 = dma.hbm_to_vmem [thread:$0]  (!%p6862_p5), %s8865_s10, 4096, %s712_s11, [#allocation24], %s8864_s8, %s8864_s8, %s8769_s18  }
  0x9a   : > { %s8866_s1 = sld [smem:[#allocation158_spill]] }
  0xa0   : > { %s6401_s19 = scalar_lea.hbm %s8866_s1, 1024 }
  0xa1   : > { %p6402_p1 = scmp.ne.s32.totalorder %s8866_s1, %s6401_s19  ;;  %p6408_p8 = scmp.lt.u32.totalorder %s6401_s19, %s8866_s1 }
  0xa3   : > { %p6404_p3 = pnand %p6402_p1, %p6874_p7 }
  0xa5   : > { %p6405_p6 = pneg %p6404_p3 }
  0xa7   : > { %p6410_p9 = pnand %p6408_p8, %p6405_p6 }
  0xa9   : > { %6413 = shalt.err (!%p6410_p9)
}
  0xaa   : > { %s6414_s24 = scalar_lea.vmem %s647_s28, 1024  ;;  %p6422_p13 = scmp.lt.s32.totalorder %s647_s28, %s647_s28 }
  0xab   : > { %p6415_p10 = scmp.ne.s32.totalorder %s647_s28, %s6414_s24  ;;  %p6423_p0 = scmp.lt.s32.totalorder %s6414_s24, %s6414_s24 }
  0xad   : > { %p6417_p11 = pnand %p6415_p10, %p6874_p7  ;;  %p6424_p2 = por %p6423_p0, %p6422_p13 }
  0xaf   : > { %p6418_p12 = pneg %p6417_p11 }
  0xb1   : > { %p6425_p4 = pnand %p6424_p2, %p6418_p12 }
  0xb3   : > { %6428 = shalt.err (!%p6425_p4)
}
  0xb4   : > { %s8867_s11 = smov 4   ;;  %s8868_s12 = smov 64  }
  0xb5   : > { %5903 = dma.hbm_to_vmem [thread:$0]  (!%p6862_p5), %s8866_s1, 1024, %s647_s28, [#allocation15], %s8868_s12, %s8868_s12, %s8867_s11  }
  0xb6   : > { %s6652_s30 = smov [#allocation19]   ;;  %s6653_s23 = smov [#allocation22]  }
  0xb7   : > { %s672_s19 = sshll.u32 %s6652_s30, 4  ;;  %s698_s26 = sshll.u32 %s6653_s23, 4  ;;  %s673_s19 = int_to_ptr.vmem [resolvable:$true] %s672_s19  ;;  %s699_s26 = int_to_ptr.vmem [resolvable:$true] %s698_s26 }
  0xb8   : > { %s8869_s24 = sld [smem:[#allocation160_spill]] }
  0xbe   : > { %s6429_s18 = scalar_lea.hbm %s8869_s24, 256 }
  0xbf   : > { %p6430_p1 = scmp.ne.s32.totalorder %s8869_s24, %s6429_s18  ;;  %p6436_p8 = scmp.lt.u32.totalorder %s6429_s18, %s8869_s24 }
  0xc1   : > { %p6432_p3 = pnand %p6430_p1, %p6874_p7 }
  0xc3   : > { %p6433_p6 = pneg %p6432_p3 }
  0xc5   : > { %p6438_p9 = pnand %p6436_p8, %p6433_p6 }
  0xc7   : > { %6441 = shalt.err (!%p6438_p9)
}
  0xc8   : > { %s6442_s28 = scalar_lea.vmem %s673_s19, 256  ;;  %p6450_p13 = scmp.lt.s32.totalorder %s673_s19, %s673_s19 }
  0xc9   : > { %p6443_p10 = scmp.ne.s32.totalorder %s673_s19, %s6442_s28  ;;  %p6451_p0 = scmp.lt.s32.totalorder %s6442_s28, %s6442_s28 }
  0xcb   : > { %p6445_p11 = pnand %p6443_p10, %p6874_p7  ;;  %p6452_p2 = por %p6451_p0, %p6450_p13 }
  0xcd   : > { %p6446_p12 = pneg %p6445_p11 }
  0xcf   : > { %p6453_p4 = pnand %p6452_p2, %p6446_p12 }
  0xd1   : > { %6456 = shalt.err (!%p6453_p4)
}
  0xd2   : > { %5909 = dma.hbm_to_vmem [thread:$0]  (!%p6862_p5), %s8869_s24, 256, %s673_s19, [#allocation18], %s8868_s12, %s8868_s12, %s8867_s11  }
  0xd3   : > { %s8870_s9 = sld [smem:[#allocation162_spill]] }
  0xd9   : > { %s6457_s20 = scalar_lea.hbm %s8870_s9, 1024 }
  0xda   : > { %p6458_p1 = scmp.ne.s32.totalorder %s8870_s9, %s6457_s20  ;;  %p6464_p8 = scmp.lt.u32.totalorder %s6457_s20, %s8870_s9 }
  0xdc   : > { %p6460_p3 = pnand %p6458_p1, %p6874_p7 }
  0xde   : > { %p6461_p6 = pneg %p6460_p3 }
  0xe0   : > { %p6466_p9 = pnand %p6464_p8, %p6461_p6 }
  0xe2   : > { %6469 = shalt.err (!%p6466_p9)
}
  0xe3   : > { %s6470_s13 = scalar_lea.vmem %s699_s26, 1024  ;;  %p6478_p13 = scmp.lt.s32.totalorder %s699_s26, %s699_s26 }
  0xe4   : > { %p6471_p10 = scmp.ne.s32.totalorder %s699_s26, %s6470_s13  ;;  %p6479_p0 = scmp.lt.s32.totalorder %s6470_s13, %s6470_s13 }
  0xe6   : > { %p6473_p11 = pnand %p6471_p10, %p6874_p7  ;;  %p6480_p2 = por %p6479_p0, %p6478_p13 }
  0xe8   : > { %p6474_p12 = pneg %p6473_p11 }
  0xea   : > { %p6481_p4 = pnand %p6480_p2, %p6474_p12 }
  0xec   : > { %6484 = shalt.err (!%p6481_p4)
}
  0xed   : > { %s8871_s11 = smov 16   ;;  %s6654_s28 = smov [#allocation25]  }
  0xee   : > { %5915 = dma.hbm_to_vmem [thread:$0]  (!%p6862_p5), %s8870_s9, 1024, %s699_s26, [#allocation21], %s8864_s8, %s8864_s8, %s8871_s11  }
  0xef   : > { %s733_s10 = sshll.u32 %s6654_s28, 4  ;;  %s8872_s14 = sld [smem:[#allocation167_spill]]  ;;  %s734_s10 = int_to_ptr.vmem [resolvable:$true] %s733_s10 }
  0xf5   : > { %s6485_s16 = scalar_lea.hbm %s8872_s14, 512 }
  0xf6   : > { %p6486_p1 = scmp.ne.s32.totalorder %s8872_s14, %s6485_s16  ;;  %p6492_p8 = scmp.lt.u32.totalorder %s6485_s16, %s8872_s14 }
  0xf8   : > { %p6488_p3 = pnand %p6486_p1, %p6874_p7 }
  0xfa   : > { %p6489_p6 = pneg %p6488_p3 }
  0xfc   : > { %p6494_p9 = pnand %p6492_p8, %p6489_p6 }
  0xfe   : > { %6497 = shalt.err (!%p6494_p9)
}
  0xff   : > { %s6498_s8 = scalar_lea.vmem %s734_s10, 512  ;;  %p6506_p13 = scmp.lt.s32.totalorder %s734_s10, %s734_s10 }
 0x100   : > { %p6499_p10 = scmp.ne.s32.totalorder %s734_s10, %s6498_s8  ;;  %p6507_p0 = scmp.lt.s32.totalorder %s6498_s8, %s6498_s8 }
 0x102   : > { %p6501_p11 = pnand %p6499_p10, %p6874_p7  ;;  %p6508_p2 = por %p6507_p0, %p6506_p13 }
 0x104   : > { %p6502_p12 = pneg %p6501_p11 }
 0x106   : > { %p6509_p4 = pnand %p6508_p2, %p6502_p12 }
 0x108   : > { %6512 = shalt.err (!%p6509_p4)
}
 0x109   : > { %s6655_s26 = smov 128   ;;  %s6656_s5 = smov 8  }
 0x10a   : > { %5921 = dma.hbm_to_vmem [thread:$0]  (!%p6862_p5), %s8872_s14, 512, %s734_s10, [#allocation24], %s6655_s26, %s6655_s26, %s6656_s5  }
 0x10b   : > { %s53_s11 = sadd.s32 1, %s6633_s21  ;;  %s56_s12 = sadd.s32 1, %s6637_s3 }
 0x10c   : > { %p54_p7 = scmp.ge.s32.totalorder %s53_s11, 6  ;;  %s65_s19 = sadd.s32 1, %s6621_s7 }
 0x10d   : > { %p72_p1 = scmp.ne.s32.totalorder %s6621_s7, %s6617_s0  ;;  %p73_p3 = scmp.eq.s32.totalorder %s6641_s25, 0 }
 0x10e   : > { %s9196_s11 = smov (%p54_p7, %s53_s11), 0  ;;  %s9198_s12 = smov (!%p54_p7, %s56_s12), %s6637_s3 }
 0x10f   : > { %s60_s27 = ssub.s32 %s6633_s21, %s9196_s11  ;;  %p7048_p6 = por %p73_p3, %p72_p1 }
 0x110   : > { %p58_p5 = scmp.ge.s32.totalorder %s9198_s12, 2  ;;  %p78_p8 = scmp.ne.s32.totalorder %s6617_s0, %s6613_s29 }
 0x111   : > { %s542_s10 = sadd.s32 1, %s6609_s2  ;;  %p552_p9 = scmp.ne.s32.totalorder %s6609_s2, %s6605_s6 }
 0x112   : > { %s9200_s12 = smov (%p58_p5, %s9198_s12), 0  ;;  %p8874_p10 = scmp.ne.s32.totalorder %s8856_s4, 0 }
 0x113   : > { %s8876_s18 = sadd.s32 4294967295, %s6641_s25   ;;  %s61_s16 = ssub.s32 %s6637_s3, %s9200_s12 }
 0x114   : > { %p7061_p11 = por %p8874_p10, %p78_p8  ;;  %p553_p12 = scmp.eq.s32.totalorder %s8876_s18, 11 }
 0x115   : > { %p5934_p13 = scmp.lt.s32.totalorder %s6641_s25, 12  ;;  %s62_s20 = sor.u32 %s61_s16, %s60_s27 }
 0x116   : > { %p540_p0 = scmp.eq.s32.totalorder %s61_s16, 0  ;;  %p63_p2 = scmp.eq.s32.totalorder %s62_s20, 0 }
 0x117   : > { %p7070_p4 = por %p553_p12, %p552_p9  ;;  %s768_s15 = sand.u32 1, %s6621_s7  }
 0x118   : > { %s7075_s30 = scalar_select %p540_p0, %s6609_s2, %s542_s10  }
 0x119   : > { %s8877_s29 = scalar_select %p7070_p4, 1, 0 }
 0x11a   : > { %s7078_s23 = scalar_select %p63_p2, %s6621_s7, %s65_s19  }
 0x11b   : > { %s5487_s8 = sshll.u32 %s6637_s3, 2  ;;  %s5486_s26 = sshll.u32 %s768_s15, 5 }
 0x11c   : > { %s5488_s5 = sshll.u32 %s6633_s21, 3  ;;  %s772_s13 = scalar_lea.vmem [#allocation12], %s5486_s26 }
 0x11d   : > { %s778_s17 = sadd.s32 %s5488_s5, %s5487_s8  ;;  %s782_s18 = sshll.u32 %s772_s13, 4  ;;  %s7083_s18 = int_to_ptr.vmem [resolvable:$true] %s782_s18 }
 0x11e   : > { %s5489_s27 = sshll.u32 %s778_s17, 7  ;;  %s8878_s1 = sld [smem:[#allocation153_spill]] }
 0x11f   : > { %p7094_p7 = pnand %p5934_p13, %p7048_p6  ;;  %s769_s10 = scalar_lea.sflag [#allocation13], %s768_s15 }
 0x121   : > { %p6515_p3 = pneg %p7094_p7 }
 0x124   : > { %s7088_s9 = scalar_lea.hbm %s8878_s1, %s5489_s27  ;;  %s6518_s5 = scalar_lea.hbm %s8878_s1, 6144 }
 0x125   : > { %s6513_s8 = scalar_lea.hbm %s7088_s9, 512  ;;  %p6519_p6 = scmp.lt.u32.totalorder %s7088_s9, %s8878_s1 }
 0x126   : > { %p6514_p1 = scmp.ne.s32.totalorder %s7088_s9, %s6513_s8  ;;  %p6520_p9 = scmp.lt.u32.totalorder %s6518_s5, %s6513_s8 }
 0x127   : > { %p6522_p12 = scmp.lt.u32.totalorder %s6513_s8, %s7088_s9 }
 0x128   : > { %p6516_p5 = pnand %p6515_p3, %p6514_p1  ;;  %p6521_p10 = por %p6520_p9, %p6519_p6 }
 0x12a   : > { %p6517_p8 = pneg %p6516_p5  ;;  %p6523_p13 = por %p6522_p12, %p6521_p10 }
 0x12c   : > { %p6524_p0 = pnand %p6523_p13, %p6517_p8 }
 0x12e   : > { %6527 = shalt.err (!%p6524_p0)
}
 0x12f   : > { %s6528_s15 = scalar_lea.vmem %s7083_s18, 512  ;;  %s6657_s27 = smov [#allocation12]  }
 0x130   : > { %p6529_p2 = scmp.ne.s32.totalorder %s7083_s18, %s6528_s15  ;;  %s6533_s16 = sshll.u32 %s6657_s27, 4  ;;  %s6534_s16 = int_to_ptr.vmem [resolvable:$false] %s6533_s16 }
 0x131   : > { %s6535_s20 = scalar_lea.vmem %s6534_s16, 1024  ;;  %p6536_p4 = scmp.lt.s32.totalorder %s7083_s18, %s6534_s16 }
 0x132   : > { %p6531_p1 = pnand %p6529_p2, %p6515_p3  ;;  %p6537_p6 = scmp.lt.s32.totalorder %s6535_s20, %s6528_s15 }
 0x134   : > { %p6532_p5 = pneg %p6531_p1  ;;  %p6538_p9 = por %p6537_p6, %p6536_p4 }
 0x136   : > { %p6539_p10 = pnand %p6538_p9, %p6532_p5 }
 0x138   : > { %6542 = shalt.err (!%p6539_p10)
}
 0x139   : > { %5925 = dma.hbm_to_vmem [thread:$0]  (!%p7094_p7), %s7088_s9, 512, %s7083_s18, %s769_s10  }
 0x13a   : > { %s8880_s8 = sld [smem:[#allocation36_spill]] }
 0x140   : > { %p8881_p8 = scmp.ne.s32.totalorder %s8880_s8, 0 }
 0x142   : > { %807 = sbr.rel (%p8881_p8) target bundleno = 2853 (0xb25), region = 108 }
 0x149   : > { %s809_s28 = sand.u32 1, %s6617_s0  }
 0x14a   : > { %s5491_s26 = sshll.u32 %s809_s28, 5  ;;  %s810_s5 = scalar_lea.sflag [#allocation13], %s809_s28 }
 0x14b   : > { %s7126_s17 = scalar_lea.vmem [#allocation12], %s5491_s26 }
 0x14c   : > { %6584 = dma.done.wait (%p7061_p11), %s810_s5, 512  }
 0x14d   : > { %6586 = vsyncadd (%p7061_p11), %s810_s5, 4294966784  ;;  %p8882_p4 = scmp.ne.s32.totalorder %s8856_s4, 0 }
 0x14f   : > { %6588 = dma.done.wait (%p8882_p4), [#allocation15], 5120  }
 0x150   : > { %6590 = vsyncadd (%p8882_p4), [#allocation15], 4294962176 }
 0x151   : > { %6592 = dma.done.wait (%p8882_p4), [#allocation18], 512  }
 0x152   : > { %6594 = vsyncadd (%p8882_p4), [#allocation18], 4294966784 }
 0x153   : > { %6596 = dma.done.wait (%p8882_p4), [#allocation21], 5120  }
 0x154   : > { %6598 = vsyncadd (%p8882_p4), [#allocation21], 4294962176 }
 0x155   : > { %6600 = dma.done.wait (%p8882_p4), [#allocation24], 4608  }
 0x156   : > { %6602 = vsyncadd (%p8882_p4), [#allocation24], 4294962688  ;;  %s8883_s9 = sld [smem:[#allocation35_spill]]  ;;  %s911_s22 = sand.u32 1, %s6605_s6  }
 0x157   : > { %s5862_s19 = smul.u32 48, %s911_s22  ;;  %s8884_s16 = sld [smem:[#allocation154_spill]] }
 0x158   : > { %s8885_s26 = sld [smem:[#allocation155_spill]]  ;;  %s8886_s14 = sld [smem:[#allocation34_spill]] }
 0x159   : > { %s7166_s5 = scalar_lea.vmem [#allocation26], %s5862_s19  ;;  %s7168_s1 = scalar_lea.vmem [#allocation27], %s5862_s19 }
 0x15a   : > { %s7170_s22 = scalar_lea.vmem [#allocation28], %s5862_s19 }
 0x15c   : > { %s7150_s18 = sshll.u32 %s8883_s9, 3  ;;  %p932_p7 = scmp.lt.s32.totalorder %s8883_s9, 1 }
 0x15d   : > { %p927_p11 = scmp.lt.s32.totalorder %s7150_s18, 15 }
 0x15e   : > { %s9202_s9 = smov (!%p932_p7, %s8883_s9), 1  ;;  %p5503_p3 = scmp.ne.s32.totalorder %s8886_s14, 0 }
 0x15f   : > { %s928_s10 = scalar_select %p927_p11, %s7150_s18, 15 }
 0x160   : > { %s5502_s20 = sshll.u32 %s9202_s9, 3  ;;  %940 = sbr.rel (%p5503_p3) target bundleno = 577 (0x241), region = 148  ;;  %v6043_v0 = vld [vmem:[#allocation17] sm:$0xff] (!%p5503_p3)   ;;  %v6044_v1 = vld [vmem:[#allocation17 + $0x8] sm:$0xff] (!%p5503_p3)   ;;  %v6658_v2 = vmov (!%p5503_p3), 0.0   ;;  %vm945_vm0 = vcmask (!%p5503_p3), 261120  }
 0x161   : > { %s5501_s13 = sshll.u32 %s928_s10, 2  ;;  %s7164_s6 = scalar_lea.vmem %s8885_s26, %s5502_s20  ;;  %941 = vst [vmem:[#allocation2] sm:$0xff] (!%p5503_p3), %v6658_v2  ;;  %942 = vst [vmem:[#allocation3] sm:$0xff] (!%p5503_p3), %v6658_v2  ;;  %5728 = vmatprep.subr.bf16.mxu0 (!%p5503_p3), %v6043_v0  ;;  %5848 = vmatprep.subr.bf16.mxu1 (!%p5503_p3), %v6043_v0  ;;  %vm947_vm1 = vcmask (!%p5503_p3), 310272  }
 0x162   : > { %s7159_s4 = scalar_lea.vmem %s8884_s16, %s5501_s13  ;;  %943 = vst [vmem:[#allocation4] sm:$0xff] (!%p5503_p3), %v6658_v2  ;;  %944 = vst [vmem:[#allocation5] sm:$0xff] (!%p5503_p3), %v6658_v2  ;;  %5729 = vmatpush3.bf16.msra.mxu0 (!%p5503_p3), %v6043_v0  ;;  %5850 = vmatpush3.bf16.msra.mxu1 (!%p5503_p3), %v6043_v0 }
 0x163   : > { %946 = vst.msk [vmem:[#allocation6] sm:$0xff] (!%p5503_p3), %vm945_vm0, %v6658_v2  ;;  %v6045_v3 = vld [vmem:[%s7159_s4] sm:$0xff] (!%p5503_p3)   ;;  %v6046_v4 = vld [vmem:[%s7159_s4 + $0x10] sm:$0xff] (!%p5503_p3)   ;;  %5730 = vmatprep.subr.bf16.mxu0 (!%p5503_p3), %v6044_v1  ;;  %5849 = vmatprep.subr.bf16.mxu1 (!%p5503_p3), %v6044_v1  ;;  %v6047_v5 = vld [vmem:[%s7159_s4 + $0x8] sm:$0xff] (!%p5503_p3)  }
 0x164   : > { %948 = vst.msk [vmem:[#allocation7] sm:$0xff] (!%p5503_p3), %vm947_vm1, %v6658_v2  ;;  %949 = vst.msk [vmem:[#allocation8] sm:$0xff] (!%p5503_p3), %vm947_vm1, %v6658_v2  ;;  %5732 = vmatprep.mubr.msk.bf16.mxu0 (!%p5503_p3), %vm945_vm0, %v6045_v3  ;;  %5736 = vmatprep.mubr.msk.bf16.mxu1 (!%p5503_p3), %vm945_vm0, %v6046_v4  ;;  %v6048_v6 = vld [vmem:[%s7159_s4 + $0x18] sm:$0xff] (!%p5503_p3)  }
 0x166   : > { %5731 = vmatpush3.bf16.msra.mxu0 (!%p5503_p3), %v6044_v1  ;;  %5851 = vmatpush3.bf16.msra.mxu1 (!%p5503_p3), %v6044_v1 }
 0x169   : > { %5733 = vmatmul.mubr.msk.bf16.vlgmr.msra.gmra.mrb[0].mxu0 %vm945_vm0, %v6047_v5  ;;  %5737 = vmatmul.mubr.msk.bf16.vlgmr.msra.gmra.mrb[0].mxu1 %vm945_vm0, %v6048_v6 }
 0x23c   : > { %v5734_v7 = vpop.f32.mrb[0].mxu0  ;;  %v5738_v8 = vpop.f32.mrb[0].mxu1 }
 0x23d   : > { %1073 = vst [vmem:[#allocation9 + $0x10] sm:$0xff] %v5734_v7  ;;  %1077 = vst [vmem:[#allocation9 + $0x30] sm:$0xff] %v5738_v8  ;;  %v1040_v9 = vpop.f32.mrb[1].mxu0  ;;  %v1056_v10 = vpop.f32.mrb[1].mxu1 }
 0x23e   : > { %1071 = vst [vmem:[#allocation9] sm:$0xff] %v1040_v9  ;;  %1075 = vst [vmem:[#allocation9 + $0x20] sm:$0xff] %v1056_v10  ;;  %v5735_v11 = vpop.f32.mrb[2].mxu0  ;;  %v5739_v12 = vpop.f32.mrb[2].mxu1 }
 0x23f   : > { %1074 = vst [vmem:[#allocation9 + $0x18] sm:$0xff] %v5735_v11  ;;  %1078 = vst [vmem:[#allocation9 + $0x38] sm:$0xff] %v5739_v12  ;;  %v1043_v13 = vpop.f32.mrb[3].mxu0  ;;  %v1059_v14 = vpop.f32.mrb[3].mxu1 }
 0x240   : > { %1072 = vst [vmem:[#allocation9 + $0x8] sm:$0xff] %v1043_v13  ;;  %1076 = vst [vmem:[#allocation9 + $0x28] sm:$0xff] %v1059_v14 }
 0x241 PF: > { %v8776_v15 = vlaneseq  ;;  %s8905_s19 = sld [smem:[#allocation156_spill]]  ;;  %v8774_v51 = vmov 0   ;;  %vm1134_vm2 = vcmask 261120   ;;  %v6063_v54 = vld [vmem:[#allocation14 + $0x4] ss:$16 sps:$4 sm:$0xff]   ;;  %s8987_s20 = sld [smem:[#allocation166_spill]] }
 0x242   : > { %1170 = vmatprep.mubr.bf16.mxu0 %v8774_v51  ;;  %1490 = vmatprep.mubr.bf16.mxu1 %v8774_v51  ;;  %v6061_v57 = vld [vmem:[#allocation14] ss:$16 sps:$4 sm:$0xff]   ;;  %v6066_v58 = vld [vmem:[#allocation14 + $0x24] ss:$16 sps:$4 sm:$0xff]   ;;  %v6073_v6 = vld [vmem:[#allocation14 + $0xc] ss:$16 sps:$4 sm:$0xff]  }
 0x243   : > { %v7183_v18 = vshrl.u32 %v8776_v15, 7  ;;  %v6064_v61 = vld [vmem:[#allocation14 + $0x20] ss:$16 sps:$4 sm:$0xff]   ;;  %v6069_v62 = vld [vmem:[#allocation14 + $0x44] ss:$16 sps:$4 sm:$0xff]   ;;  %1458 = vmatprep.subr.bf16.mxu1 %v6073_v6  ;;  %vm6661_vm3 = vmmov 0  }
 0x244   : > { %v1079_v48 = vld [vmem:[#allocation6] sm:$0xff]  ;;  %v6067_v1 = vld [vmem:[#allocation14 + $0x40] ss:$16 sps:$4 sm:$0xff]   ;;  %v6072_v2 = vld [vmem:[#allocation14 + $0x64] ss:$16 sps:$4 sm:$0xff]   ;;  %s9167_s9 = sld [smem:[#allocation168_spill]] }
 0x245   : > { %v1640_v16 = vld [vmem:[#allocation8] sm:$0xff]  ;;  %v1639_v17 = vld [vmem:[#allocation7] sm:$0xff]  ;;  %8887 = vst [vmem:[#allocation37_spill] sm:$0xff] %v7183_v18  ;;  %v7186_v19 = vsub.s32 0, %v7183_v18  ;;  %v7189_v20 = vsub.s32 1, %v7183_v18  ;;  %v7198_v23 = vsub.s32 3, %v7183_v18  ;;  %v1085_v50 = vpack.c.bf16 %v1079_v48, %v1079_v48 }
 0x246   : > { %v7209_v26 = vsub.s32 2, %v7183_v18  ;;  %v7238_v31 = vsub.s32 5, %v7183_v18  ;;  %v7243_v32 = vsub.s32 4, %v7183_v18  ;;  %v7254_v35 = vsub.s32 7, %v7183_v18  ;;  %v6070_v5 = vld [vmem:[#allocation14 + $0x60] ss:$16 sps:$4 sm:$0xff]  }
 0x247   : > { %8888 = vst [vmem:[#allocation38_spill] sm:$0xff] %v7186_v19  ;;  %8889 = vst [vmem:[#allocation39_spill] sm:$0xff] %v7189_v20  ;;  %v7192_v21 = vrot.slane %v1640_v16, %v7186_v19  ;;  %v7195_v22 = vrot.slane %v1639_v17, %v7186_v19  ;;  %v7203_v24 = vrot.slane %v1640_v16, %v7189_v20  ;;  %v7257_v36 = vsub.s32 6, %v7183_v18  ;;  %v6049_v43 = vld [vmem:[%s8905_s19 + $0x4] ss:$16 sps:$4 sm:$0xff]   ;;  %s8988_s8 = smov %s8987_s20  ;;  %s3515_s10 = sld [smem:[#allocation10]] }
 0x248   : > { %8892 = vst [vmem:[#allocation42_spill] sm:$0xff] %v7198_v23  ;;  %v7206_v25 = vrot.slane %v1639_v17, %v7189_v20  ;;  %8894 = vst [vmem:[#allocation44_spill] sm:$0xff] %v7209_v26  ;;  %v7214_v27 = vrot.slane %v1639_v17, %v7198_v23  ;;  %v7217_v28 = vrot.slane %v1639_v17, %v7209_v26  ;;  %v6051_v44 = vld [vmem:[%s8905_s19] ss:$16 sps:$4 sm:$0xff]   ;;  %1138 = vmatprep.subr.bf16.mxu0 %v6049_v43  ;;  %v6052_v45 = vld [vmem:[%s8905_s19 + $0x24] ss:$16 sps:$4 sm:$0xff]  }
 0x249   : > { %8890 = vst [vmem:[#allocation40_spill] sm:$0xff] %v7192_v21  ;;  %8891 = vst [vmem:[#allocation41_spill] sm:$0xff] %v7195_v22  ;;  %1731 = vbcast.lane.b32.xlu1 %v7192_v21, 264  ;;  %1647 = vbcast.lane.b32.xlu0 %v7195_v22, 264  ;;  %v7222_v29 = vrot.slane %v1640_v16, %v7198_v23  ;;  %v7225_v30 = vrot.slane %v1640_v16, %v7209_v26  ;;  %v6054_v46 = vld [vmem:[%s8905_s19 + $0x20] ss:$16 sps:$4 sm:$0xff]  }
 0x24a   : > { %8893 = vst [vmem:[#allocation43_spill] sm:$0xff] %v7203_v24  ;;  %8897 = vst [vmem:[#allocation47_spill] sm:$0xff] %v7238_v31  ;;  %v7248_v33 = vrot.slane %v1639_v17, %v7238_v31  ;;  %v7251_v34 = vrot.slane %v1639_v17, %v7243_v32  ;;  %v7262_v37 = vrot.slane %v1640_v16, %v7238_v31  ;;  %1139 = vmatpush1.bf16.msra.mxu0 %v6051_v44  ;;  %v6057_v47 = vld [vmem:[%s8905_s19 + $0xc] ss:$16 sps:$4 sm:$0xff]   ;;  %v6055_v49 = vld [vmem:[%s8905_s19 + $0x8] ss:$16 sps:$4 sm:$0xff]  }
 0x24b   : > { %8895 = vst [vmem:[#allocation45_spill] sm:$0xff] %v7222_v29  ;;  %8896 = vst [vmem:[#allocation46_spill] sm:$0xff] %v7225_v30  ;;  %v7265_v38 = vrot.slane %v1640_v16, %v7243_v32  ;;  %v7272_v39 = vrot.slane %v1639_v17, %v7254_v35  ;;  %v7275_v40 = vrot.slane %v1639_v17, %v7257_v36  ;;  %1140 = vmatprep.subr.bf16.mxu0 %v6052_v45  ;;  %v6060_v52 = vld [vmem:[%s8905_s19 + $0x2c] ss:$16 sps:$4 sm:$0xff]   ;;  %v6058_v53 = vld [vmem:[%s8905_s19 + $0x28] ss:$16 sps:$4 sm:$0xff]  }
 0x24c   : > { %8898 = vst [vmem:[#allocation48_spill] sm:$0xff] %v7243_v32  ;;  %8899 = vst [vmem:[#allocation49_spill] sm:$0xff] %v7248_v33  ;;  %v7280_v41 = vrot.slane %v1640_v16, %v7254_v35  ;;  %v7283_v42 = vrot.slane %v1640_v16, %v7257_v36  ;;  %v6077_v7 = vld [vmem:[#allocation14 + $0x84] ss:$16 sps:$4 sm:$0xff]   ;;  %v6078_v8 = vld [vmem:[#allocation14 + $0x8] ss:$16 sps:$4 sm:$0xff]  }
 0x24d   : > { %1739 = vbcast.lane.b32.xlu1 %v7203_v24, 264  ;;  %1655 = vbcast.lane.b32.xlu0 %v7206_v25, 264  ;;  %8900 = vst [vmem:[#allocation50_spill] sm:$0xff] %v7251_v34  ;;  %8901 = vst [vmem:[#allocation51_spill] sm:$0xff] %v7254_v35  ;;  %v6075_v11 = vld [vmem:[#allocation14 + $0x80] ss:$16 sps:$4 sm:$0xff]  }
 0x24e   : > { %8902 = vst [vmem:[#allocation52_spill] sm:$0xff] %v7257_v36  ;;  %8903 = vst [vmem:[#allocation53_spill] sm:$0xff] %v7280_v41  ;;  %1141 = vmatpush1.bf16.msra.mxu0 %v6054_v46  ;;  %1459 = vmatpush1.bf16.msra.mxu1 %v6078_v8  ;;  %v6079_v12 = vld [vmem:[#allocation14 + $0x2c] ss:$16 sps:$4 sm:$0xff]   ;;  %v6083_v13 = vld [vmem:[#allocation14 + $0xa4] ss:$16 sps:$4 sm:$0xff]  }
 0x24f   : > { %8904 = vst [vmem:[#allocation54_spill] sm:$0xff] %v7283_v42  ;;  %1179 = vmatprep.subr.bf16.mxu0 %v6057_v47  ;;  %v6084_v14 = vld [vmem:[#allocation14 + $0x28] ss:$16 sps:$4 sm:$0xff]   ;;  %1460 = vmatprep.subr.bf16.mxu1 %v6079_v12  ;;  %v6081_v43 = vld [vmem:[#allocation14 + $0xa0] ss:$16 sps:$4 sm:$0xff]   ;;  %vm3569_vm4 = vcmask 1041409  }
 0x250   : > { %v6085_v44 = vld [vmem:[#allocation14 + $0x4c] ss:$16 sps:$4 sm:$0xff]   ;;  %v6089_v45 = vld [vmem:[#allocation14 + $0xc4] ss:$16 sps:$4 sm:$0xff]   ;;  %v6090_v46 = vld [vmem:[#allocation14 + $0x48] ss:$16 sps:$4 sm:$0xff]  }
 0x251   : > { %1671 = vbcast.lane.b32.xlu1 %v7214_v27, 264  ;;  %1663 = vbcast.lane.b32.xlu0 %v7217_v28, 264  ;;  %v6102_v8 = vld [vmem:[#allocation14 + $0xa8] ss:$16 sps:$4 sm:$0xff]   ;;  %vm3571_vm5 = vcmask 1042434   ;;  %vm3573_vm6 = vcmask 1043459  }
 0x252   : > { %5522 = vmatmul.mubr.msk.bf16.vlgmr.msra.gmra.mrb[0].mxu0 %vm1134_vm2, %v1085_v50  ;;  %1461 = vmatpush1.bf16.msra.mxu1 %v6084_v14  ;;  %v6105_v14 = vld [vmem:[#allocation14 + $0xc8] ss:$16 sps:$4 sm:$0xff]   ;;  %vm3575_vm7 = vcmask 1044484   ;;  %vm3577_vm8 = vcmask 1045509   ;;  %vm3579_vm9 = vcmask 1046534   ;;  %vm3581_vm10 = vcmask 1047559  }
 0x253   : > { %1180 = vmatpush1.bf16.msra.mxu0 %v6055_v49  ;;  %1211 = vmatprep.mubr.bf16.mxu0 %v8774_v51  ;;  %v6087_v49 = vld [vmem:[#allocation14 + $0xc0] ss:$16 sps:$4 sm:$0xff]   ;;  %vm3585_vm12 = vcmask 64512   ;;  %vm3682_vm13 = vcmask 1043456   ;;  %s9172_s16 = sld [smem:[#allocation165_spill]]  ;;  %s9173_s14 = sld [smem:[#allocation164_spill]] }
 0x254   : > { %1181 = vmatprep.subr.bf16.mxu0 %v6060_v52  ;;  %1462 = vmatprep.subr.bf16.mxu1 %v6085_v44  ;;  %v6095_v52 = vld [vmem:[#allocation14 + $0xe4] ss:$16 sps:$4 sm:$0xff]   ;;  %s9177_s26 = sld [smem:[#allocation171_spill]]  ;;  %vm3601_vm14 = vcmask 187512   ;;  %s5042_s28 = sld [smem:[#allocation11]]  ;;  %vm5049_vm15 = vcmask 7168  }
 0x255   : > { %1755 = vbcast.lane.b32.xlu1 %v7222_v29, 264  ;;  %1747 = vbcast.lane.b32.xlu0 %v7225_v30, 264  ;;  %p9180_p12 = scmp.ne.s32.totalorder %s8877_s29, 0 }
 0x256   : > { %1463 = vmatpush1.bf16.msra.mxu1 %v6090_v46  ;;  %v6108_v46 = vld [vmem:[#allocation14 + $0xe8] ss:$16 sps:$4 sm:$0xff]  }
 0x257   : > { %1182 = vmatpush1.bf16.msra.mxu0 %v6058_v53  ;;  %v6096_v53 = vld [vmem:[#allocation14 + $0x68] ss:$16 sps:$4 sm:$0xff]  }
 0x258   : > { %1417 = vmatprep.subr.bf16.mxu0 %v6063_v54 }
 0x259   : > { %1815 = vbcast.lane.b32.xlu1 %v7206_v25, 265  ;;  %1811 = vbcast.lane.b32.xlu0 %v7195_v22, 265 }
 0x25a   : > { %5523 = vmatmul.mubr.msk.bf16.vlgmr.msra.gmra.mrb[4].mxu0 %vm1134_vm2, %v1085_v50  ;;  %v6091_v50 = vld [vmem:[#allocation14 + $0x6c] ss:$16 sps:$4 sm:$0xff]  }
 0x25b   : > { %1418 = vmatpush1.bf16.msra.mxu0 %v6061_v57  ;;  %1449 = vmatprep.mubr.bf16.mxu0 %v8774_v51 }
 0x25c   : > { %1419 = vmatprep.subr.bf16.mxu0 %v6066_v58  ;;  %1464 = vmatprep.subr.bf16.mxu1 %v6091_v50  ;;  %v6093_v58 = vld [vmem:[#allocation14 + $0xe0] ss:$16 sps:$4 sm:$0xff]  }
 0x25d   : > { %1823 = vbcast.lane.b32.xlu1 %v7214_v27, 265  ;;  %1819 = vbcast.lane.b32.xlu0 %v7217_v28, 265 }
 0x25e   : > { %1465 = vmatpush1.bf16.msra.mxu1 %v6096_v53 }
 0x25f   : > { %1420 = vmatpush1.bf16.msra.mxu0 %v6064_v61  ;;  %v6097_v61 = vld [vmem:[#allocation14 + $0x8c] ss:$16 sps:$4 sm:$0xff]  }
 0x260   : > { %1421 = vmatprep.subr.bf16.mxu0 %v6069_v62  ;;  %v1080_v62 = vld [vmem:[#allocation2] sm:$0xff]  ;;  %1466 = vmatprep.subr.bf16.mxu1 %v6097_v61 }
 0x261   : > { %1867 = vbcast.lane.b32.xlu1 %v7203_v24, 265  ;;  %1863 = vbcast.lane.b32.xlu0 %v7192_v21, 265 }
 0x263   : > { %1422 = vmatpush1.bf16.msra.mxu0 %v6067_v1  ;;  %v6099_v1 = vld [vmem:[#allocation14 + $0x88] ss:$16 sps:$4 sm:$0xff]  }
 0x264   : > { %1423 = vmatprep.subr.bf16.mxu0 %v6072_v2  ;;  %v1224_v2 = vpack.c.bf16 %v1080_v62, %v1080_v62  ;;  %1467 = vmatpush1.bf16.msra.mxu1 %v6099_v1 }
 0x265   : > { %1875 = vbcast.lane.b32.xlu1 %v7222_v29, 265  ;;  %1871 = vbcast.lane.b32.xlu0 %v7225_v30, 265 }
 0x267   : > { %1424 = vmatpush1.bf16.msra.mxu0 %v6070_v5 }
 0x268   : > { %1425 = vmatprep.subr.bf16.mxu0 %v6077_v7  ;;  %v6100_v7 = vld [vmem:[#allocation14 + $0xac] ss:$16 sps:$4 sm:$0xff]  }
 0x269   : > { %1919 = vbcast.lane.b32.xlu1 %v7206_v25, 266  ;;  %1915 = vbcast.lane.b32.xlu0 %v7195_v22, 266 }
 0x26a   : > { %1468 = vmatprep.subr.bf16.mxu1 %v6100_v7 }
 0x26b   : > { %1426 = vmatpush1.bf16.msra.mxu0 %v6075_v11  ;;  %1469 = vmatpush1.bf16.msra.mxu1 %v6102_v8 }
 0x26c   : > { %1427 = vmatprep.subr.bf16.mxu0 %v6083_v13  ;;  %v6103_v13 = vld [vmem:[#allocation14 + $0xcc] ss:$16 sps:$4 sm:$0xff]  }
 0x26d   : > { %1927 = vbcast.lane.b32.xlu1 %v7214_v27, 266  ;;  %1923 = vbcast.lane.b32.xlu0 %v7217_v28, 266 }
 0x26e   : > { %1470 = vmatprep.subr.bf16.mxu1 %v6103_v13 }
 0x26f   : > { %1428 = vmatpush1.bf16.msra.mxu0 %v6081_v43  ;;  %1471 = vmatpush1.bf16.msra.mxu1 %v6105_v14 }
 0x270   : > { %1429 = vmatprep.subr.bf16.mxu0 %v6089_v45  ;;  %v6106_v45 = vld [vmem:[#allocation14 + $0xec] ss:$16 sps:$4 sm:$0xff]  }
 0x271   : > { %1687 = vbcast.lane.b32.xlu1 %v7248_v33, 264  ;;  %1679 = vbcast.lane.b32.xlu0 %v7251_v34, 264 }
 0x272   : > { %1472 = vmatprep.subr.bf16.mxu1 %v6106_v45 }
 0x273   : > { %1430 = vmatpush1.bf16.msra.mxu0 %v6087_v49  ;;  %1473 = vmatpush1.bf16.msra.mxu1 %v6108_v46 }
 0x274   : > { %1431 = vmatprep.subr.bf16.mxu0 %v6095_v52 }
 0x275   : > { %1771 = vbcast.lane.b32.xlu1 %v7262_v37, 264  ;;  %1763 = vbcast.lane.b32.xlu0 %v7265_v38, 264 }
 0x276   : > { %1491 = vmatmul.mubr.bf16.vlgmr.msra.gmra.mrb[0].mxu1 %v1224_v2 }
 0x277   : > { %1432 = vmatpush1.bf16.msra.mxu0 %v6093_v58 }
 0x279   : > { %1971 = vbcast.lane.b32.xlu1 %v7203_v24, 266  ;;  %1967 = vbcast.lane.b32.xlu0 %v7192_v21, 266 }
 0x27a   : > { %1450 = vmatmul.mubr.bf16.vlgmr.msra.gmra.mrb[0].mxu0 %v1224_v2 }
 0x27d   : > { %1703 = vbcast.lane.b32.xlu1 %v7272_v39, 264  ;;  %1695 = vbcast.lane.b32.xlu0 %v7275_v40, 264 }
 0x281   : > { %1787 = vbcast.lane.b32.xlu1 %v7280_v41, 264  ;;  %1779 = vbcast.lane.b32.xlu0 %v7283_v42, 264 }
 0x285   : > { %1979 = vbcast.lane.b32.xlu1 %v7222_v29, 266  ;;  %1975 = vbcast.lane.b32.xlu0 %v7225_v30, 266 }
 0x289   : > { %1831 = vbcast.lane.b32.xlu1 %v7248_v33, 265  ;;  %1827 = vbcast.lane.b32.xlu0 %v7251_v34, 265 }
 0x28d   : > { %2023 = vbcast.lane.b32.xlu1 %v7206_v25, 267  ;;  %2019 = vbcast.lane.b32.xlu0 %v7195_v22, 267 }
 0x291   : > { %1839 = vbcast.lane.b32.xlu1 %v7272_v39, 265  ;;  %1835 = vbcast.lane.b32.xlu0 %v7275_v40, 265 }
 0x295   : > { %2031 = vbcast.lane.b32.xlu1 %v7214_v27, 267  ;;  %2027 = vbcast.lane.b32.xlu0 %v7217_v28, 267 }
 0x299   : > { %1883 = vbcast.lane.b32.xlu1 %v7262_v37, 265  ;;  %1879 = vbcast.lane.b32.xlu0 %v7265_v38, 265 }
 0x29d   : > { %2075 = vbcast.lane.b32.xlu1 %v7203_v24, 267  ;;  %2071 = vbcast.lane.b32.xlu0 %v7192_v21, 267 }
 0x2a1   : > { %1891 = vbcast.lane.b32.xlu1 %v7280_v41, 265  ;;  %1887 = vbcast.lane.b32.xlu0 %v7283_v42, 265 }
 0x2a5   : > { %2083 = vbcast.lane.b32.xlu1 %v7222_v29, 267  ;;  %2079 = vbcast.lane.b32.xlu0 %v7225_v30, 267 }
 0x2a9   : > { %1935 = vbcast.lane.b32.xlu1 %v7248_v33, 266  ;;  %1931 = vbcast.lane.b32.xlu0 %v7251_v34, 266 }
 0x2ad   : > { %2127 = vbcast.lane.b32.xlu1 %v7206_v25, 268  ;;  %2123 = vbcast.lane.b32.xlu0 %v7195_v22, 268 }
 0x2b1   : > { %1943 = vbcast.lane.b32.xlu1 %v7272_v39, 266  ;;  %1939 = vbcast.lane.b32.xlu0 %v7275_v40, 266 }
 0x2b5   : > { %2135 = vbcast.lane.b32.xlu1 %v7214_v27, 268  ;;  %2131 = vbcast.lane.b32.xlu0 %v7217_v28, 268 }
 0x2b9   : > { %1987 = vbcast.lane.b32.xlu1 %v7262_v37, 266  ;;  %1983 = vbcast.lane.b32.xlu0 %v7265_v38, 266 }
 0x2bb   : > { %v7343_v55 = vpop.permute.xlu1 %1731  ;;  %v7345_v56 = vpop.permute.xlu0 %1647 }
 0x2bd   : > { %2179 = vbcast.lane.b32.xlu1 %v7203_v24, 268  ;;  %2175 = vbcast.lane.b32.xlu0 %v7192_v21, 268 }
 0x2bf   : > { %v7350_v59 = vpop.permute.xlu1 %1739  ;;  %v7352_v60 = vpop.permute.xlu0 %1655 }
 0x2c1   : > { %1995 = vbcast.lane.b32.xlu1 %v7280_v41, 266  ;;  %1991 = vbcast.lane.b32.xlu0 %v7283_v42, 266 }
 0x2c3   : > { %v7357_v63 = vpop.permute.xlu1 %1671  ;;  %v7359_v0 = vpop.permute.xlu0 %1663 }
 0x2c5   : > { %2187 = vbcast.lane.b32.xlu1 %v7222_v29, 268  ;;  %2183 = vbcast.lane.b32.xlu0 %v7225_v30, 268 }
 0x2c7   : > { %v7363_v3 = vpop.permute.xlu1 %1755  ;;  %v7365_v4 = vpop.permute.xlu0 %1747 }
 0x2c9   : > { %2039 = vbcast.lane.b32.xlu1 %v7248_v33, 267  ;;  %2035 = vbcast.lane.b32.xlu0 %v7251_v34, 267 }
 0x2cb   : > { %v7369_v9 = vpop.permute.xlu1 %1815  ;;  %v7371_v10 = vpop.permute.xlu0 %1811 }
 0x2cd   : > { %2231 = vbcast.lane.b32.xlu1 %v7206_v25, 269  ;;  %2227 = vbcast.lane.b32.xlu0 %v7195_v22, 269 }
 0x2cf   : > { %v7375_v16 = vpop.permute.xlu1 %1823  ;;  %v7377_v17 = vpop.permute.xlu0 %1819 }
 0x2d1   : > { %2047 = vbcast.lane.b32.xlu1 %v7272_v39, 267  ;;  %2043 = vbcast.lane.b32.xlu0 %v7275_v40, 267 }
 0x2d3   : > { %v7381_v47 = vpop.permute.xlu1 %1867  ;;  %v7383_v48 = vpop.permute.xlu0 %1863 }
 0x2d5   : > { %2239 = vbcast.lane.b32.xlu1 %v7214_v27, 269  ;;  %2235 = vbcast.lane.b32.xlu0 %v7217_v28, 269 }
 0x2d7   : > { %v7387_v54 = vpop.permute.xlu1 %1875  ;;  %v7389_v57 = vpop.permute.xlu0 %1871 }
 0x2d9   : > { %2091 = vbcast.lane.b32.xlu1 %v7262_v37, 267  ;;  %2087 = vbcast.lane.b32.xlu0 %v7265_v38, 267 }
 0x2db   : > { %v7393_v5 = vpop.permute.xlu1 %1919  ;;  %v7395_v6 = vpop.permute.xlu0 %1915 }
 0x2dd   : > { %2283 = vbcast.lane.b32.xlu1 %v7203_v24, 269  ;;  %2279 = vbcast.lane.b32.xlu0 %v7192_v21, 269 }
 0x2df   : > { %v7399_v11 = vpop.permute.xlu1 %1927  ;;  %v7401_v12 = vpop.permute.xlu0 %1923 }
 0x2e1   : > { %2099 = vbcast.lane.b32.xlu1 %v7280_v41, 267  ;;  %2095 = vbcast.lane.b32.xlu0 %v7283_v42, 267 }
 0x2e3   : > { %v7405_v43 = vpop.permute.xlu1 %1687  ;;  %v7407_v44 = vpop.permute.xlu0 %1679 }
 0x2e5   : > { %2291 = vbcast.lane.b32.xlu1 %v7222_v29, 269  ;;  %2287 = vbcast.lane.b32.xlu0 %v7225_v30, 269 }
 0x2e7   : > { %v7411_v49 = vpop.permute.xlu1 %1771  ;;  %v7413_v50 = vpop.permute.xlu0 %1763 }
 0x2e9   : > { %2143 = vbcast.lane.b32.xlu1 %v7248_v33, 268  ;;  %2139 = vbcast.lane.b32.xlu0 %v7251_v34, 268 }
 0x2eb   : > { %v7417_v52 = vpop.permute.xlu1 %1971  ;;  %v7419_v53 = vpop.permute.xlu0 %1967 }
 0x2ed   : > { %2335 = vbcast.lane.b32.xlu1 %v7206_v25, 270  ;;  %2331 = vbcast.lane.b32.xlu0 %v7195_v22, 270 }
 0x2ef   : > { %v7423_v58 = vpop.permute.xlu1 %1703  ;;  %v7425_v61 = vpop.permute.xlu0 %1695 }
 0x2f1   : > { %2151 = vbcast.lane.b32.xlu1 %v7272_v39, 268  ;;  %2147 = vbcast.lane.b32.xlu0 %v7275_v40, 268 }
 0x2f3   : > { %v7429_v62 = vpop.permute.xlu1 %1787  ;;  %v7431_v1 = vpop.permute.xlu0 %1779 }
 0x2f5   : > { %2343 = vbcast.lane.b32.xlu1 %v7214_v27, 270  ;;  %2339 = vbcast.lane.b32.xlu0 %v7217_v28, 270 }
 0x2f7   : > { %v7435_v2 = vpop.permute.xlu1 %1979  ;;  %v7437_v7 = vpop.permute.xlu0 %1975 }
 0x2f9   : > { %2195 = vbcast.lane.b32.xlu1 %v7262_v37, 268  ;;  %2191 = vbcast.lane.b32.xlu0 %v7265_v38, 268 }
 0x2fb   : > { %v7441_v8 = vpop.permute.xlu1 %1831  ;;  %v7443_v13 = vpop.permute.xlu0 %1827 }
 0x2fd   : > { %2387 = vbcast.lane.b32.xlu1 %v7203_v24, 270  ;;  %2383 = vbcast.lane.b32.xlu0 %v7192_v21, 270 }
 0x2ff   : > { %v7447_v14 = vpop.permute.xlu1 %2023  ;;  %v7449_v45 = vpop.permute.xlu0 %2019 }
 0x300   : > { %8906 = vst [vmem:[#allocation55_spill] sm:$0xff] %v7449_v45 }
 0x301   : > { %2203 = vbcast.lane.b32.xlu1 %v7280_v41, 268  ;;  %2199 = vbcast.lane.b32.xlu0 %v7283_v42, 268 }
 0x303   : > { %v7453_v46 = vpop.permute.xlu1 %1839  ;;  %v7455_v51 = vpop.permute.xlu0 %1835 }
 0x304   : > { %8907 = vst [vmem:[#allocation56_spill] sm:$0xff] %v7453_v46  ;;  %8908 = vst [vmem:[#allocation57_spill] sm:$0xff] %v7455_v51 }
 0x305   : > { %2395 = vbcast.lane.b32.xlu1 %v7222_v29, 270  ;;  %2391 = vbcast.lane.b32.xlu0 %v7225_v30, 270 }
 0x307   : > { %v7459_v15 = vpop.permute.xlu1 %2031  ;;  %v7461_v18 = vpop.permute.xlu0 %2027 }
 0x308   : > { %8909 = vst [vmem:[#allocation58_spill] sm:$0xff] %v7459_v15  ;;  %8910 = vst [vmem:[#allocation59_spill] sm:$0xff] %v7461_v18 }
 0x309   : > { %2247 = vbcast.lane.b32.xlu1 %v7248_v33, 269  ;;  %2243 = vbcast.lane.b32.xlu0 %v7251_v34, 269 }
 0x30b   : > { %v7465_v35 = vpop.permute.xlu1 %1883  ;;  %v7467_v45 = vpop.permute.xlu0 %1879 }
 0x30c   : > { %8911 = vst [vmem:[#allocation60_spill] sm:$0xff] %v7465_v35  ;;  %8912 = vst [vmem:[#allocation61_spill] sm:$0xff] %v7467_v45 }
 0x30d   : > { %2439 = vbcast.lane.b32.xlu1 %v7206_v25, 271  ;;  %2435 = vbcast.lane.b32.xlu0 %v7195_v22, 271 }
 0x30f   : > { %v7471_v51 = vpop.permute.xlu1 %2075  ;;  %v7473_v46 = vpop.permute.xlu0 %2071 }
 0x310   : > { %8913 = vst [vmem:[#allocation62_spill] sm:$0xff] %v7471_v51  ;;  %8914 = vst [vmem:[#allocation63_spill] sm:$0xff] %v7473_v46 }
 0x311   : > { %2255 = vbcast.lane.b32.xlu1 %v7272_v39, 269  ;;  %2251 = vbcast.lane.b32.xlu0 %v7275_v40, 269 }
 0x313   : > { %v7477_v18 = vpop.permute.xlu1 %1891  ;;  %v7479_v15 = vpop.permute.xlu0 %1887 }
 0x314   : > { %8915 = vst [vmem:[#allocation64_spill] sm:$0xff] %v7477_v18  ;;  %8916 = vst [vmem:[#allocation65_spill] sm:$0xff] %v7479_v15 }
 0x315   : > { %2447 = vbcast.lane.b32.xlu1 %v7214_v27, 271  ;;  %2443 = vbcast.lane.b32.xlu0 %v7217_v28, 271 }
 0x317   : > { %v7483_v45 = vpop.permute.xlu1 %2083  ;;  %v7485_v35 = vpop.permute.xlu0 %2079 }
 0x318   : > { %8917 = vst [vmem:[#allocation66_spill] sm:$0xff] %v7483_v45  ;;  %8918 = vst [vmem:[#allocation67_spill] sm:$0xff] %v7485_v35 }
 0x319   : > { %2299 = vbcast.lane.b32.xlu1 %v7262_v37, 269  ;;  %2295 = vbcast.lane.b32.xlu0 %v7265_v38, 269 }
 0x31b   : > { %v7489_v46 = vpop.permute.xlu1 %1935  ;;  %v7491_v51 = vpop.permute.xlu0 %1931 }
 0x31c   : > { %8919 = vst [vmem:[#allocation68_spill] sm:$0xff] %v7489_v46  ;;  %8920 = vst [vmem:[#allocation69_spill] sm:$0xff] %v7491_v51 }
 0x31d   : > { %2491 = vbcast.lane.b32.xlu1 %v7203_v24, 271  ;;  %2487 = vbcast.lane.b32.xlu0 %v7192_v21, 271 }
 0x31f   : > { %v7495_v15 = vpop.permute.xlu1 %2127  ;;  %v7497_v18 = vpop.permute.xlu0 %2123 }
 0x320   : > { %8921 = vst [vmem:[#allocation70_spill] sm:$0xff] %v7495_v15  ;;  %8922 = vst [vmem:[#allocation71_spill] sm:$0xff] %v7497_v18 }
 0x321   : > { %2307 = vbcast.lane.b32.xlu1 %v7280_v41, 269  ;;  %2303 = vbcast.lane.b32.xlu0 %v7283_v42, 269 }
 0x323   : > { %v7501_v35 = vpop.permute.xlu1 %1943  ;;  %v7503_v45 = vpop.permute.xlu0 %1939 }
 0x324   : > { %8923 = vst [vmem:[#allocation72_spill] sm:$0xff] %v7501_v35  ;;  %8924 = vst [vmem:[#allocation73_spill] sm:$0xff] %v7503_v45 }
 0x325   : > { %2499 = vbcast.lane.b32.xlu1 %v7222_v29, 271  ;;  %2495 = vbcast.lane.b32.xlu0 %v7225_v30, 271 }
 0x327   : > { %v7507_v51 = vpop.permute.xlu1 %2135  ;;  %v7509_v46 = vpop.permute.xlu0 %2131 }
 0x328   : > { %8925 = vst [vmem:[#allocation74_spill] sm:$0xff] %v7507_v51  ;;  %8926 = vst [vmem:[#allocation75_spill] sm:$0xff] %v7509_v46 }
 0x329   : > { %2351 = vbcast.lane.b32.xlu1 %v7248_v33, 270  ;;  %2347 = vbcast.lane.b32.xlu0 %v7251_v34, 270 }
 0x32b   : > { %v7513_v18 = vpop.permute.xlu1 %1987  ;;  %v7515_v15 = vpop.permute.xlu0 %1983 }
 0x32c   : > { %8927 = vst [vmem:[#allocation76_spill] sm:$0xff] %v7513_v18  ;;  %8928 = vst [vmem:[#allocation77_spill] sm:$0xff] %v7515_v15 }
 0x32d   : > { %2543 = vbcast.lane.b32.xlu1 %v7206_v25, 272  ;;  %2539 = vbcast.lane.b32.xlu0 %v7195_v22, 272 }
 0x32f   : > { %v7519_v45 = vpop.permute.xlu1 %2179  ;;  %v7521_v35 = vpop.permute.xlu0 %2175 }
 0x330   : > { %8929 = vst [vmem:[#allocation78_spill] sm:$0xff] %v7519_v45  ;;  %8930 = vst [vmem:[#allocation79_spill] sm:$0xff] %v7521_v35 }
 0x331   : > { %2359 = vbcast.lane.b32.xlu1 %v7272_v39, 270  ;;  %2355 = vbcast.lane.b32.xlu0 %v7275_v40, 270 }
 0x333   : > { %v7525_v46 = vpop.permute.xlu1 %1995  ;;  %v7527_v51 = vpop.permute.xlu0 %1991 }
 0x334   : > { %8931 = vst [vmem:[#allocation80_spill] sm:$0xff] %v7525_v46  ;;  %8932 = vst [vmem:[#allocation81_spill] sm:$0xff] %v7527_v51 }
 0x335   : > { %2551 = vbcast.lane.b32.xlu1 %v7214_v27, 272  ;;  %2547 = vbcast.lane.b32.xlu0 %v7217_v28, 272 }
 0x337   : > { %v7531_v15 = vpop.permute.xlu1 %2187  ;;  %v7533_v18 = vpop.permute.xlu0 %2183 }
 0x338   : > { %8933 = vst [vmem:[#allocation82_spill] sm:$0xff] %v7531_v15  ;;  %8934 = vst [vmem:[#allocation83_spill] sm:$0xff] %v7533_v18 }
 0x339   : > { %2403 = vbcast.lane.b32.xlu1 %v7262_v37, 270  ;;  %2399 = vbcast.lane.b32.xlu0 %v7265_v38, 270 }
 0x33b   : > { %v7537_v35 = vpop.permute.xlu1 %2039  ;;  %v7539_v45 = vpop.permute.xlu0 %2035 }
 0x33c   : > { %8935 = vst [vmem:[#allocation84_spill] sm:$0xff] %v7537_v35  ;;  %8936 = vst [vmem:[#allocation85_spill] sm:$0xff] %v7539_v45 }
 0x33d   : > { %2595 = vbcast.lane.b32.xlu1 %v7203_v24, 272  ;;  %2591 = vbcast.lane.b32.xlu0 %v7192_v21, 272 }
 0x33f   : > { %v7543_v51 = vpop.permute.xlu1 %2231  ;;  %v7545_v46 = vpop.permute.xlu0 %2227 }
 0x340   : > { %8937 = vst [vmem:[#allocation86_spill] sm:$0xff] %v7543_v51  ;;  %8938 = vst [vmem:[#allocation87_spill] sm:$0xff] %v7545_v46 }
 0x341   : > { %2411 = vbcast.lane.b32.xlu1 %v7280_v41, 270  ;;  %2407 = vbcast.lane.b32.xlu0 %v7283_v42, 270 }
 0x343   : > { %v7549_v18 = vpop.permute.xlu1 %2047  ;;  %v7551_v15 = vpop.permute.xlu0 %2043 }
 0x344   : > { %8939 = vst [vmem:[#allocation88_spill] sm:$0xff] %v7549_v18  ;;  %8940 = vst [vmem:[#allocation89_spill] sm:$0xff] %v7551_v15 }
 0x345   : > { %2603 = vbcast.lane.b32.xlu1 %v7222_v29, 272  ;;  %2599 = vbcast.lane.b32.xlu0 %v7225_v30, 272 }
 0x347   : > { %v7555_v45 = vpop.permute.xlu1 %2239  ;;  %v7557_v35 = vpop.permute.xlu0 %2235 }
 0x348   : > { %8941 = vst [vmem:[#allocation90_spill] sm:$0xff] %v7555_v45  ;;  %8942 = vst [vmem:[#allocation91_spill] sm:$0xff] %v7557_v35 }
 0x349   : > { %2455 = vbcast.lane.b32.xlu1 %v7248_v33, 271  ;;  %2451 = vbcast.lane.b32.xlu0 %v7251_v34, 271 }
 0x34b   : > { %v7561_v46 = vpop.permute.xlu1 %2091  ;;  %v7563_v51 = vpop.permute.xlu0 %2087 }
 0x34c   : > { %8943 = vst [vmem:[#allocation92_spill] sm:$0xff] %v7561_v46  ;;  %8944 = vst [vmem:[#allocation93_spill] sm:$0xff] %v7563_v51 }
 0x34d   : > { %2647 = vbcast.lane.b32.xlu1 %v7206_v25, 273  ;;  %2643 = vbcast.lane.b32.xlu0 %v7195_v22, 273 }
 0x34f   : > { %v7567_v15 = vpop.permute.xlu1 %2283  ;;  %v7569_v18 = vpop.permute.xlu0 %2279 }
 0x350   : > { %8945 = vst [vmem:[#allocation94_spill] sm:$0xff] %v7567_v15  ;;  %8946 = vst [vmem:[#allocation95_spill] sm:$0xff] %v7569_v18 }
 0x351   : > { %2463 = vbcast.lane.b32.xlu1 %v7272_v39, 271  ;;  %2459 = vbcast.lane.b32.xlu0 %v7275_v40, 271 }
 0x353   : > { %v7573_v35 = vpop.permute.xlu1 %2099  ;;  %v7575_v45 = vpop.permute.xlu0 %2095 }
 0x354   : > { %8947 = vst [vmem:[#allocation96_spill] sm:$0xff] %v7573_v35  ;;  %8948 = vst [vmem:[#allocation97_spill] sm:$0xff] %v7575_v45 }
 0x355   : > { %2655 = vbcast.lane.b32.xlu1 %v7214_v27, 273  ;;  %2651 = vbcast.lane.b32.xlu0 %v7217_v28, 273 }
 0x357   : > { %v7579_v51 = vpop.permute.xlu1 %2291  ;;  %v7581_v46 = vpop.permute.xlu0 %2287 }
 0x358   : > { %8949 = vst [vmem:[#allocation98_spill] sm:$0xff] %v7579_v51  ;;  %8950 = vst [vmem:[#allocation99_spill] sm:$0xff] %v7581_v46 }
 0x359   : > { %2507 = vbcast.lane.b32.xlu1 %v7262_v37, 271  ;;  %2503 = vbcast.lane.b32.xlu0 %v7265_v38, 271 }
 0x35b   : > { %v7585_v18 = vpop.permute.xlu1 %2143  ;;  %v7587_v15 = vpop.permute.xlu0 %2139 }
 0x35c   : > { %8951 = vst [vmem:[#allocation100_spill] sm:$0xff] %v7585_v18  ;;  %8952 = vst [vmem:[#allocation101_spill] sm:$0xff] %v7587_v15 }
 0x35d   : > { %2699 = vbcast.lane.b32.xlu1 %v7203_v24, 273  ;;  %2695 = vbcast.lane.b32.xlu0 %v7192_v21, 273 }
 0x35f   : > { %v7591_v45 = vpop.permute.xlu1 %2335  ;;  %v7593_v35 = vpop.permute.xlu0 %2331 }
 0x360   : > { %8953 = vst [vmem:[#allocation102_spill] sm:$0xff] %v7591_v45  ;;  %8954 = vst [vmem:[#allocation103_spill] sm:$0xff] %v7593_v35 }
 0x361   : > { %2515 = vbcast.lane.b32.xlu1 %v7280_v41, 271  ;;  %2511 = vbcast.lane.b32.xlu0 %v7283_v42, 271 }
 0x363   : > { %v7597_v46 = vpop.permute.xlu1 %2151  ;;  %v7599_v51 = vpop.permute.xlu0 %2147 }
 0x364   : > { %8955 = vst [vmem:[#allocation104_spill] sm:$0xff] %v7597_v46  ;;  %8956 = vst [vmem:[#allocation105_spill] sm:$0xff] %v7599_v51 }
 0x365   : > { %2707 = vbcast.lane.b32.xlu1 %v7222_v29, 273  ;;  %2703 = vbcast.lane.b32.xlu0 %v7225_v30, 273 }
 0x367   : > { %v7603_v15 = vpop.permute.xlu1 %2343  ;;  %v7605_v18 = vpop.permute.xlu0 %2339 }
 0x368   : > { %8957 = vst [vmem:[#allocation106_spill] sm:$0xff] %v7603_v15  ;;  %8958 = vst [vmem:[#allocation107_spill] sm:$0xff] %v7605_v18 }
 0x369   : > { %2559 = vbcast.lane.b32.xlu1 %v7248_v33, 272  ;;  %2555 = vbcast.lane.b32.xlu0 %v7251_v34, 272 }
 0x36b   : > { %v7609_v35 = vpop.permute.xlu1 %2195  ;;  %v7611_v45 = vpop.permute.xlu0 %2191 }
 0x36c   : > { %8959 = vst [vmem:[#allocation108_spill] sm:$0xff] %v7609_v35  ;;  %8960 = vst [vmem:[#allocation109_spill] sm:$0xff] %v7611_v45 }
 0x36d   : > { %2751 = vbcast.lane.b32.xlu1 %v7206_v25, 274  ;;  %2747 = vbcast.lane.b32.xlu0 %v7195_v22, 274 }
 0x36f   : > { %v7615_v51 = vpop.permute.xlu1 %2387  ;;  %v7617_v46 = vpop.permute.xlu0 %2383 }
 0x370   : > { %8961 = vst [vmem:[#allocation110_spill] sm:$0xff] %v7615_v51  ;;  %8962 = vst [vmem:[#allocation111_spill] sm:$0xff] %v7617_v46 }
 0x371   : > { %2567 = vbcast.lane.b32.xlu1 %v7272_v39, 272  ;;  %2563 = vbcast.lane.b32.xlu0 %v7275_v40, 272 }
 0x373   : > { %v7621_v18 = vpop.permute.xlu1 %2203  ;;  %v7623_v15 = vpop.permute.xlu0 %2199 }
 0x374   : > { %8963 = vst [vmem:[#allocation112_spill] sm:$0xff] %v7621_v18  ;;  %8964 = vst [vmem:[#allocation113_spill] sm:$0xff] %v7623_v15 }
 0x375   : > { %2759 = vbcast.lane.b32.xlu1 %v7214_v27, 274  ;;  %2755 = vbcast.lane.b32.xlu0 %v7217_v28, 274 }
 0x377   : > { %v7627_v45 = vpop.permute.xlu1 %2395  ;;  %v7629_v35 = vpop.permute.xlu0 %2391 }
 0x378   : > { %8965 = vst [vmem:[#allocation114_spill] sm:$0xff] %v7627_v45  ;;  %8966 = vst [vmem:[#allocation115_spill] sm:$0xff] %v7629_v35 }
 0x379   : > { %2611 = vbcast.lane.b32.xlu1 %v7262_v37, 272  ;;  %2607 = vbcast.lane.b32.xlu0 %v7265_v38, 272 }
 0x37b   : > { %v7633_v46 = vpop.permute.xlu1 %2247  ;;  %v7635_v51 = vpop.permute.xlu0 %2243 }
 0x37c   : > { %8967 = vst [vmem:[#allocation116_spill] sm:$0xff] %v7633_v46  ;;  %8968 = vst [vmem:[#allocation117_spill] sm:$0xff] %v7635_v51 }
 0x37d   : > { %2803 = vbcast.lane.b32.xlu1 %v7203_v24, 274  ;;  %2799 = vbcast.lane.b32.xlu0 %v7192_v21, 274 }
 0x37f   : > { %v7639_v15 = vpop.permute.xlu1 %2439  ;;  %v7641_v18 = vpop.permute.xlu0 %2435 }
 0x380   : > { %8969 = vst [vmem:[#allocation118_spill] sm:$0xff] %v7639_v15  ;;  %8970 = vst [vmem:[#allocation119_spill] sm:$0xff] %v7641_v18 }
 0x381   : > { %2619 = vbcast.lane.b32.xlu1 %v7280_v41, 272  ;;  %2615 = vbcast.lane.b32.xlu0 %v7283_v42, 272 }
 0x383   : > { %v7645_v35 = vpop.permute.xlu1 %2255  ;;  %v7647_v45 = vpop.permute.xlu0 %2251 }
 0x384   : > { %8971 = vst [vmem:[#allocation120_spill] sm:$0xff] %v7645_v35  ;;  %8972 = vst [vmem:[#allocation121_spill] sm:$0xff] %v7647_v45 }
 0x385   : > { %2811 = vbcast.lane.b32.xlu1 %v7222_v29, 274  ;;  %2807 = vbcast.lane.b32.xlu0 %v7225_v30, 274 }
 0x387   : > { %v7651_v51 = vpop.permute.xlu1 %2447  ;;  %v7653_v46 = vpop.permute.xlu0 %2443 }
 0x388   : > { %8973 = vst [vmem:[#allocation122_spill] sm:$0xff] %v7651_v51  ;;  %8974 = vst [vmem:[#allocation123_spill] sm:$0xff] %v7653_v46 }
 0x389   : > { %2663 = vbcast.lane.b32.xlu1 %v7248_v33, 273  ;;  %2659 = vbcast.lane.b32.xlu0 %v7251_v34, 273 }
 0x38b   : > { %v7657_v18 = vpop.permute.xlu1 %2299  ;;  %v7659_v15 = vpop.permute.xlu0 %2295 }
 0x38c   : > { %8975 = vst [vmem:[#allocation124_spill] sm:$0xff] %v7657_v18  ;;  %8976 = vst [vmem:[#allocation125_spill] sm:$0xff] %v7659_v15 }
 0x38d   : > { %2855 = vbcast.lane.b32.xlu1 %v7206_v25, 275  ;;  %2851 = vbcast.lane.b32.xlu0 %v7195_v22, 275 }
 0x38f   : > { %v7663_v45 = vpop.permute.xlu1 %2491  ;;  %v7665_v35 = vpop.permute.xlu0 %2487 }
 0x390   : > { %8977 = vst [vmem:[#allocation126_spill] sm:$0xff] %v7663_v45  ;;  %8978 = vst [vmem:[#allocation127_spill] sm:$0xff] %v7665_v35 }
 0x391   : > { %2671 = vbcast.lane.b32.xlu1 %v7272_v39, 273  ;;  %2667 = vbcast.lane.b32.xlu0 %v7275_v40, 273 }
 0x393   : > { %v7669_v46 = vpop.permute.xlu1 %2307  ;;  %v7671_v51 = vpop.permute.xlu0 %2303 }
 0x394   : > { %8979 = vst [vmem:[#allocation128_spill] sm:$0xff] %v7669_v46  ;;  %8980 = vst [vmem:[#allocation129_spill] sm:$0xff] %v7671_v51 }
 0x395   : > { %2863 = vbcast.lane.b32.xlu1 %v7214_v27, 275  ;;  %2859 = vbcast.lane.b32.xlu0 %v7217_v28, 275 }
 0x397   : > { %v7675_v15 = vpop.permute.xlu1 %2499  ;;  %v7677_v18 = vpop.permute.xlu0 %2495 }
 0x398   : > { %8981 = vst [vmem:[#allocation130_spill] sm:$0xff] %v7675_v15  ;;  %8982 = vst [vmem:[#allocation131_spill] sm:$0xff] %v7677_v18  ;;  %v7693_v18 = vld [vmem:[#allocation25 + $0x8] sm:$0xff] }
 0x399   : > { %2715 = vbcast.lane.b32.xlu1 %v7262_v37, 273  ;;  %2711 = vbcast.lane.b32.xlu0 %v7265_v38, 273 }
 0x39b   : > { %v7681_v35 = vpop.permute.xlu1 %2351  ;;  %v7683_v45 = vpop.permute.xlu0 %2347 }
 0x39c   : > { %8983 = vst [vmem:[#allocation132_spill] sm:$0xff] %v7681_v35  ;;  %8984 = vst [vmem:[#allocation133_spill] sm:$0xff] %v7683_v45  ;;  %v7698_v35 = vld [vmem:[%s8987_s20 + $0x8] sm:$0xff]  ;;  %s9174_s20 = sld [smem:[#allocation169_spill]] }
 0x39d   : > { %2907 = vbcast.lane.b32.xlu1 %v7203_v24, 275  ;;  %2903 = vbcast.lane.b32.xlu0 %v7192_v21, 275  ;;  %v7744_v21 = vpop.f32.mrb[4].mxu0  ;;  %v7772_v24 = vrot.slane %v7693_v18, %v7243_v32 }
 0x39f   : > { %v7687_v51 = vpop.permute.xlu1 %2543  ;;  %v7689_v46 = vpop.permute.xlu0 %2539  ;;  %8998 = vst [vmem:[#allocation145_spill] sm:$0xff] %v7772_v24 }
 0x3a0   : > { %8985 = vst [vmem:[#allocation134_spill] sm:$0xff] %v7687_v51  ;;  %8986 = vst [vmem:[#allocation135_spill] sm:$0xff] %v7689_v46  ;;  %v7708_v46 = vrot.slane %v7693_v18, %v7186_v19  ;;  %v7712_v51 = vrot.slane %v7698_v35, %v7186_v19  ;;  %v7732_v19 = vrot.slane %v7693_v18, %v7209_v26 }
 0x3a1   : > { %2723 = vbcast.lane.b32.xlu1 %v7280_v41, 273  ;;  %2719 = vbcast.lane.b32.xlu0 %v7283_v42, 273 }
 0x3a3   : > { %v7700_v45 = vpop.permute.xlu1 %2359  ;;  %v7702_v15 = vpop.permute.xlu0 %2355 }
 0x3a4   : > { %8989 = vst [vmem:[#allocation136_spill] sm:$0xff] %v7700_v45  ;;  %8990 = vst [vmem:[#allocation137_spill] sm:$0xff] %v7702_v15  ;;  %v7720_v45 = vrot.slane %v7698_v35, %v7189_v20  ;;  %v7724_v15 = vrot.slane %v7693_v18, %v7189_v20  ;;  %v1794_v20 = vmul.f32 %v7708_v46, %v7350_v59 }
 0x3a5   : > { %2915 = vbcast.lane.b32.xlu1 %v7222_v29, 275  ;;  %2911 = vbcast.lane.b32.xlu0 %v7225_v30, 275  ;;  %v7728_v30 = vrot.slane %v7698_v35, %v7209_v26  ;;  %v1710_v29 = vmul.f32 %v7712_v51, %v7352_v60  ;;  %v1796_v26 = vmul.f32 %v7708_v46, %v7363_v3 }
 0x3a6   : > { %v1846_v60 = vmul.f32 %v7720_v45, %v7369_v9  ;;  %v1845_v3 = vmul.f32 %v7720_v45, %v7371_v10  ;;  %v1848_v9 = vmul.f32 %v7720_v45, %v7375_v16  ;;  %v1847_v24 = vmul.f32 %v7720_v45, %v7377_v17 }
 0x3a7   : > { %v7714_v42 = vpop.permute.xlu1 %2551  ;;  %v7716_v41 = vpop.permute.xlu0 %2547  ;;  %v1898_v16 = vmul.f32 %v7724_v15, %v7381_v47  ;;  %v1900_v17 = vmul.f32 %v7724_v15, %v7387_v54  ;;  %v1950_v47 = vmul.f32 %v7728_v30, %v7393_v5  ;;  %v1952_v54 = vmul.f32 %v7728_v30, %v7399_v11 }
 0x3a8   : > { %8991 = vst [vmem:[#allocation138_spill] sm:$0xff] %v7714_v42  ;;  %8992 = vst [vmem:[#allocation139_spill] sm:$0xff] %v7716_v41  ;;  %v1793_v41 = vmul.f32 %v7708_v46, %v7343_v55  ;;  %v1709_v42 = vmul.f32 %v7712_v51, %v7345_v56  ;;  %v7752_v55 = vrot.slane %v7698_v35, %v7198_v23 }
 0x3a9   : > { %2767 = vbcast.lane.b32.xlu1 %v7248_v33, 274  ;;  %2763 = vbcast.lane.b32.xlu0 %v7251_v34, 274  ;;  %v1795_v34 = vmul.f32 %v7708_v46, %v7365_v4  ;;  %v7756_v56 = vrot.slane %v7693_v18, %v7198_v23  ;;  %v7768_v4 = vrot.slane %v7698_v35, %v7243_v32  ;;  %v7774_v23 = vpop.f32.mrb[5].mxu0 }
 0x3aa   : > { %8993 = vst [vmem:[#allocation140_spill] sm:$0xff] %v7752_v55  ;;  %v1217_v10 = vpop.f32.mrb[6].mxu0  ;;  %v1802_v32 = vadd.f32 %v1794_v20, %v1710_v29  ;;  %v1081_v20 = vld [vmem:[%s7126_s17] sm:$0xff]  ;;  %v7816_v5 = vrot.slane %v7693_v18, %v7238_v31  ;;  %v1798_v11 = vmul.f32 %v7708_v46, %v7411_v49  ;;  %v1714_v49 = vmul.f32 %v7712_v51, %v7405_v43 }
 0x3ab   : > { %8994 = vst [vmem:[#allocation141_spill] sm:$0xff] %v7756_v56  ;;  %v7758_v59 = vpop.permute.xlu1 %2403  ;;  %v7760_v33 = vpop.permute.xlu0 %2399  ;;  %8997 = vst [vmem:[#allocation144_spill] sm:$0xff] %v7768_v4  ;;  %v1801_v4 = vadd.f32 %v1793_v41, %v1709_v42 }
 0x3ac   : > { %8995 = vst [vmem:[#allocation142_spill] sm:$0xff] %v7758_v59  ;;  %8996 = vst [vmem:[#allocation143_spill] sm:$0xff] %v7760_v33  ;;  %v1712_v59 = vmul.f32 %v7712_v51, %v7357_v63  ;;  %v1711_v33 = vmul.f32 %v7712_v51, %v7359_v0  ;;  %v7788_v63 = vrot.slane %v7698_v35, %v7238_v31  ;;  %v1218_v0 = vpop.f32.mrb[7].mxu0 }
 0x3ad   : > { %2959 = vbcast.lane.b32.xlu1 %v7206_v25, 276  ;;  %2955 = vbcast.lane.b32.xlu0 %v7195_v22, 276  ;;  %v1897_v22 = vmul.f32 %v7724_v15, %v7383_v48  ;;  %v1854_v29 = vadd.f32 %v1846_v60, %v1802_v32  ;;  %v1853_v42 = vadd.f32 %v1845_v3, %v1801_v4  ;;  %v1451_v32 = vpop.f32.mrb[0].mxu0 }
 0x3ae   : > { %v1804_v56 = vadd.f32 %v1796_v26, %v1712_v59  ;;  %v1803_v55 = vadd.f32 %v1795_v34, %v1711_v33  ;;  %v1899_v26 = vmul.f32 %v7724_v15, %v7389_v57  ;;  %v1082_v33 = vld [vmem:[%s7126_s17 + $0x8] sm:$0xff]  ;;  %v1949_v48 = vmul.f32 %v7728_v30, %v7395_v6 }
 0x3af   : > { %v7794_v10 = vpop.permute.xlu1 %2595  ;;  %v7796_v41 = vpop.permute.xlu0 %2591  ;;  %v1951_v57 = vmul.f32 %v7728_v30, %v7401_v12  ;;  %v5852_v60 = vadd.f32 %v1451_v32, %v1081_v20  ;;  %v1906_v3 = vadd.f32 %v1898_v16, %v1854_v29  ;;  %v1905_v4 = vadd.f32 %v1897_v22, %v1853_v42 }
 0x3b0   : > { %8999 = vst [vmem:[#allocation146_spill] sm:$0xff] %v7796_v41  ;;  %v1856_v34 = vadd.f32 %v1848_v9, %v1804_v56  ;;  %v1855_v59 = vadd.f32 %v1847_v24, %v1803_v55  ;;  %v1453_v56 = vpop.f32.mrb[1].mxu0  ;;  %v7826_v22 = vrot.slane %v7698_v35, %v7257_v36  ;;  %v1806_v43 = vadd.f32 %v1798_v11, %v1714_v49  ;;  %v9007_v11 = vld [vmem:[#allocation43_spill] sm:$0xff] }
 0x3b1   : > { %2775 = vbcast.lane.b32.xlu1 %v7272_v39, 274  ;;  %2771 = vbcast.lane.b32.xlu0 %v7275_v40, 274  ;;  %v5853_v0 = vadd.f32 %v1453_v56, %v1082_v33  ;;  %v5556_v41 = vmul.f32 -1.442695, %v5852_v60  ;;  %v1455_v12 = vpop.f32.mrb[2].mxu0  ;;  %v1958_v20 = vadd.f32 %v1950_v47, %v1906_v3  ;;  %v1957_v16 = vadd.f32 %v1949_v48, %v1905_v4 }
 0x3b2   : > { %v1908_v24 = vadd.f32 %v1900_v17, %v1856_v34  ;;  %v1907_v55 = vadd.f32 %v1899_v26, %v1855_v59  ;;  %v1456_v42 = vpop.f32.mrb[3].mxu0  ;;  %v1797_v33 = vmul.f32 %v7708_v46, %v7413_v50  ;;  %v2002_v34 = vmul.f32 %v7732_v19, %v7417_v52  ;;  %v1083_v59 = vld [vmem:[%s7126_s17 + $0x10] sm:$0xff]  ;;  %v1084_v52 = vld [vmem:[%s7126_s17 + $0x18] sm:$0xff]  ;;  %s9179_s17 = sld [smem:[#allocation172_spill]] }
 0x3b3   : > { %v7818_v6 = vpop.permute.xlu1 %2411  ;;  %v7820_v9 = vpop.permute.xlu0 %2407  ;;  %v5557_v29 = vmul.f32 -1.442695, %v5853_v0  ;;  %6237 = vpow2.f32 %v5556_v41  ;;  %v2001_v47 = vmul.f32 %v7732_v19, %v7419_v53  ;;  %v1800_v41 = vmul.f32 %v7708_v46, %v7429_v62  ;;  %v9008_v12 = vld [vmem:[#allocation40_spill] sm:$0xff] }
 0x3b4   : > { %9000 = vst [vmem:[#allocation147_spill] sm:$0xff] %v7818_v6  ;;  %9001 = vst [vmem:[#allocation148_spill] sm:$0xff] %v7820_v9  ;;  %v1960_v17 = vadd.f32 %v1952_v54, %v1908_v24  ;;  %v1959_v26 = vadd.f32 %v1951_v57, %v1907_v55  ;;  %v1713_v54 = vmul.f32 %v7712_v51, %v7407_v44  ;;  %v9010_v42 = vld [vmem:[#allocation56_spill] sm:$0xff] }
 0x3b5   : > { %2967 = vbcast.lane.b32.xlu1 %v7214_v27, 276  ;;  %2963 = vbcast.lane.b32.xlu0 %v7217_v28, 276  ;;  %6239 = vpow2.f32 %v5557_v29  ;;  %v1799_v50 = vmul.f32 %v7708_v46, %v7431_v1  ;;  %v2004_v53 = vmul.f32 %v7732_v19, %v7435_v2  ;;  %v2003_v57 = vmul.f32 %v7732_v19, %v7437_v7  ;;  %v9009_v29 = vld [vmem:[#allocation55_spill] sm:$0xff]  ;;  %v9057_v9 = vld [vmem:[#allocation80_spill] sm:$0xff] }
 0x3b6   : > { %v1850_v60 = vmul.f32 %v7720_v45, %v7441_v8  ;;  %v1716_v44 = vmul.f32 %v7712_v51, %v7423_v58  ;;  %v1715_v62 = vmul.f32 %v7712_v51, %v7425_v61  ;;  %v1849_v1 = vmul.f32 %v7720_v45, %v7443_v13  ;;  %v9006_v58 = vld [vmem:[#allocation140_spill] sm:$0xff] }
 0x3b7   : > { %v7838_v48 = vpop.permute.xlu1 %2603  ;;  %v7840_v32 = vpop.permute.xlu0 %2599  ;;  %v1222_v2 = vadd.f32 %v7744_v21, %v1083_v59  ;;  %v1805_v46 = vadd.f32 %v1797_v33, %v1713_v54  ;;  %v2010_v7 = vadd.f32 %v2002_v34, %v1958_v20  ;;  %v2009_v56 = vadd.f32 %v2001_v47, %v1957_v16  ;;  %v6109_v34 = vld [vmem:[#allocation16] sm:$0xff]  }
 0x3b8   : > { %9002 = vst [vmem:[#allocation149_spill] sm:$0xff] %v7838_v48  ;;  %9003 = vst [vmem:[#allocation150_spill] sm:$0xff] %v7840_v32  ;;  %v1223_v4 = vadd.f32 %v7774_v23, %v1084_v52  ;;  %v1808_v0 = vadd.f32 %v1800_v41, %v1716_v44  ;;  %v1807_v24 = vadd.f32 %v1799_v50, %v1715_v62  ;;  %v1492_v20 = vpop.f32.mrb[0].mxu1  ;;  %v9011_v47 = vld [vmem:[#allocation57_spill] sm:$0xff]  ;;  %v9017_v62 = vld [vmem:[#allocation51_spill] sm:$0xff] }
 0x3b9   : > { %2819 = vbcast.lane.b32.xlu1 %v7262_v37, 274  ;;  %2815 = vbcast.lane.b32.xlu0 %v7265_v38, 274  ;;  %v2054_v55 = vmul.f32 %v9006_v58, %v7447_v14  ;;  %v7874_v51 = vrot.slane %v7693_v18, %v7257_v36  ;;  %v2012_v61 = vadd.f32 %v2004_v53, %v1960_v17  ;;  %v1494_v33 = vpop.f32.mrb[1].mxu1  ;;  %v9015_v53 = vld [vmem:[#allocation59_spill] sm:$0xff] }
 0x3ba   : > { %v2011_v21 = vadd.f32 %v2003_v57, %v1959_v26  ;;  %v1858_v13 = vadd.f32 %v1850_v60, %v1806_v43  ;;  %v1857_v16 = vadd.f32 %v1849_v1, %v1805_v46  ;;  %v2053_v23 = vmul.f32 %v9006_v58, %v9009_v29  ;;  %v9012_v26 = vld [vmem:[#allocation58_spill] sm:$0xff]  ;;  %v9016_v60 = vld [vmem:[#allocation60_spill] sm:$0xff]  ;;  %v9019_v29 = vld [vmem:[#allocation53_spill] sm:$0xff] }
 0x3bb   : > { %v7865_v3 = vpop.permute.xlu1 %2455  ;;  %v7867_v8 = vpop.permute.xlu0 %2451  ;;  %v1852_v49 = vmul.f32 %v7720_v45, %v9010_v42  ;;  %v1501_v14 = vadd.f32 %v1492_v20, %v1222_v2  ;;  %v1851_v17 = vmul.f32 %v7720_v45, %v9011_v47  ;;  %v2056_v59 = vmul.f32 %v9006_v58, %v9012_v26  ;;  %v9018_v20 = vld [vmem:[#allocation61_spill] sm:$0xff] }
 0x3bc   : > { %9004 = vst [vmem:[#allocation151_spill] sm:$0xff] %v7865_v3  ;;  %9005 = vst [vmem:[#allocation152_spill] sm:$0xff] %v7867_v8  ;;  %v1502_v41 = vadd.f32 %v1494_v33, %v1223_v4  ;;  %v2062_v52 = vadd.f32 %v2054_v55, %v2010_v7  ;;  %v2055_v57 = vmul.f32 %v9006_v58, %v9015_v53  ;;  %v8815_v45 = vmov 0.0   ;;  %v1496_v2 = vpop.f32.mrb[2].mxu1  ;;  %v9020_v7 = vld [vmem:[#allocation54_spill] sm:$0xff]  ;;  %v9022_v53 = vld [vmem:[#allocation141_spill] sm:$0xff] }
 0x3bd   : > { %3011 = vbcast.lane.b32.xlu1 %v9007_v11, 276  ;;  %3007 = vbcast.lane.b32.xlu0 %v9008_v12, 276  ;;  %v6238_v50 = vpop.eup %6237  ;;  %v1902_v44 = vmul.f32 %v7724_v15, %v9016_v60  ;;  %v7896_v1 = vrot.slane %v7698_v35, %v9017_v62  ;;  %v1901_v4 = vmul.f32 %v7724_v15, %v9018_v20  ;;  %6241 = vtanh.f32 %v1501_v14  ;;  %v1497_v33 = vpop.f32.mrb[3].mxu1  ;;  %v9021_v35 = vld [vmem:[#allocation62_spill] sm:$0xff] }
 0x3be   : > { %5740 = vmatprep.subr.bf16.mxu0 %v8815_v45  ;;  %v1506_v55 = vadd.f32 1.0, %v6238_v50  ;;  %v5558_v42 = vmul.f32 -1.442695, %v1502_v41  ;;  %v2061_v47 = vadd.f32 %v2053_v23, %v2009_v56  ;;  %v1860_v26 = vadd.f32 %v1852_v49, %v1808_v0  ;;  %v6110_v2 = vld [vmem:[#allocation16 + $0x8] sm:$0xff]   ;;  %v9027_v23 = vld [vmem:[#allocation64_spill] sm:$0xff]  ;;  %v9028_v41 = vld [vmem:[#allocation65_spill] sm:$0xff] }
 0x3bf   : > { %v7886_v54 = vpop.permute.xlu1 %2647  ;;  %v7888_v43 = vpop.permute.xlu0 %2643  ;;  %v2106_v60 = vmul.f32 %v9022_v53, %v9021_v35  ;;  %5741 = vmatpush3.bf16.msra.mxu0 %v6109_v34  ;;  %v1859_v45 = vadd.f32 %v1851_v17, %v1807_v24  ;;  %v2064_v31 = vadd.f32 %v2056_v59, %v2012_v61  ;;  %v9026_v14 = vmov 0.0   ;;  %v9029_v17 = vld [vmem:[#allocation45_spill] sm:$0xff]  ;;  %v9030_v59 = vld [vmem:[#allocation46_spill] sm:$0xff]  ;;  %v9032_v50 = vld [vmem:[#allocation67_spill] sm:$0xff] }
 0x3c0   : > { %9013 = vst [vmem:[#allocation140_spill] sm:$0xff] %v7886_v54  ;;  %9014 = vst [vmem:[#allocation43_spill] sm:$0xff] %v7888_v43  ;;  %v6240_v46 = vpop.eup %6239  ;;  %v9023_v43 = vld [vmem:[#allocation63_spill] sm:$0xff]  ;;  %6243 = vrcp.f32 %v1506_v55  ;;  %5742 = vmatprep.subr.bf16.mxu0 %v9026_v14  ;;  %v2063_v56 = vadd.f32 %v2055_v57, %v2011_v21  ;;  %v1910_v0 = vadd.f32 %v1902_v44, %v1858_v13  ;;  %v9031_v21 = vld [vmem:[#allocation66_spill] sm:$0xff]  ;;  %5756 = vmatprep.mubr.msk.bf16.mxu0 %vm6661_vm3, %v9026_v14 }
 0x3c1   : > { %2827 = vbcast.lane.b32.xlu1 %v9019_v29, 274  ;;  %2823 = vbcast.lane.b32.xlu0 %v9020_v7, 274  ;;  %v1512_v36 = vadd.f32 1.0, %v6240_v46  ;;  %v2105_v20 = vmul.f32 %v9022_v53, %v9023_v43  ;;  %v1904_v49 = vmul.f32 %v7724_v15, %v9027_v23  ;;  %v1909_v34 = vadd.f32 %v1901_v4, %v1857_v16  ;;  %v9033_v16 = vld [vmem:[#allocation68_spill] sm:$0xff]  ;;  %v9035_v46 = vld [vmem:[#allocation70_spill] sm:$0xff] }
 0x3c2   : > { %v1903_v24 = vmul.f32 %v7724_v15, %v9028_v41  ;;  %v7918_v61 = vrot.slane %v7693_v18, %v9017_v62  ;;  %v2114_v43 = vadd.f32 %v2106_v60, %v2062_v52  ;;  %v2108_v13 = vmul.f32 %v9022_v53, %v9031_v21  ;;  %v6111_v15 = vld [vmem:[#allocation16 + $0x10] sm:$0xff]   ;;  %v9034_v18 = vld [vmem:[#allocation69_spill] sm:$0xff]  ;;  %v9036_v4 = vld [vmem:[#allocation144_spill] sm:$0xff] }
 0x3c3   : > { %v7907_v54 = vpop.permute.xlu1 %2463  ;;  %v7909_v8 = vpop.permute.xlu0 %2459  ;;  %6245 = vrcp.f32 %v1512_v36  ;;  %v2107_v36 = vmul.f32 %v9022_v53, %v9032_v50  ;;  %v1954_v57 = vmul.f32 %v7728_v30, %v9033_v16  ;;  %5743 = vmatpush3.bf16.msra.mxu0 %v6110_v2  ;;  %v2113_v44 = vadd.f32 %v2105_v20, %v2061_v47  ;;  %v9040_v23 = vld [vmem:[#allocation72_spill] sm:$0xff]  ;;  %v9041_v47 = vld [vmem:[#allocation73_spill] sm:$0xff]  ;;  %v9042_v41 = vld [vmem:[#allocation74_spill] sm:$0xff] }
 0x3c4   : > { %9024 = vst [vmem:[#allocation40_spill] sm:$0xff] %v7907_v54  ;;  %9025 = vst [vmem:[#allocation55_spill] sm:$0xff] %v7909_v8  ;;  %6247 = vpow2.f32 %v5558_v42  ;;  %v1953_v62 = vmul.f32 %v7728_v30, %v9034_v18  ;;  %v2158_v55 = vmul.f32 %v9036_v4, %v9035_v46  ;;  %v9037_v42 = vld [vmem:[#allocation71_spill] sm:$0xff]  ;;  %5744 = vmatprep.subr.bf16.mxu0 %v9026_v14  ;;  %v7948_v50 = vld [vmem:[%s8988_s8 + $0x10] sm:$0xff] }
 0x3c5   : > { %3019 = vbcast.lane.b32.xlu1 %v9029_v17, 276  ;;  %3015 = vbcast.lane.b32.xlu0 %v9030_v59, 276  ;;  %v2157_v52 = vmul.f32 %v9036_v4, %v9037_v42  ;;  %v1912_v60 = vadd.f32 %v1904_v49, %v1860_v26  ;;  %v1956_v2 = vmul.f32 %v7728_v30, %v9040_v23  ;;  %v9044_v18 = vld [vmem:[#allocation75_spill] sm:$0xff]  ;;  %v9045_v42 = vld [vmem:[#allocation76_spill] sm:$0xff]  ;;  %v9046_v49 = vld [vmem:[#allocation49_spill] sm:$0xff] }
 0x3c6   : > { %v1955_v20 = vmul.f32 %v7728_v30, %v9041_v47  ;;  %v2160_v21 = vmul.f32 %v9036_v4, %v9042_v41  ;;  %9043 = vst [vmem:[#allocation58_spill] sm:$0xff] %v7948_v50  ;;  %v1911_v16 = vadd.f32 %v1903_v24, %v1859_v45  ;;  %v2159_v46 = vmul.f32 %v9036_v4, %v9044_v18  ;;  %v9047_v23 = vld [vmem:[#allocation50_spill] sm:$0xff]  ;;  %v9048_v41 = vld [vmem:[#allocation77_spill] sm:$0xff]  ;;  %v6112_v8 = vld [vmem:[#allocation16 + $0x18] sm:$0xff]  }
 0x3c7   : > { %v7934_v33 = vpop.permute.xlu1 %2655  ;;  %v7936_v35 = vpop.permute.xlu0 %2651  ;;  %v2006_v26 = vmul.f32 %v7732_v19, %v9045_v42  ;;  %v2116_v30 = vadd.f32 %v2108_v13, %v2064_v31  ;;  %v2115_v47 = vadd.f32 %v2107_v36, %v2063_v56  ;;  %5745 = vmatpush3.bf16.msra.mxu0 %v6111_v15  ;;  %v1961_v45 = vadd.f32 %v1953_v62, %v1909_v34  ;;  %v9049_v18 = vld [vmem:[#allocation38_spill] sm:$0xff]  ;;  %v7962_v42 = vld [vmem:[#allocation25 + $0x10] sm:$0xff] }
 0x3c8   : > { %9038 = vst [vmem:[#allocation56_spill] sm:$0xff] %v7934_v33  ;;  %9039 = vst [vmem:[#allocation57_spill] sm:$0xff] %v7936_v35  ;;  %v1962_v35 = vadd.f32 %v1954_v57, %v1910_v0  ;;  %v2005_v33 = vmul.f32 %v7732_v19, %v9048_v41  ;;  %v6242_v54 = vpop.eup %6241  ;;  %v2166_v24 = vadd.f32 %v2158_v55, %v2114_v43  ;;  %5746 = vmatprep.subr.bf16.mxu0 %v9026_v14  ;;  %v9053_v36 = vld [vmem:[#allocation78_spill] sm:$0xff]  ;;  %v9054_v57 = vld [vmem:[#allocation145_spill] sm:$0xff] }
 0x3c9   : > { %2871 = vbcast.lane.b32.xlu1 %v9046_v49, 275  ;;  %2867 = vbcast.lane.b32.xlu0 %v9047_v23, 275  ;;  %v2165_v3 = vadd.f32 %v2157_v52, %v2113_v44  ;;  %v7960_v32 = vrot.slane %v7948_v50, %v9049_v18  ;;  %9050 = vst [vmem:[#allocation59_spill] sm:$0xff] %v7962_v42  ;;  %v1522_v43 = vld [vmem:[#allocation3] sm:$0xff]  ;;  %v9056_v41 = vld [vmem:[#allocation41_spill] sm:$0xff] }
 0x3ca   : > { %v1964_v56 = vadd.f32 %v1956_v2, %v1912_v60  ;;  %v1963_v0 = vadd.f32 %v1955_v20, %v1911_v16  ;;  %v2168_v13 = vadd.f32 %v2160_v21, %v2116_v30  ;;  %v2210_v34 = vmul.f32 %v9054_v57, %v9053_v36  ;;  %v6244_v15 = vpop.eup %6243  ;;  %v9055_v55 = vld [vmem:[#allocation79_spill] sm:$0xff]  ;;  %v6113_v21 = vld [vmem:[#allocation16 + $0x20] sm:$0xff]  }
 0x3cb   : > { %v7964_v48 = vpop.permute.xlu1 %2507  ;;  %v7966_v31 = vpop.permute.xlu0 %2503  ;;  %v2167_v44 = vadd.f32 %v2159_v46, %v2115_v47  ;;  %v2014_v62 = vadd.f32 %v2006_v26, %v1962_v35  ;;  %v2209_v52 = vmul.f32 %v9054_v57, %v9055_v55  ;;  %v2008_v60 = vmul.f32 %v7732_v19, %v9057_v9  ;;  %5747 = vmatpush3.bf16.msra.mxu0 %v6112_v8  ;;  %v9058_v16 = vld [vmem:[#allocation81_spill] sm:$0xff]  ;;  %v9059_v26 = vld [vmem:[#allocation82_spill] sm:$0xff]  ;;  %v9060_v47 = vld [vmem:[#allocation83_spill] sm:$0xff] }
 0x3cc   : > { %9051 = vst [vmem:[#allocation60_spill] sm:$0xff] %v7964_v48  ;;  %9052 = vst [vmem:[#allocation51_spill] sm:$0xff] %v7966_v31  ;;  %v2013_v48 = vadd.f32 %v2005_v33, %v1961_v45  ;;  %v7979_v2 = vrot.slane %v7962_v42, %v9049_v18  ;;  %v1524_v20 = vmul.f32 %v6244_v15, %v6242_v54  ;;  %5748 = vmatprep.subr.bf16.mxu0 %v9026_v14  ;;  %v9063_v8 = vld [vmem:[#allocation84_spill] sm:$0xff]  ;;  %v9064_v55 = vld [vmem:[#allocation85_spill] sm:$0xff] }
 0x3cd   : > { %3063 = vbcast.lane.b32.xlu1 %v7206_v25, 277  ;;  %3059 = vbcast.lane.b32.xlu0 %v9056_v41, 277  ;;  %v6246_v31 = vpop.eup %6245  ;;  %v2007_v46 = vmul.f32 %v7732_v19, %v9058_v16  ;;  %v2212_v30 = vmul.f32 %v9054_v57, %v9059_v26  ;;  %v2211_v33 = vmul.f32 %v9054_v57, %v9060_v47  ;;  %v9065_v26 = vld [vmem:[#allocation86_spill] sm:$0xff] }
 0x3ce   : > { %v6248_v35 = vpop.eup %6247  ;;  %v1523_v36 = vmul.f32 %v6246_v31, %v1522_v43  ;;  %v2218_v54 = vadd.f32 %v2210_v34, %v2166_v24  ;;  %v2058_v15 = vmul.f32 %v9006_v58, %v9063_v8  ;;  %v2057_v19 = vmul.f32 %v9006_v58, %v9064_v55  ;;  %v9066_v43 = vld [vmem:[#allocation87_spill] sm:$0xff]  ;;  %v9067_v34 = vld [vmem:[#allocation88_spill] sm:$0xff]  ;;  %v6114_v55 = vld [vmem:[#allocation16 + $0x28] sm:$0xff]  }
 0x3cf   : > { %v7987_v45 = vpop.permute.xlu1 %2699  ;;  %v7989_v9 = vpop.permute.xlu0 %2695  ;;  %v1519_v16 = vadd.f32 1.0, %v6248_v35  ;;  %v2217_v18 = vadd.f32 %v2209_v52, %v2165_v3  ;;  %v2262_v6 = vmul.f32 %v7788_v63, %v9065_v26  ;;  %v2016_v31 = vadd.f32 %v2008_v60, %v1964_v56  ;;  %5749 = vmatpush3.bf16.msra.mxu0 %v6113_v21 }
 0x3d0   : > { %9061 = vst [vmem:[#allocation61_spill] sm:$0xff] %v7987_v45  ;;  %9062 = vst [vmem:[#allocation53_spill] sm:$0xff] %v7989_v9  ;;  %v1525_v47 = vadd.f32 %v1524_v20, %v1523_v36  ;;  %v2261_v24 = vmul.f32 %v7788_v63, %v9066_v43  ;;  %v2060_v8 = vmul.f32 %v9006_v58, %v9067_v34  ;;  %5750 = vmatprep.subr.bf16.mxu0 %v9026_v14  ;;  %v9070_v20 = vld [vmem:[#allocation89_spill] sm:$0xff]  ;;  %v9071_v43 = vld [vmem:[#allocation90_spill] sm:$0xff] }
 0x3d1   : > { %2879 = vbcast.lane.b32.xlu1 %v7272_v39, 275  ;;  %2875 = vbcast.lane.b32.xlu0 %v7275_v40, 275  ;;  %6249 = vrcp.f32 %v1519_v16  ;;  %v2015_v35 = vadd.f32 %v2007_v46, %v1963_v0  ;;  %v2220_v3 = vadd.f32 %v2212_v30, %v2168_v13  ;;  %v2219_v52 = vadd.f32 %v2211_v33, %v2167_v44  ;;  %v9072_v0 = vld [vmem:[#allocation91_spill] sm:$0xff]  ;;  %v9074_v30 = vld [vmem:[#allocation92_spill] sm:$0xff]  ;;  %v9075_v33 = vld [vmem:[#allocation93_spill] sm:$0xff] }
 0x3d2   : > { %6251 = vtanh.f32 %v1525_v47  ;;  %1528 = vst [vmem:[#allocation3] sm:$0xff] %v1525_v47  ;;  %v2066_v56 = vadd.f32 %v2058_v15, %v2014_v62  ;;  %v2065_v60 = vadd.f32 %v2057_v19, %v2013_v48  ;;  %v2059_v36 = vmul.f32 %v9006_v58, %v9070_v20  ;;  %v9073_v44 = vld [vmem:[#allocation39_spill] sm:$0xff]  ;;  %v9078_v20 = vld [vmem:[#allocation96_spill] sm:$0xff]  ;;  %v9085_v45 = vld [vmem:[#allocation101_spill] sm:$0xff] }
 0x3d3   : > { %v8004_v9 = vpop.permute.xlu1 %2515  ;;  %v8006_v26 = vpop.permute.xlu0 %2511  ;;  %v2264_v21 = vmul.f32 %v7788_v63, %v9071_v43  ;;  %v2270_v16 = vadd.f32 %v2262_v6, %v2218_v54  ;;  %v2263_v13 = vmul.f32 %v7788_v63, %v9072_v0  ;;  %v8017_v46 = vrot.slane %v7948_v50, %v9073_v44  ;;  %5751 = vmatpush3.bf16.msra.mxu0 %v6114_v55  ;;  %v6115_v6 = vld [vmem:[#allocation16 + $0x30] sm:$0xff]   ;;  %v9076_v54 = vld [vmem:[#allocation94_spill] sm:$0xff]  ;;  %v9079_v0 = vld [vmem:[#allocation97_spill] sm:$0xff] }
 0x3d4   : > { %9068 = vst [vmem:[#allocation62_spill] sm:$0xff] %v8004_v9  ;;  %9069 = vst [vmem:[#allocation141_spill] sm:$0xff] %v8006_v26  ;;  %v2269_v62 = vadd.f32 %v2261_v24, %v2217_v18  ;;  %v2068_v48 = vadd.f32 %v2060_v8, %v2016_v31  ;;  %v2110_v58 = vmul.f32 %v9022_v53, %v9074_v30  ;;  %v9077_v47 = vld [vmem:[#allocation95_spill] sm:$0xff]  ;;  %5752 = vmatprep.subr.bf16.mxu0 %v9026_v14  ;;  %v9082_v30 = vld [vmem:[#allocation98_spill] sm:$0xff] }
 0x3d5   : > { %3071 = vbcast.lane.b32.xlu1 %v7214_v27, 277  ;;  %3067 = vbcast.lane.b32.xlu0 %v7217_v28, 277  ;;  %v2109_v15 = vmul.f32 %v9022_v53, %v9075_v33  ;;  %v2314_v19 = vmul.f32 %v7816_v5, %v9076_v54  ;;  %v2313_v34 = vmul.f32 %v7816_v5, %v9077_v47  ;;  %v9083_v54 = vld [vmem:[#allocation99_spill] sm:$0xff]  ;;  %v9084_v9 = vld [vmem:[#allocation100_spill] sm:$0xff] }
 0x3d6   : > { %v2112_v43 = vmul.f32 %v9022_v53, %v9078_v20  ;;  %v2111_v18 = vmul.f32 %v9022_v53, %v9079_v0  ;;  %v2067_v8 = vadd.f32 %v2059_v36, %v2015_v35  ;;  %v2272_v55 = vadd.f32 %v2264_v21, %v2220_v3  ;;  %v9086_v3 = vld [vmem:[#allocation102_spill] sm:$0xff] }
 0x3d7   : > { %v8033_v31 = vpop.permute.xlu1 %2707  ;;  %v8035_v24 = vpop.permute.xlu0 %2703  ;;  %v2316_v33 = vmul.f32 %v7816_v5, %v9082_v30  ;;  %v2315_v47 = vmul.f32 %v7816_v5, %v9083_v54  ;;  %v2271_v26 = vadd.f32 %v2263_v13, %v2219_v52  ;;  %v2162_v20 = vmul.f32 %v9036_v4, %v9084_v9  ;;  %5753 = vmatpush3.bf16.msra.mxu0 %v6115_v6  ;;  %v6116_v52 = vld [vmem:[#allocation16 + $0x38] sm:$0xff]  }
 0x3d8   : > { %9080 = vst [vmem:[#allocation63_spill] sm:$0xff] %v8033_v31  ;;  %9081 = vst [vmem:[#allocation64_spill] sm:$0xff] %v8035_v24  ;;  %v2161_v53 = vmul.f32 %v9036_v4, %v9085_v45  ;;  %v2118_v0 = vadd.f32 %v2110_v58, %v2066_v56  ;;  %v2117_v35 = vadd.f32 %v2109_v15, %v2065_v60  ;;  %5754 = vmatprep.subr.bf16.mxu0 %v9026_v14  ;;  %v9089_v15 = vld [vmem:[#allocation103_spill] sm:$0xff] }
 0x3d9   : > { %2923 = vbcast.lane.b32.xlu1 %v7262_v37, 275  ;;  %2919 = vbcast.lane.b32.xlu0 %v7265_v38, 275  ;;  %v2366_v36 = vmul.f32 %v7826_v22, %v9086_v3  ;;  %v8052_v21 = vrot.slane %v7962_v42, %v9073_v44  ;;  %v2322_v13 = vadd.f32 %v2314_v19, %v2270_v16  ;;  %v9090_v44 = vld [vmem:[#allocation104_spill] sm:$0xff] }
 0x3da   : > { %v2321_v9 = vadd.f32 %v2313_v34, %v2269_v62  ;;  %v2120_v30 = vadd.f32 %v2112_v43, %v2068_v48  ;;  %v2119_v54 = vadd.f32 %v2111_v18, %v2067_v8  ;;  %v2324_v60 = vadd.f32 %v2316_v33, %v2272_v55  ;;  %v9091_v48 = vld [vmem:[#allocation44_spill] sm:$0xff]  ;;  %v9092_v43 = vld [vmem:[#allocation105_spill] sm:$0xff]  ;;  %v9093_v18 = vld [vmem:[#allocation106_spill] sm:$0xff] }
 0x3db   : > { %v8054_v45 = vpop.permute.xlu1 %2559  ;;  %v8056_v24 = vpop.permute.xlu0 %2555  ;;  %v2323_v58 = vadd.f32 %v2315_v47, %v2271_v26  ;;  %v2365_v3 = vmul.f32 %v7826_v22, %v9089_v15  ;;  %v2164_v6 = vmul.f32 %v9036_v4, %v9090_v44  ;;  %v2170_v16 = vadd.f32 %v2162_v20, %v2118_v0  ;;  %5755 = vmatpush3.bf16.msra.mxu0 %v6116_v52  ;;  %v9094_v44 = vld [vmem:[#allocation107_spill] sm:$0xff]  ;;  %v9095_v33 = vld [vmem:[#allocation108_spill] sm:$0xff]  ;;  %v9096_v20 = vld [vmem:[#allocation109_spill] sm:$0xff] }
 0x3dc   : > { %9087 = vst [vmem:[#allocation65_spill] sm:$0xff] %v8054_v45  ;;  %9088 = vst [vmem:[#allocation45_spill] sm:$0xff] %v8056_v24  ;;  %v6250_v56 = vpop.eup %6249  ;;  %v2169_v62 = vadd.f32 %v2161_v53, %v2117_v35  ;;  %v8067_v19 = vrot.slane %v7948_v50, %v9091_v48  ;;  %v2374_v34 = vadd.f32 %v2366_v36, %v2322_v13  ;;  %5784 = vmatprep.subr.bf16.mxu0 %v9026_v14  ;;  %v9098_v13 = vld [vmem:[#allocation110_spill] sm:$0xff]  ;;  %v9101_v24 = vld [vmem:[#allocation113_spill] sm:$0xff] }
 0x3dd   : > { %v6252_v31 = vpop.eup %6251  ;;  %3115 = vbcast.lane.b32.xlu1 %v9007_v11, 277  ;;  %3111 = vbcast.lane.b32.xlu0 %v9008_v12, 277  ;;  %v2163_v26 = vmul.f32 %v9036_v4, %v9092_v43  ;;  %v2368_v8 = vmul.f32 %v7826_v22, %v9093_v18  ;;  %v2367_v55 = vmul.f32 %v7826_v22, %v9094_v44  ;;  %v9099_v43 = vld [vmem:[#allocation111_spill] sm:$0xff]  ;;  %v9100_v44 = vld [vmem:[#allocation112_spill] sm:$0xff] }
 0x3de   : > { %v2214_v47 = vmul.f32 %v9054_v57, %v9095_v33  ;;  %v2213_v53 = vmul.f32 %v9054_v57, %v9096_v20  ;;  %v1527_v35 = vmul.f32 %v6252_v31, %v6250_v56  ;;  %v2373_v36 = vadd.f32 %v2365_v3, %v2321_v9  ;;  %v9103_v56 = vld [vmem:[#allocation114_spill] sm:$0xff]  ;;  %v9105_v45 = vld [vmem:[#allocation116_spill] sm:$0xff] }
 0x3df   : > { %v8081_v0 = vpop.permute.xlu1 %2751  ;;  %v8083_v4 = vpop.permute.xlu0 %2747  ;;  %v2172_v52 = vadd.f32 %v2164_v6, %v2120_v30  ;;  %v2418_v15 = vmul.f32 %v7874_v51, %v9098_v13  ;;  %v2417_v18 = vmul.f32 %v7874_v51, %v9099_v43  ;;  %v2216_v33 = vmul.f32 %v9054_v57, %v9100_v44  ;;  %v9104_v6 = vld [vmem:[#allocation115_spill] sm:$0xff] }
 0x3e0   : > { %9097 = vst [vmem:[#allocation46_spill] sm:$0xff] %v8083_v4  ;;  %v2215_v20 = vmul.f32 %v9054_v57, %v9101_v24  ;;  %1529 = vst [vmem:[#allocation2] sm:$0xff] %v1527_v35  ;;  %v8096_v31 = vpack.c.bf16 %v1527_v35, %v1527_v35  ;;  %v2171_v9 = vadd.f32 %v2163_v26, %v2119_v54  ;;  %v9106_v26 = vld [vmem:[#allocation117_spill] sm:$0xff] }
 0x3e1   : > { %2931 = vbcast.lane.b32.xlu1 %v9019_v29, 275  ;;  %2927 = vbcast.lane.b32.xlu0 %v9020_v7, 275  ;;  %v2376_v30 = vadd.f32 %v2368_v8, %v2324_v60  ;;  %v2420_v3 = vmul.f32 %v7874_v51, %v9103_v56  ;;  %v2419_v13 = vmul.f32 %v7874_v51, %v9104_v6  ;;  %v9110_v56 = vld [vmem:[#allocation121_spill] sm:$0xff] }
 0x3e2   : > { %9102 = vst [vmem:[#allocation66_spill] sm:$0xff] %v8096_v31  ;;  %v2375_v43 = vadd.f32 %v2367_v55, %v2323_v58  ;;  %v2222_v44 = vadd.f32 %v2214_v47, %v2170_v16  ;;  %v2221_v4 = vadd.f32 %v2213_v53, %v2169_v62  ;;  %v2266_v57 = vmul.f32 %v7788_v63, %v9105_v45  ;;  %v9107_v16 = vld [vmem:[#allocation118_spill] sm:$0xff]  ;;  %v9108_v47 = vld [vmem:[#allocation119_spill] sm:$0xff] }
 0x3e3   : > { %v8104_v24 = vpop.permute.xlu1 %2567  ;;  %v8106_v7 = vpop.permute.xlu0 %2563  ;;  %5757 = vmatmul.mubr.bf16.vlgmr.msra.gmra.mrb[8].mxu0 %v8096_v31  ;;  %v2426_v54 = vadd.f32 %v2418_v15, %v2374_v34  ;;  %v2425_v60 = vadd.f32 %v2417_v18, %v2373_v36  ;;  %v2265_v8 = vmul.f32 %v7788_v63, %v9106_v26  ;;  %v8113_v35 = vrot.slane %v7962_v42, %v9091_v48  ;;  %v9109_v36 = vld [vmem:[#allocation120_spill] sm:$0xff]  ;;  %v9119_v48 = vld [vmem:[#allocation129_spill] sm:$0xff]  ;;  %v9120_v42 = vld [vmem:[#allocation130_spill] sm:$0xff] }
 0x3e4   : > { %5786 = vmatprep.mubr.msk.bf16.mxu0 %vm6661_vm3, %v9026_v14  ;;  %v2224_v58 = vadd.f32 %v2216_v33, %v2172_v52  ;;  %v2223_v45 = vadd.f32 %v2215_v20, %v2171_v9  ;;  %v2470_v62 = vmul.f32 %v7896_v1, %v9107_v16  ;;  %v2428_v34 = vadd.f32 %v2420_v3, %v2376_v30  ;;  %v9111_v33 = vld [vmem:[#allocation122_spill] sm:$0xff]  ;;  %v9112_v9 = vld [vmem:[#allocation123_spill] sm:$0xff]  ;;  %v9114_v16 = vld [vmem:[#allocation125_spill] sm:$0xff] }
 0x3e5   : > { %3123 = vbcast.lane.b32.xlu1 %v9029_v17, 277  ;;  %3119 = vbcast.lane.b32.xlu0 %v9030_v59, 277  ;;  %v2427_v55 = vadd.f32 %v2419_v13, %v2375_v43  ;;  %v2469_v53 = vmul.f32 %v7896_v1, %v9108_v47  ;;  %v2268_v15 = vmul.f32 %v7788_v63, %v9109_v36  ;;  %v9113_v13 = vld [vmem:[#allocation124_spill] sm:$0xff]  ;;  %v9116_v36 = vld [vmem:[#allocation126_spill] sm:$0xff] }
 0x3e6   : > { %v2274_v18 = vadd.f32 %v2266_v57, %v2222_v44  ;;  %v2267_v52 = vmul.f32 %v7788_v63, %v9110_v56  ;;  %v2472_v20 = vmul.f32 %v7896_v1, %v9111_v33  ;;  %v2471_v6 = vmul.f32 %v7896_v1, %v9112_v9  ;;  %v9115_v57 = vld [vmem:[#allocation42_spill] sm:$0xff]  ;;  %v9117_v33 = vld [vmem:[#allocation127_spill] sm:$0xff] }
 0x3e7   : > { %v8131_v26 = vpop.permute.xlu1 %2759  ;;  %v8133_v30 = vpop.permute.xlu0 %2755  ;;  %v2273_v3 = vadd.f32 %v2265_v8, %v2221_v4  ;;  %v2318_v43 = vmul.f32 %v7816_v5, %v9113_v13  ;;  %v2317_v44 = vmul.f32 %v7816_v5, %v9114_v16  ;;  %v8141_v63 = vrot.slane %v7948_v50, %v9115_v57  ;;  %v9118_v13 = vld [vmem:[#allocation128_spill] sm:$0xff] }
 0x3e8   : > { %v2478_v47 = vadd.f32 %v2470_v62, %v2426_v54  ;;  %v2522_v56 = vmul.f32 %v7918_v61, %v9116_v36  ;;  %v2521_v9 = vmul.f32 %v7918_v61, %v9117_v33  ;;  %v2477_v4 = vadd.f32 %v2469_v53, %v2425_v60  ;;  %v9121_v60 = vld [vmem:[#allocation131_spill] sm:$0xff]  ;;  %v9122_v53 = vld [vmem:[#allocation132_spill] sm:$0xff] }
 0x3e9   : > { %2975 = vbcast.lane.b32.xlu1 %v9046_v49, 276  ;;  %2971 = vbcast.lane.b32.xlu0 %v9047_v23, 276  ;;  %v2276_v8 = vadd.f32 %v2268_v15, %v2224_v58  ;;  %v2320_v16 = vmul.f32 %v7816_v5, %v9118_v13  ;;  %v2319_v31 = vmul.f32 %v7816_v5, %v9119_v48  ;;  %v9123_v48 = vld [vmem:[#allocation133_spill] sm:$0xff] }
 0x3ea   : > { %v2275_v50 = vadd.f32 %v2267_v52, %v2223_v45  ;;  %v2480_v54 = vadd.f32 %v2472_v20, %v2428_v34  ;;  %v2479_v62 = vadd.f32 %v2471_v6, %v2427_v55  ;;  %v2524_v36 = vmul.f32 %v7918_v61, %v9120_v42  ;;  %v9124_v55 = vld [vmem:[#allocation134_spill] sm:$0xff]  ;;  %v9125_v52 = vld [vmem:[#allocation135_spill] sm:$0xff] }
 0x3eb   : > { %v8155_v57 = vpop.permute.xlu1 %2611  ;;  %v8157_v33 = vpop.permute.xlu0 %2607  ;;  %v2326_v49 = vadd.f32 %v2318_v43, %v2274_v18  ;;  %v2325_v23 = vadd.f32 %v2317_v44, %v2273_v3  ;;  %v2523_v58 = vmul.f32 %v7918_v61, %v9121_v60  ;;  %v2370_v15 = vmul.f32 %v7826_v22, %v9122_v53  ;;  %v9126_v3 = vld [vmem:[#allocation136_spill] sm:$0xff]  ;;  %v9127_v44 = vld [vmem:[#allocation137_spill] sm:$0xff]  ;;  %v9131_v60 = vld [vmem:[#allocation143_spill] sm:$0xff] }
 0x3ec   : > { %v2530_v13 = vadd.f32 %v2522_v56, %v2478_v47  ;;  %v2529_v5 = vadd.f32 %v2521_v9, %v2477_v4  ;;  %v2369_v45 = vmul.f32 %v7826_v22, %v9123_v48  ;;  %v2328_v42 = vadd.f32 %v2320_v16, %v2276_v8  ;;  %v9128_v56 = vld [vmem:[#allocation138_spill] sm:$0xff]  ;;  %v9129_v4 = vld [vmem:[#allocation139_spill] sm:$0xff] }
 0x3ed   : > { %3167 = vbcast.lane.b32.xlu1 %v7206_v25, 278  ;;  %3163 = vbcast.lane.b32.xlu0 %v9056_v41, 278  ;;  %v2327_v34 = vadd.f32 %v2319_v31, %v2275_v50  ;;  %v2574_v18 = vmul.f32 %v7960_v32, %v9124_v55  ;;  %v2573_v20 = vmul.f32 %v7960_v32, %v9125_v52  ;;  %v9130_v16 = vld [vmem:[#allocation142_spill] sm:$0xff] }
 0x3ee   : > { %v2532_v6 = vadd.f32 %v2524_v36, %v2480_v54  ;;  %v2372_v43 = vmul.f32 %v7826_v22, %v9126_v3  ;;  %v2371_v47 = vmul.f32 %v7826_v22, %v9127_v44  ;;  %v2576_v25 = vmul.f32 %v7960_v32, %v9128_v56  ;;  %v9134_v3 = vld [vmem:[#allocation148_spill] sm:$0xff] }
 0x3ef   : > { %v8177_v9 = vpop.permute.xlu1 %2803  ;;  %v8179_v41 = vpop.permute.xlu0 %2799  ;;  %v2531_v50 = vadd.f32 %v2523_v58, %v2479_v62  ;;  %v2378_v31 = vadd.f32 %v2370_v15, %v2326_v49  ;;  %v2575_v8 = vmul.f32 %v7960_v32, %v9129_v4  ;;  %v2422_v54 = vmul.f32 %v7874_v51, %v9130_v16  ;;  %v9132_v49 = vld [vmem:[#allocation146_spill] sm:$0xff]  ;;  %v9133_v15 = vld [vmem:[#allocation147_spill] sm:$0xff] }
 0x3f0   : > { %v2377_v36 = vadd.f32 %v2369_v45, %v2325_v23  ;;  %v2421_v53 = vmul.f32 %v7874_v51, %v9131_v60  ;;  %v2626_v22 = vmul.f32 %v7979_v2, %v7794_v10  ;;  %v2582_v48 = vadd.f32 %v2574_v18, %v2530_v13  ;;  %v9135_v13 = vld [vmem:[#allocation149_spill] sm:$0xff]  ;;  %v9136_v18 = vld [vmem:[#allocation150_spill] sm:$0xff]  ;;  %v6117_v60 = vld [vmem:[#allocation19] sm:$0xff]  }
 0x3f1   : > { %2983 = vbcast.lane.b32.xlu1 %v7272_v39, 276  ;;  %2979 = vbcast.lane.b32.xlu0 %v7275_v40, 276  ;;  %v2581_v62 = vadd.f32 %v2573_v20, %v2529_v5  ;;  %v2625_v58 = vmul.f32 %v7979_v2, %v9132_v49  ;;  %v2424_v55 = vmul.f32 %v7874_v51, %v9133_v15 }
 0x3f2   : > { %v2380_v52 = vadd.f32 %v2372_v43, %v2328_v42  ;;  %v2379_v23 = vadd.f32 %v2371_v47, %v2327_v34  ;;  %v2584_v45 = vadd.f32 %v2576_v25, %v2532_v6  ;;  %v2423_v44 = vmul.f32 %v7874_v51, %v9134_v3  ;;  %v9137_v34 = vld [vmem:[#allocation151_spill] sm:$0xff]  ;;  %v9138_v47 = vld [vmem:[#allocation152_spill] sm:$0xff]  ;;  %5760 = vmatprep.subr.bf16.mxu1 %v6117_v60  ;;  %v9144_v3 = vld [vmem:[#allocation61_spill] sm:$0xff] }
 0x3f3   : > { %v8197_v56 = vpop.permute.xlu1 %2619  ;;  %v8199_v10 = vpop.permute.xlu0 %2615  ;;  %v2583_v4 = vadd.f32 %v2575_v8, %v2531_v50  ;;  %v2430_v16 = vadd.f32 %v2422_v54, %v2378_v31  ;;  %v2628_v5 = vmul.f32 %v7979_v2, %v9135_v13  ;;  %v2627_v20 = vmul.f32 %v7979_v2, %v9136_v18  ;;  %v9139_v50 = vld [vmem:[#allocation140_spill] sm:$0xff]  ;;  %v9140_v54 = vld [vmem:[#allocation43_spill] sm:$0xff]  ;;  %5761 = vmatpush3.bf16.msra.mxu1 %v6117_v60  ;;  %v9145_v18 = vld [vmem:[#allocation57_spill] sm:$0xff] }
 0x3f4   : > { %v2429_v49 = vadd.f32 %v2421_v53, %v2377_v36  ;;  %v2634_v42 = vadd.f32 %v2626_v22, %v2582_v48  ;;  %v2474_v6 = vmul.f32 %v7896_v1, %v9137_v34  ;;  %v2633_v51 = vadd.f32 %v2625_v58, %v2581_v62  ;;  %v9141_v53 = vld [vmem:[#allocation40_spill] sm:$0xff]  ;;  %v9142_v48 = vld [vmem:[#allocation55_spill] sm:$0xff] }
 0x3f5   : > { %3175 = vbcast.lane.b32.xlu1 %v7214_v27, 278  ;;  %3171 = vbcast.lane.b32.xlu0 %v7217_v28, 278  ;;  %v2432_v43 = vadd.f32 %v2424_v55, %v2380_v52  ;;  %v2473_v25 = vmul.f32 %v7896_v1, %v9138_v47  ;;  %v2678_v31 = vmul.f32 %v8017_v46, %v9139_v50  ;;  %v9143_v55 = vld [vmem:[#allocation56_spill] sm:$0xff] }
 0x3f6   : > { %v2431_v8 = vadd.f32 %v2423_v44, %v2379_v23  ;;  %v2677_v36 = vmul.f32 %v8017_v46, %v9140_v54  ;;  %v2476_v22 = vmul.f32 %v7896_v1, %v9141_v53  ;;  %v2475_v27 = vmul.f32 %v7896_v1, %v9142_v48  ;;  %v6118_v44 = vld [vmem:[#allocation19 + $0x8] sm:$0xff]   ;;  %v9148_v54 = vld [vmem:[#allocation62_spill] sm:$0xff] }
 0x3f7   : > { %v2812_v28 = vpop.permute.xlu1 %2811  ;;  %v8219_v62 = vpop.permute.xlu0 %2807  ;;  %v2636_v58 = vadd.f32 %v2628_v5, %v2584_v45  ;;  %v2635_v15 = vadd.f32 %v2627_v20, %v2583_v4  ;;  %v2680_v52 = vmul.f32 %v8017_v46, %v9143_v55  ;;  %v2730_v23 = vmul.f32 %v8052_v21, %v9144_v3  ;;  %v9146_v47 = vld [vmem:[#allocation60_spill] sm:$0xff]  ;;  %v9147_v5 = vld [vmem:[#allocation51_spill] sm:$0xff]  ;;  %5762 = vmatprep.subr.bf16.mxu1 %v6118_v44 }
 0x3f8   : > { %v2482_v13 = vadd.f32 %v2474_v6, %v2430_v16  ;;  %v2679_v34 = vmul.f32 %v8017_v46, %v9145_v18  ;;  %v2526_v1 = vmul.f32 %v7918_v61, %v9146_v47  ;;  %v2481_v45 = vadd.f32 %v2473_v25, %v2429_v49  ;;  %5763 = vmatpush3.bf16.msra.mxu1 %v6118_v44 }
 0x3f9   : > { %3027 = vbcast.lane.b32.xlu1 %v7262_v37, 276  ;;  %3023 = vbcast.lane.b32.xlu0 %v7265_v38, 276  ;;  %v2686_v4 = vadd.f32 %v2678_v31, %v2634_v42  ;;  %v2525_v20 = vmul.f32 %v7918_v61, %v9147_v5  ;;  %v2782_v60 = vmul.f32 %v8067_v19, %v8081_v0  ;;  %v9149_v42 = vld [vmem:[#allocation141_spill] sm:$0xff] }
 0x3fa   : > { %v8235_v16 = vadd.f32 %v2677_v36, %v2633_v51  ;;  %v2484_v6 = vadd.f32 %v2476_v22, %v2432_v43  ;;  %v2483_v50 = vadd.f32 %v2475_v27, %v2431_v8  ;;  %v2528_v53 = vmul.f32 %v7918_v61, %v9148_v54  ;;  %5772 = vmatprep.subr.bf16.mxu1 %v9026_v14  ;;  %v9150_v36 = vld [vmem:[#allocation63_spill] sm:$0xff] }
 0x3fb   : > { %v2664_v48 = vpop.permute.xlu1 %2663  ;;  %v2660_v55 = vpop.permute.xlu0 %2659  ;;  %v2688_v3 = vadd.f32 %v2680_v52, %v2636_v58  ;;  %v2738_v49 = vadd.f32 %v2730_v23, %v2686_v4  ;;  %v2527_v25 = vmul.f32 %v7918_v61, %v9149_v42  ;;  %v2834_v31 = vmul.f32 %v8113_v35, %v8177_v9  ;;  %v9151_v9 = vld [vmem:[#allocation53_spill] sm:$0xff]  ;;  %v9152_v52 = vld [vmem:[#allocation64_spill] sm:$0xff]  ;;  %v9154_v4 = vld [vmem:[#allocation54_spill] sm:$0xff] }
 0x3fc   : > { %v2687_v0 = vadd.f32 %v2679_v34, %v2635_v15  ;;  %v2534_v51 = vadd.f32 %v2526_v1, %v2482_v13  ;;  %v2580_v43 = vmul.f32 %v7960_v32, %v8104_v24  ;;  %v2533_v8 = vadd.f32 %v2525_v20, %v2481_v45 }
 0x3fd   : > { %3219 = vbcast.lane.b32.xlu1 %v9007_v11, 278  ;;  %3215 = vbcast.lane.b32.xlu0 %v9008_v12, 278  ;;  %v2732_v22 = vmul.f32 %v8052_v21, %v9150_v36  ;;  %v2790_v27 = vadd.f32 %v2782_v60, %v2738_v49  ;;  %v2579_v61 = vmul.f32 %v7960_v32, %v8106_v7  ;;  %v9153_v7 = vld [vmem:[#allocation65_spill] sm:$0xff] }
 0x3fe   : > { %v2729_v58 = vmul.f32 %v8052_v21, %v9151_v9  ;;  %v2536_v15 = vadd.f32 %v2528_v53, %v2484_v6  ;;  %v2731_v23 = vmul.f32 %v8052_v21, %v9152_v52  ;;  %v2632_v11 = vmul.f32 %v7979_v2, %v8197_v56  ;;  %v9155_v6 = vld [vmem:[#allocation45_spill] sm:$0xff] }
 0x3ff   : > { %v2856_v24 = vpop.permute.xlu1 %2855  ;;  %v2852_v12 = vpop.permute.xlu0 %2851  ;;  %v2535_v44 = vadd.f32 %v2527_v25, %v2483_v50  ;;  %v2842_v13 = vadd.f32 %v2834_v31, %v2790_v27  ;;  %v2631_v18 = vmul.f32 %v7979_v2, %v8199_v10  ;;  %v2578_v47 = vmul.f32 %v7960_v32, %v9153_v7  ;;  %v9156_v27 = vld [vmem:[#allocation46_spill] sm:$0xff] }
 0x400   : > { %v2886_v34 = vmul.f32 %v8141_v63, %v2856_v24  ;;  %v2588_v1 = vadd.f32 %v2580_v43, %v2536_v15  ;;  %v2784_v45 = vmul.f32 %v8067_v19, %v8131_v26  ;;  %v2740_v56 = vadd.f32 %v2732_v22, %v2688_v3  ;;  %v9159_v7 = vld [vmem:[#allocation42_spill] sm:$0xff] }
 0x401   : > { %3035 = vbcast.lane.b32.xlu1 %v9019_v29, 276  ;;  %3031 = vbcast.lane.b32.xlu0 %v9154_v4, 276  ;;  %v2587_v5 = vadd.f32 %v2579_v61, %v2535_v44  ;;  %v2783_v20 = vmul.f32 %v8067_v19, %v8133_v30  ;;  %v2739_v10 = vadd.f32 %v2731_v23, %v2687_v0 }
 0x402   : > { %v2894_v60 = vadd.f32 %v2886_v34, %v2842_v13  ;;  %v2577_v50 = vmul.f32 %v7960_v32, %v9155_v6  ;;  %v2640_v54 = vadd.f32 %v2632_v11, %v2588_v1  ;;  %v2836_v53 = vmul.f32 %v8113_v35, %v2812_v28  ;;  %v9157_v11 = vld [vmem:[#allocation49_spill] sm:$0xff] }
 0x403   : > { %v2672_v49 = vpop.permute.xlu1 %2671  ;;  %v2668_v42 = vpop.permute.xlu0 %2667  ;;  %v2639_v26 = vadd.f32 %v2631_v18, %v2587_v5  ;;  %v2835_v25 = vmul.f32 %v8113_v35, %v8219_v62  ;;  %v2586_v43 = vadd.f32 %v2578_v47, %v2534_v51  ;;  %v2792_v30 = vadd.f32 %v2784_v45, %v2740_v56  ;;  %v9160_v47 = vld [vmem:[#allocation59_spill] sm:$0xff] }
 0x404   : > { %v2684_v3 = vmul.f32 %v8017_v46, %v2672_v49  ;;  %v2683_v31 = vmul.f32 %v8017_v46, %v2668_v42  ;;  %v2630_v0 = vmul.f32 %v7979_v2, %v8155_v57  ;;  %v2791_v32 = vadd.f32 %v2783_v20, %v2739_v10 }
 0x405   : > { %3227 = vbcast.lane.b32.xlu1 %v9029_v17, 278  ;;  %3223 = vbcast.lane.b32.xlu0 %v9030_v59, 278  ;;  %v2629_v28 = vmul.f32 %v7979_v2, %v8157_v33  ;;  %v2585_v62 = vadd.f32 %v2577_v50, %v2533_v8  ;;  %v2781_v61 = vmul.f32 %v8067_v19, %v9156_v27  ;;  %v9158_v8 = vld [vmem:[#allocation50_spill] sm:$0xff] }
 0x406   : > { %v2692_v36 = vadd.f32 %v2684_v3, %v2640_v54  ;;  %v2691_v22 = vadd.f32 %v2683_v31, %v2639_v26  ;;  %v2844_v9 = vadd.f32 %v2836_v53, %v2792_v30  ;;  %v2682_v51 = vmul.f32 %v8017_v46, %v2664_v48 }
 0x407   : > { %v2864_v15 = vpop.permute.xlu1 %2863  ;;  %v2860_v52 = vpop.permute.xlu0 %2859  ;;  %v2843_v57 = vadd.f32 %v2835_v25, %v2791_v32  ;;  %v2681_v17 = vmul.f32 %v8017_v46, %v2660_v55  ;;  %v2737_v2 = vadd.f32 %v2729_v58, %v8235_v16  ;;  %v2638_v33 = vadd.f32 %v2630_v0, %v2586_v43 }
 0x408   : > { %v2888_v59 = vmul.f32 %v8141_v63, %v2864_v15  ;;  %v2887_v23 = vmul.f32 %v8141_v63, %v2860_v52  ;;  %v2637_v24 = vadd.f32 %v2629_v28, %v2585_v62  ;;  %v2833_v48 = vmul.f32 %v8113_v35, %v8179_v41 }
 0x409   : > { %3079 = vbcast.lane.b32.xlu1 %v9157_v11, 277  ;;  %3075 = vbcast.lane.b32.xlu0 %v9158_v8, 277  ;;  %v2789_v18 = vadd.f32 %v2781_v61, %v2737_v2  ;;  %v2690_v34 = vadd.f32 %v2682_v51, %v2638_v33  ;;  %v8295_v1 = vrot.slane %v9160_v47, %v9159_v7 }
 0x40a   : > { %v2896_v44 = vadd.f32 %v2888_v59, %v2844_v9  ;;  %v2895_v13 = vadd.f32 %v2887_v23, %v2843_v57  ;;  %v2689_v16 = vadd.f32 %v2681_v17, %v2637_v24  ;;  %v2885_v58 = vmul.f32 %v8141_v63, %v2852_v12 }
 0x40b   : > { %v2716_v46 = vpop.permute.xlu1 %2715  ;;  %v2712_v55 = vpop.permute.xlu0 %2711  ;;  %v2841_v41 = vadd.f32 %v2833_v48, %v2789_v18 }
 0x40c   : > { %v2734_v45 = vmul.f32 %v8052_v21, %v2716_v46  ;;  %v2733_v56 = vmul.f32 %v8052_v21, %v2712_v55 }
 0x40d   : > { %3087 = vbcast.lane.b32.xlu1 %v7272_v39, 277  ;;  %3083 = vbcast.lane.b32.xlu0 %v7275_v40, 277  ;;  %v2893_v50 = vadd.f32 %v2885_v58, %v2841_v41 }
 0x40e   : > { %v2742_v5 = vadd.f32 %v2734_v45, %v2690_v34  ;;  %v2741_v20 = vadd.f32 %v2733_v56, %v2689_v16 }
 0x40f   : > { %v2908_v10 = vpop.permute.xlu1 %2907  ;;  %v2904_v6 = vpop.permute.xlu0 %2903 }
 0x410   : > { %v2938_v54 = vmul.f32 %v8295_v1, %v2908_v10  ;;  %v2937_v53 = vmul.f32 %v8295_v1, %v2904_v6 }
 0x411   : > { %3131 = vbcast.lane.b32.xlu1 %v7262_v37, 277  ;;  %3127 = vbcast.lane.b32.xlu0 %v7265_v38, 277 }
 0x412   : > { %v2946_v12 = vadd.f32 %v2938_v54, %v2894_v60  ;;  %v2945_v49 = vadd.f32 %v2937_v53, %v2893_v50 }
 0x413   : > { %v2724_v42 = vpop.permute.xlu1 %2723  ;;  %v2720_v26 = vpop.permute.xlu0 %2719 }
 0x414   : > { %v2736_v25 = vmul.f32 %v8052_v21, %v2724_v42  ;;  %v2735_v3 = vmul.f32 %v8052_v21, %v2720_v26 }
 0x415   : > { %3139 = vbcast.lane.b32.xlu1 %v9019_v29, 277  ;;  %3135 = vbcast.lane.b32.xlu0 %v9154_v4, 277 }
 0x416   : > { %v2744_v31 = vadd.f32 %v2736_v25, %v2692_v36  ;;  %v2743_v43 = vadd.f32 %v2735_v3, %v2691_v22  ;;  %v9161_v36 = vld [vmem:[#allocation48_spill] sm:$0xff]  ;;  %v9162_v22 = vld [vmem:[#allocation58_spill] sm:$0xff] }
 0x417   : > { %v2916_v30 = vpop.permute.xlu1 %2915  ;;  %v2912_v0 = vpop.permute.xlu0 %2911  ;;  %v8318_v51 = vrot.slane %v9162_v22, %v9161_v36 }
 0x418   : > { %v2940_v32 = vmul.f32 %v8295_v1, %v2916_v30  ;;  %v2939_v28 = vmul.f32 %v8295_v1, %v2912_v0 }
 0x419   : > { %3183 = vbcast.lane.b32.xlu1 %v9157_v11, 278  ;;  %3179 = vbcast.lane.b32.xlu0 %v9158_v8, 278 }
 0x41a   : > { %v2948_v60 = vadd.f32 %v2940_v32, %v2896_v44  ;;  %v2947_v62 = vadd.f32 %v2939_v28, %v2895_v13 }
 0x41b   : > { %v2768_v27 = vpop.permute.xlu1 %2767  ;;  %v2764_v21 = vpop.permute.xlu0 %2763 }
 0x41c   : > { %v2786_v61 = vmul.f32 %v8067_v19, %v2768_v27  ;;  %v2785_v9 = vmul.f32 %v8067_v19, %v2764_v21 }
 0x41d   : > { %3191 = vbcast.lane.b32.xlu1 %v7272_v39, 278  ;;  %3187 = vbcast.lane.b32.xlu0 %v7275_v40, 278 }
 0x41e   : > { %v2794_v15 = vadd.f32 %v2786_v61, %v2742_v5  ;;  %v2793_v52 = vadd.f32 %v2785_v9, %v2741_v20 }
 0x41f   : > { %v2960_v57 = vpop.permute.xlu1 %2959  ;;  %v2956_v17 = vpop.permute.xlu0 %2955 }
 0x420   : > { %v2990_v59 = vmul.f32 %v8318_v51, %v2960_v57  ;;  %v2989_v23 = vmul.f32 %v8318_v51, %v2956_v17 }
 0x421   : > { %3235 = vbcast.lane.b32.xlu1 %v7262_v37, 278  ;;  %3231 = vbcast.lane.b32.xlu0 %v7265_v38, 278 }
 0x422   : > { %v8326_v2 = vadd.f32 %v2990_v59, %v2946_v12  ;;  %v8328_v33 = vadd.f32 %v2989_v23, %v2945_v49 }
 0x423   : > { %v2776_v11 = vpop.permute.xlu1 %2775  ;;  %v2772_v39 = vpop.permute.xlu0 %2771 }
 0x424   : > { %v2788_v40 = vmul.f32 %v8067_v19, %v2776_v11  ;;  %v2787_v8 = vmul.f32 %v8067_v19, %v2772_v39  ;;  %v8370_v39 = vrot.slane %v9160_v47, %v9161_v36 }
 0x425   : > { %3243 = vbcast.lane.b32.xlu1 %v9019_v29, 278  ;;  %3239 = vbcast.lane.b32.xlu0 %v9154_v4, 278 }
 0x426   : > { %v2796_v24 = vadd.f32 %v2788_v40, %v2744_v31  ;;  %v2795_v48 = vadd.f32 %v2787_v8, %v2743_v43 }
 0x427   : > { %v2968_v44 = vpop.permute.xlu1 %2967  ;;  %v2964_v37 = vpop.permute.xlu0 %2963 }
 0x428   : > { %v2992_v38 = vmul.f32 %v8318_v51, %v2968_v44  ;;  %v2991_v13 = vmul.f32 %v8318_v51, %v2964_v37 }
 0x42a   : > { %v8336_v18 = vadd.f32 %v2992_v38, %v2948_v60  ;;  %v8338_v34 = vadd.f32 %v2991_v13, %v2947_v62 }
 0x42b   : > { %v2820_v46 = vpop.permute.xlu1 %2819  ;;  %v2816_v55 = vpop.permute.xlu0 %2815 }
 0x42c   : > { %v2838_v19 = vmul.f32 %v8113_v35, %v2820_v46  ;;  %v2837_v29 = vmul.f32 %v8113_v35, %v2816_v55 }
 0x42e   : > { %v2846_v16 = vadd.f32 %v2838_v19, %v2794_v15  ;;  %v2845_v4 = vadd.f32 %v2837_v29, %v2793_v52  ;;  %v9164_v19 = vld [vmem:[#allocation52_spill] sm:$0xff] }
 0x42f   : > { %v3012_v58 = vpop.permute.xlu1 %3011  ;;  %v3008_v45 = vpop.permute.xlu0 %3007  ;;  %v8390_v29 = vrot.slane %v9162_v22, %v9164_v19 }
 0x430   : > { %v3042_v44 = vmul.f32 %v8370_v39, %v3012_v58  ;;  %v3041_v37 = vmul.f32 %v8370_v39, %v3008_v45 }
 0x433   : > { %v2828_v56 = vpop.permute.xlu1 %2827  ;;  %v2824_v41 = vpop.permute.xlu0 %2823 }
 0x434   : > { %v2840_v5 = vmul.f32 %v8113_v35, %v2828_v56  ;;  %v2839_v20 = vmul.f32 %v8113_v35, %v2824_v41 }
 0x436   : > { %v2848_v10 = vadd.f32 %v2840_v5, %v2796_v24  ;;  %v2847_v6 = vadd.f32 %v2839_v20, %v2795_v48  ;;  %v9163_v24 = vld [vmem:[#allocation47_spill] sm:$0xff]  ;;  %v8400_v5 = vrot.slane %v9160_v47, %v9164_v19 }
 0x437   : > { %v3020_v50 = vpop.permute.xlu1 %3019  ;;  %v3016_v54 = vpop.permute.xlu0 %3015  ;;  %v8378_v48 = vrot.slane %v9162_v22, %v9163_v24  ;;  %v8384_v38 = vrot.slane %v9160_v47, %v9163_v24 }
 0x43b   : > { %v2872_v53 = vpop.permute.xlu1 %2871  ;;  %v2868_v12 = vpop.permute.xlu0 %2867 }
 0x43c   : > { %v2890_v49 = vmul.f32 %v8141_v63, %v2872_v53  ;;  %v2889_v42 = vmul.f32 %v8141_v63, %v2868_v12 }
 0x43e   : > { %v8346_v26 = vadd.f32 %v2890_v49, %v2846_v16  ;;  %v8348_v25 = vadd.f32 %v2889_v42, %v2845_v4  ;;  %v3050_v16 = vadd.f32 %v3042_v44, %v8326_v2  ;;  %v3049_v4 = vadd.f32 %v3041_v37, %v8328_v33 }
 0x43f   : > { %v3064_v3 = vpop.permute.xlu1 %3063  ;;  %v3060_v31 = vpop.permute.xlu0 %3059  ;;  %v3044_v2 = vmul.f32 %v8370_v39, %v3020_v50  ;;  %v3043_v33 = vmul.f32 %v8370_v39, %v3016_v54 }
 0x440   : > { %v3094_v36 = vmul.f32 %v8378_v48, %v3064_v3  ;;  %v3093_v55 = vmul.f32 %v8378_v48, %v3060_v31 }
 0x441   : > { %v3051_v50 = vadd.f32 %v3043_v33, %v8338_v34 }
 0x442   : > { %v3102_v20 = vadd.f32 %v3094_v36, %v3050_v16 }
 0x443   : > { %v2880_v43 = vpop.permute.xlu1 %2879  ;;  %v2876_v30 = vpop.permute.xlu0 %2875 }
 0x444   : > { %v2892_v35 = vmul.f32 %v8141_v63, %v2880_v43  ;;  %v2891_v0 = vmul.f32 %v8141_v63, %v2876_v30 }
 0x446   : > { %v8352_v32 = vadd.f32 %v2892_v35, %v2848_v10  ;;  %v8354_v28 = vadd.f32 %v2891_v0, %v2847_v6  ;;  %v3101_v10 = vadd.f32 %v3093_v55, %v3049_v4  ;;  %v3052_v0 = vadd.f32 %v3044_v2, %v8336_v18 }
 0x447   : > { %v3072_v60 = vpop.permute.xlu1 %3071  ;;  %v3068_v62 = vpop.permute.xlu0 %3067 }
 0x448   : > { %v3096_v49 = vmul.f32 %v8378_v48, %v3072_v60  ;;  %v3095_v42 = vmul.f32 %v8378_v48, %v3068_v62 }
 0x44a   : > { %v3103_v24 = vadd.f32 %v3095_v42, %v3051_v50 }
 0x44b   : > { %v8356_v27 = vpop.permute.xlu1 %2923  ;;  %v8358_v21 = vpop.permute.xlu0 %2919 }
 0x44c   : > { %v2942_v33 = vmul.f32 %v8295_v1, %v8356_v27 }
 0x44f   : > { %v3116_v61 = vpop.permute.xlu1 %3115  ;;  %v3112_v9 = vpop.permute.xlu0 %3111 }
 0x450   : > { %v3146_v58 = vmul.f32 %v8384_v38, %v3116_v61  ;;  %v3145_v45 = vmul.f32 %v8384_v38, %v3112_v9 }
 0x452   : > { %v3154_v53 = vadd.f32 %v3146_v58, %v3102_v20  ;;  %v3153_v12 = vadd.f32 %v3145_v45, %v3101_v10 }
 0x453   : > { %v8360_v15 = vpop.permute.xlu1 %2931  ;;  %v8362_v52 = vpop.permute.xlu0 %2927 }
 0x457   : > { %v3124_v57 = vpop.permute.xlu1 %3123  ;;  %v3120_v17 = vpop.permute.xlu0 %3119 }
 0x458   : > { %v3148_v54 = vmul.f32 %v8384_v38, %v3124_v57  ;;  %v3147_v61 = vmul.f32 %v8384_v38, %v3120_v17 }
 0x45a   : > { %v3155_v19 = vadd.f32 %v3147_v61, %v3103_v24 }
 0x45b   : > { %v8364_v59 = vpop.permute.xlu1 %2975  ;;  %v8366_v63 = vpop.permute.xlu0 %2971 }
 0x45f   : > { %v3168_v23 = vpop.permute.xlu1 %3167  ;;  %v3164_v11 = vpop.permute.xlu0 %3163 }
 0x460   : > { %v3198_v22 = vmul.f32 %v8390_v29, %v3168_v23  ;;  %v3197_v6 = vmul.f32 %v8390_v29, %v3164_v11  ;;  %v3104_v23 = vadd.f32 %v3096_v49, %v3052_v0 }
 0x462   : > { %v3206_v47 = vadd.f32 %v3198_v22, %v3154_v53  ;;  %v3205_v43 = vadd.f32 %v3197_v6, %v3153_v12  ;;  %v3156_v55 = vadd.f32 %v3148_v54, %v3104_v23  ;;  %v2941_v53 = vmul.f32 %v8295_v1, %v8358_v21 }
 0x463   : > { %v8372_v40 = vpop.permute.xlu1 %2983  ;;  %v8374_v8 = vpop.permute.xlu0 %2979  ;;  %v2994_v12 = vmul.f32 %v8318_v51, %v8364_v59 }
 0x464   : > { %v2949_v21 = vadd.f32 %v2941_v53, %v8348_v25  ;;  %v2996_v59 = vmul.f32 %v8318_v51, %v8372_v40 }
 0x467   : > { %v3176_v13 = vpop.permute.xlu1 %3175  ;;  %v3172_v46 = vpop.permute.xlu0 %3171 }
 0x468   : > { %v3200_v44 = vmul.f32 %v8390_v29, %v3176_v13  ;;  %v3199_v37 = vmul.f32 %v8390_v29, %v3172_v46 }
 0x46a   : > { %v3208_v57 = vadd.f32 %v3200_v44, %v3156_v55  ;;  %v3207_v16 = vadd.f32 %v3199_v37, %v3155_v19 }
 0x46b   : > { %v3028_v56 = vpop.permute.xlu1 %3027  ;;  %v8396_v41 = vpop.permute.xlu0 %3023 }
 0x46c   : > { %v3046_v27 = vmul.f32 %v8370_v39, %v3028_v56 }
 0x46f   : > { %v3220_v3 = vpop.permute.xlu1 %3219  ;;  %v3216_v31 = vpop.permute.xlu0 %3215 }
 0x470   : > { %v3250_v30 = vmul.f32 %v8400_v5, %v3220_v3  ;;  %v3249_v35 = vmul.f32 %v8400_v5, %v3216_v31  ;;  %v2944_v3 = vmul.f32 %v8295_v1, %v8360_v15  ;;  %v2943_v31 = vmul.f32 %v8295_v1, %v8362_v52 }
 0x471   : > { %v3045_v15 = vmul.f32 %v8370_v39, %v8396_v41 }
 0x472   : > { %v3258_v9 = vadd.f32 %v3250_v30, %v3206_v47  ;;  %v3257_v60 = vadd.f32 %v3249_v35, %v3205_v43  ;;  %v2993_v47 = vmul.f32 %v8318_v51, %v8366_v63  ;;  %v2950_v43 = vadd.f32 %v2942_v33, %v8346_v26 }
 0x473   : > { %v3036_v62 = vpop.permute.xlu1 %3035  ;;  %v3032_v11 = vpop.permute.xlu0 %3031  ;;  %v2995_v30 = vmul.f32 %v8318_v51, %v8374_v8  ;;  %v2952_v26 = vadd.f32 %v2944_v3, %v8352_v32  ;;  %v2951_v56 = vadd.f32 %v2943_v31, %v8354_v28 }
 0x474   : > { %v3265_v36 = vpack.c.bf16 %v3258_v9, %v3257_v60  ;;  %v3002_v35 = vadd.f32 %v2994_v12, %v2950_v43  ;;  %v3001_v0 = vadd.f32 %v2993_v47, %v2949_v21  ;;  %v3048_v40 = vmul.f32 %v8370_v39, %v3036_v62 }
 0x475   : > { %v3047_v51 = vmul.f32 %v8370_v39, %v3032_v11  ;;  %v3004_v41 = vadd.f32 %v2996_v59, %v2952_v26  ;;  %v3003_v54 = vadd.f32 %v2995_v30, %v2951_v56  ;;  %v6662_v59 = vmov 1966171168  }
 0x476   : > { %5764 = vmatprep.mubr.msk.bf16.mxu1 %vm1134_vm2, %v3265_v36  ;;  %v3054_v50 = vadd.f32 %v3046_v27, %v3002_v35  ;;  %v3053_v61 = vadd.f32 %v3045_v15, %v3001_v0  ;;  %v3365_v30 = vunpack.c.l.s4 %v6662_v59  ;;  %v9165_v35 = vld [vmem:[#allocation37_spill] sm:$0xff] }
 0x477   : > { %v3228_v18 = vpop.permute.xlu1 %3227  ;;  %v3224_v34 = vpop.permute.xlu0 %3223  ;;  %v3056_v39 = vadd.f32 %v3048_v40, %v3004_v41  ;;  %v3055_v11 = vadd.f32 %v3047_v51, %v3003_v54  ;;  %v3462_v51 = vld [vmem:[#allocation9 + $0x10] sm:$0xff] }
 0x478   : > { %v3252_v17 = vmul.f32 %v8400_v5, %v3228_v18  ;;  %v3251_v4 = vmul.f32 %v8400_v5, %v3224_v34  ;;  %v3366_v15 = vunpack.c.0.s8 %v3365_v30  ;;  %v3465_v30 = vld [vmem:[#allocation9 + $0x28] sm:$0xff] }
 0x47a   : > { %v3260_v58 = vadd.f32 %v3252_v17, %v3208_v57  ;;  %v3259_v45 = vadd.f32 %v3251_v4, %v3207_v16 }
 0x47b   : > { %v3080_v20 = vpop.permute.xlu1 %3079  ;;  %v3076_v10 = vpop.permute.xlu0 %3075 }
 0x47c   : > { %v3266_v13 = vpack.c.bf16 %v3260_v58, %v3259_v45  ;;  %v3098_v1 = vmul.f32 %v8378_v48, %v3080_v20  ;;  %v3097_v25 = vmul.f32 %v8378_v48, %v3076_v10 }
 0x47e   : > { %5765 = vmatmul.mubr.msk.bf16.vlgmr.msra.gmra.mrb[4].mxu1 %vm1134_vm2, %v3266_v13  ;;  %v3106_v60 = vadd.f32 %v3098_v1, %v3054_v50  ;;  %v3105_v37 = vadd.f32 %v3097_v25, %v3053_v61  ;;  %v8466_v1 = vsub.s32 %v3366_v15, %v9165_v35  ;;  %v9166_v25 = vld [vmem:[#allocation38_spill] sm:$0xff]  ;;  %v3460_v61 = vld [vmem:[#allocation9] sm:$0xff] }
 0x47f   : > { %v3088_v46 = vpop.permute.xlu1 %3087  ;;  %v3084_v22 = vpop.permute.xlu0 %3083 }
 0x480   : > { %v3100_v32 = vmul.f32 %v8378_v48, %v3088_v46  ;;  %v3099_v28 = vmul.f32 %v8378_v48, %v3084_v22 }
 0x482   : > { %v3108_v34 = vadd.f32 %v3100_v32, %v3056_v39  ;;  %v3107_v57 = vadd.f32 %v3099_v28, %v3055_v11  ;;  %v3463_v11 = vld [vmem:[#allocation9 + $0x18] sm:$0xff] }
 0x483   : > { %v3132_v6 = vpop.permute.xlu1 %3131  ;;  %v3128_v2 = vpop.permute.xlu0 %3127 }
 0x484   : > { %v3150_v8 = vmul.f32 %v8384_v38, %v3132_v6  ;;  %v3149_v9 = vmul.f32 %v8384_v38, %v3128_v2 }
 0x486   : > { %v3158_v36 = vadd.f32 %v3150_v8, %v3106_v60  ;;  %v3157_v19 = vadd.f32 %v3149_v9, %v3105_v37  ;;  %v3461_v37 = vld [vmem:[#allocation9 + $0x8] sm:$0xff] }
 0x487   : > { %v3140_v49 = vpop.permute.xlu1 %3139  ;;  %v3136_v42 = vpop.permute.xlu0 %3135 }
 0x488   : > { %v3152_v55 = vmul.f32 %v8384_v38, %v3140_v49  ;;  %v3151_v18 = vmul.f32 %v8384_v38, %v3136_v42 }
 0x48a   : > { %v3160_v13 = vadd.f32 %v3152_v55, %v3108_v34  ;;  %v3159_v46 = vadd.f32 %v3151_v18, %v3107_v57  ;;  %v5573_v18 = vld [vmem:[%s9167_s9] ss:$0 sm:$0xff]  ;;  %s6663_s9 = smov 15  }
 0x48b   : > { %v3184_v52 = vpop.permute.xlu1 %3183  ;;  %v3180_v63 = vpop.permute.xlu0 %3179 }
 0x48c   : > { %v3202_v23 = vmul.f32 %v8390_v29, %v3184_v52  ;;  %v3201_v62 = vmul.f32 %v8390_v29, %v3180_v63 }
 0x48e   : > { %v3210_v16 = vadd.f32 %v3202_v23, %v3158_v36  ;;  %v3209_v58 = vadd.f32 %v3201_v62, %v3157_v19 }
 0x48f   : > { %v3192_v24 = vpop.permute.xlu1 %3191  ;;  %v3188_v44 = vpop.permute.xlu0 %3187 }
 0x490   : > { %v3204_v48 = vmul.f32 %v8390_v29, %v3192_v24  ;;  %v3203_v45 = vmul.f32 %v8390_v29, %v3188_v44 }
 0x492   : > { %v3212_v2 = vadd.f32 %v3204_v48, %v3160_v13  ;;  %v3211_v53 = vadd.f32 %v3203_v45, %v3159_v46 }
 0x493   : > { %v3236_v17 = vpop.permute.xlu1 %3235  ;;  %v3232_v4 = vpop.permute.xlu0 %3231 }
 0x494   : > { %v3254_v20 = vmul.f32 %v8400_v5, %v3236_v17  ;;  %v3253_v10 = vmul.f32 %v8400_v5, %v3232_v4 }
 0x496   : > { %v3262_v22 = vadd.f32 %v3254_v20, %v3210_v16  ;;  %v3261_v6 = vadd.f32 %v3253_v10, %v3209_v58 }
 0x497   : > { %v3244_v38 = vpop.permute.xlu1 %3243  ;;  %v3240_v33 = vpop.permute.xlu0 %3239 }
 0x498   : > { %v3267_v12 = vpack.c.bf16 %v3262_v22, %v3261_v6  ;;  %v3256_v49 = vmul.f32 %v8400_v5, %v3244_v38  ;;  %v3255_v42 = vmul.f32 %v8400_v5, %v3240_v33  ;;  %v3466_v33 = vld [vmem:[#allocation9 + $0x30] sm:$0xff] }
 0x49a   : > { %v3264_v3 = vadd.f32 %v3256_v49, %v3212_v2  ;;  %v3263_v31 = vadd.f32 %v3255_v42, %v3211_v53  ;;  %5768 = vmatprep.mubr.msk.bf16.mxu1 %vm1134_vm2, %v3267_v12  ;;  %v3464_v42 = vld [vmem:[#allocation9 + $0x20] sm:$0xff] }
 0x49c   : > { %v3268_v29 = vpack.c.bf16 %v3264_v3, %v3263_v31 }
 0x49e   : > { %5769 = vmatmul.mubr.msk.bf16.gmra.mrb[8].mxu1 %vm1134_vm2, %v3268_v29 }
 0x49f   : > { %5774 = vmatprep.mubr.msk.bf16.mxu1 %vm6661_vm3, %v9026_v14 }
 0x4b6   : > { %v1629_v47 = vpop.f32.mrb[8].mxu0 }
 0x4b7   : > { %v5758_v43 = vpop.f32.mrb[9].mxu0  ;;  %v3370_v5 = vrot.slane %v1629_v47, %v8466_v1  ;;  %v3363_v19 = vcombine.high %v1629_v47, %v1629_v47 }
 0x4b8   : > { %v1632_v27 = vpop.f32.mrb[10].mxu0 }
 0x4b9   : > { %v5759_v21 = vpop.f32.mrb[11].mxu0  ;;  %v3378_v52 = vcombine.high %v3370_v5, %v3370_v5  ;;  %v3386_v63 = vrot.slane %v3370_v5, %v8466_v1  ;;  %v3377_v16 = vrot.slane %v3363_v19, %v8466_v1 }
 0x4ba   : > { %v3467_v21 = vld [vmem:[#allocation9 + $0x38] sm:$0xff] }
 0x4bb   : > { %v3400_v26 = vrot.slane %v3378_v52, %v8466_v1  ;;  %v3408_v56 = vcombine.high %v3386_v63, %v3386_v63  ;;  %v3415_v8 = vrot.slane %v3386_v63, %v9166_v25  ;;  %v3379_v58 = vcombine.high %v3377_v16, %v3377_v16 }
 0x4bc   : > { %v3393_v10 = vrot.slane %v3377_v16, %v8466_v1 }
 0x4bd   : > { %v3410_v0 = vcombine.high %v3400_v26, %v3400_v26  ;;  %v3423_v50 = vrot.slane %v3408_v56, %v9166_v25  ;;  %v3419_v28 = vrot.slane %v3400_v26, %v9166_v25  ;;  %v3407_v46 = vrot.slane %v3379_v58, %v8466_v1 }
 0x4be   : > { %v3409_v22 = vcombine.high %v3393_v10, %v3393_v10  ;;  %v3431_v53 = vrot.slane %v3393_v10, %v9166_v25 }
 0x4bf   : > { %v3427_v9 = vrot.slane %v3410_v0, %v9166_v25  ;;  %v3411_v6 = vcombine.high %v3407_v46, %v3407_v46  ;;  %v3435_v47 = vrot.slane %v3407_v46, %v9166_v25  ;;  %v3525_v46 = vld [vmem:[%s7164_s6] sm:$0xff]  ;;  %s9169_s6 = sld [smem:[#allocation34_spill]] }
 0x4c0   : > { %v3439_v2 = vrot.slane %v3409_v22, %v9166_v25  ;;  %vm3526_vm11 = vcmp.gt.f32.partialorder %v3525_v46, 0.5  ;;  %v6125_v46 = vld [vmem:[#allocation22 + $0x20] ss:$16 sps:$4 sm:$0xff]  }
 0x4c1   : > { %v3443_v3 = vrot.slane %v3411_v6, %v9166_v25 }
 0x4c5   : > { %s8504_s13 = sshll.u32 %s9169_s6, 3  ;;  %s9181_s6 = sld [smem:[#allocation173_spill]] (%p9180_p12) }
 0x4c6   : > { %s5051_s15 = scalar_lea.vmem %s7170_s22, %s8504_s13 [#allocation28] }
 0x551   : > { %v5766_v40 = vpop.f32.mrb[4].mxu1 }
 0x552   : > { %v3454_v41 = vadd.f32 %v5766_v40, %v3423_v50  ;;  %v3331_v54 = vpop.f32.mrb[5].mxu1 }
 0x553   : > { %v3452_v60 = vadd.f32 %v3415_v8, %v3331_v54  ;;  %v5767_v32 = vpop.f32.mrb[6].mxu1 }
 0x554   : > { %v3470_v23 = vadd.f32 %v3462_v51, %v3454_v41  ;;  %v3455_v24 = vadd.f32 %v5767_v32, %v3427_v9  ;;  %v3334_v44 = vpop.f32.mrb[7].mxu1 }
 0x555   : > { %v3468_v62 = vadd.f32 %v3460_v61, %v3452_v60  ;;  %v3453_v39 = vadd.f32 %v3419_v28, %v3334_v44  ;;  %v9168_v60 = vlaneseq  ;;  %v3516_v28 = vstv %s3515_s10 }
 0x556   : > { %v3471_v55 = vadd.f32 %v3463_v11, %v3455_v24 }
 0x557   : > { %6253 = vtanh.f32 %v3468_v62  ;;  %v3469_v36 = vadd.f32 %v3461_v37, %v3453_v39  ;;  %v3536_v32 = vand.u32 127, %v9168_v60  ;;  %v3674_v60 = vld [vmem:[%s7159_s4 + $0xc] sm:$0xf] }
 0x558   : > { %6255 = vtanh.f32 %v3470_v23 }
 0x559   : > { %6257 = vtanh.f32 %v3469_v36  ;;  %v3539_v44 = vsub.s32 %v3536_v32, %v9165_v35 }
 0x55a   : > { %6259 = vtanh.f32 %v3471_v55 }
 0x561   : > { %v6254_v34 = vpop.eup %6253 }
 0x562   : > { %v6256_v57 = vpop.eup %6255  ;;  %v3491_v48 = vmul.f32 %v6254_v34, %v5573_v18 }
 0x563   : > { %v6258_v17 = vpop.eup %6257  ;;  %v3493_v45 = vmul.f32 %v6256_v57, %v5573_v18 }
 0x564   : > { %3499 = vadd.xlane.f32.xlu0 %v3491_v48  ;;  %v3492_v4 = vmul.f32 %v6258_v17, %v5573_v18  ;;  %v6260_v20 = vpop.eup %6259 }
 0x565   : > { %v3494_v13 = vmul.f32 %v6260_v20, %v5573_v18 }
 0x566   : > { %3501 = vadd.xlane.f32.xlu1 %v3492_v4 }
 0x568   : > { %3503 = vadd.xlane.f32.xlu0 %v3493_v45 }
 0x56c   : > { %3505 = vadd.xlane.f32.xlu0 %v3494_v13 }
 0x571   : > { %v5770_v38 = vpop.f32.mrb[8].mxu1 }
 0x572   : > { %v3458_v12 = vadd.f32 %v5770_v38, %v3439_v2  ;;  %v3347_v49 = vpop.f32.mrb[9].mxu1 }
 0x573   : > { %v3456_v31 = vadd.f32 %v3431_v53, %v3347_v49  ;;  %v5771_v29 = vpop.f32.mrb[10].mxu1 }
 0x574   : > { %v3474_v43 = vadd.f32 %v3466_v33, %v3458_v12  ;;  %v3459_v27 = vadd.f32 %v5771_v29, %v3443_v3  ;;  %v3350_v59 = vpop.f32.mrb[11].mxu1 }
 0x575   : > { %v3472_v15 = vadd.f32 %v3464_v42, %v3456_v31  ;;  %v3457_v5 = vadd.f32 %v3435_v47, %v3350_v59 }
 0x576   : > { %v3475_v52 = vadd.f32 %v3467_v21, %v3459_v27  ;;  %v3673_v27 = vld [vmem:[%s7159_s4 + $0x8] sm:$0xf] }
 0x577   : > { %6261 = vtanh.f32 %v3472_v15  ;;  %v3473_v63 = vadd.f32 %v3465_v30, %v3457_v5  ;;  %v3776_v59 = vsel %vm3682_vm13, %v3673_v27, 0 }
 0x578   : > { %6263 = vtanh.f32 %v3474_v43  ;;  %v3671_v43 = vld [vmem:[%s7159_s4] sm:$0xf]  ;;  %5785 = vmatpush3.bf16.msra.mxu0 %v3776_v59 }
 0x579   : > { %6265 = vtanh.f32 %v3473_v63  ;;  %v3684_v21 = vsel %vm3682_vm13, %v3671_v43, 0  ;;  %5796 = vmatprep.subr.bf16.mxu0 %v9026_v14  ;;  %v3672_v63 = vld [vmem:[%s7159_s4 + $0x4] sm:$0xf] }
 0x57a   : > { %6267 = vtanh.f32 %v3475_v52  ;;  %5773 = vmatpush3.bf16.msra.mxu1 %v3684_v21 }
 0x57b   : > { %5778 = vmatprep.subr.bf16.mxu1 %v9026_v14 }
 0x581   : > { %v6262_v26 = vpop.eup %6261 }
 0x582   : > { %v6264_v56 = vpop.eup %6263  ;;  %v3495_v0 = vmul.f32 %v6262_v26, %v5573_v18 }
 0x583   : > { %v6266_v50 = vpop.eup %6265  ;;  %v3497_v8 = vmul.f32 %v6264_v56, %v5573_v18 }
 0x584   : > { %3507 = vadd.xlane.f32.xlu1 %v3495_v0  ;;  %v3496_v40 = vmul.f32 %v6266_v50, %v5573_v18  ;;  %v6268_v51 = vpop.eup %6267  ;;  %v3675_v0 = vld [vmem:[%s7159_s4 + $0x10] sm:$0xf] }
 0x585   : > { %v3498_v41 = vmul.f32 %v6268_v51, %v5573_v18 }
 0x586   : > { %3509 = vadd.xlane.f32.xlu0 %v3496_v40  ;;  %v3730_v40 = vsel %vm3682_vm13, %v3672_v63, 0 }
 0x588   : > { %3511 = vadd.xlane.f32.xlu1 %v3497_v8 }
 0x58a   : > { %3513 = vadd.xlane.f32.xlu0 %v3498_v41 }
 0x5f1   : > { %v3500_v54 = vpop.xlane.xlu0 %3499 }
 0x5f2   : > { %v3517_v37 = vadd.f32 %v3516_v28, %v3500_v54  ;;  %v3868_v54 = vsel %vm3682_vm13, %v3675_v0, 0 }
 0x5f3   : > { %v3502_v9 = vpop.xlane.xlu1 %3501 }
 0x5f4   : > { %v3518_v23 = vadd.f32 %v3516_v28, %v3502_v9  ;;  %v3540_v36 = vrot.slane %v3517_v37, %v3539_v44 }
 0x5f5   : > { %v3504_v61 = vpop.xlane.xlu0 %3503 }
 0x5f6   : > { %v3519_v62 = vadd.f32 %v3516_v28, %v3504_v61  ;;  %v3544_v39 = vrot.slane %v3518_v23, %v3539_v44 }
 0x5f8   : > { %v3548_v55 = vrot.slane %v3519_v62, %v3539_v44  ;;  %v3570_v19 = vsel %vm3569_vm4, %v3544_v39, %v3540_v36  ;;  %v3676_v39 = vld [vmem:[%s7159_s4 + $0x14] sm:$0xf] }
 0x5f9   : > { %v3506_v24 = vpop.xlane.xlu0 %3505 }
 0x5fa   : > { %v3520_v11 = vadd.f32 %v3516_v28, %v3506_v24  ;;  %v3572_v48 = vsel %vm3571_vm5, %v3548_v55, %v3570_v19  ;;  %v3822_v24 = vsel %vm3682_vm13, %v3674_v60, 0  ;;  %v3914_v55 = vsel %vm3682_vm13, %v3676_v39, 0 }
 0x5fc   : > { %v3552_v18 = vrot.slane %v3520_v11, %v3539_v44 }
 0x5fe   : > { %v3574_v4 = vsel %vm3573_vm6, %v3552_v18, %v3572_v48 }
 0x611   : > { %v3508_v34 = vpop.xlane.xlu1 %3507 }
 0x612   : > { %v3521_v57 = vadd.f32 %v3516_v28, %v3508_v34 }
 0x613   : > { %v3510_v16 = vpop.xlane.xlu0 %3509 }
 0x614   : > { %v3556_v35 = vrot.slane %v3521_v57, %v3539_v44  ;;  %v3522_v17 = vadd.f32 %v3516_v28, %v3510_v16  ;;  %v3678_v57 = vld [vmem:[%s7159_s4 + $0x1c] sm:$0xf]  ;;  %v9170_v16 = vmov 0  }
 0x615   : > { %v3512_v58 = vpop.xlane.xlu1 %3511 }
 0x616   : > { %v3576_v45 = vsel %vm3575_vm7, %v3556_v35, %v3574_v4  ;;  %v3560_v20 = vrot.slane %v3522_v17, %v3539_v44  ;;  %v3523_v10 = vadd.f32 %v3516_v28, %v3512_v58  ;;  %v4006_v35 = vsel %vm3682_vm13, %v3678_v57, 0  ;;  %v6121_v58 = vld [vmem:[#allocation22 + $0x4] ss:$16 sps:$4 sm:$0xff]  }
 0x617   : > { %v3514_v13 = vpop.xlane.xlu0 %3513 }
 0x618   : > { %v3578_v22 = vsel %vm3577_vm8, %v3560_v20, %v3576_v45  ;;  %v3564_v6 = vrot.slane %v3523_v10, %v3539_v44  ;;  %v3524_v2 = vadd.f32 %v3516_v28, %v3514_v13  ;;  %v3677_v28 = vld [vmem:[%s7159_s4 + $0x18] sm:$0xf]  ;;  %v6122_v20 = vld [vmem:[#allocation22 + $0x8] ss:$16 sps:$4 sm:$0xff]   ;;  %v6127_v10 = vld [vmem:[#allocation22 + $0x24] ss:$16 sps:$4 sm:$0xff]   ;;  %s5046_s4 = scalar_lea.vmem %s7166_s5, %s8504_s13 [#allocation26] }
 0x619   : > { %v3960_v37 = vsel %vm3682_vm13, %v3677_v28, 0  ;;  %v6119_v45 = vld [vmem:[#allocation22] ss:$16 sps:$4 sm:$0xff]   ;;  %v6130_v13 = vld [vmem:[#allocation22 + $0x2c] ss:$16 sps:$4 sm:$0xff]  }
 0x61a   : > { %v3568_v38 = vrot.slane %v3524_v2, %v3539_v44  ;;  %v3580_v33 = vsel %vm3579_vm9, %v3564_v6, %v3578_v22  ;;  %v6128_v22 = vld [vmem:[#allocation22 + $0x28] ss:$16 sps:$4 sm:$0xff]   ;;  %v6133_v6 = vld [vmem:[#allocation20 + $0x4] ss:$16 sps:$4 sm:$0xff]   ;;  %v6136_v2 = vld [vmem:[#allocation20 + $0xc] ss:$16 sps:$4 sm:$0xff]  }
 0x61c   : > { %v3582_v53 = vsel %vm3581_vm10, %v3568_v38, %v3580_v33 }
 0x61d   : > { %v3584_v12 = vsel %vm3526_vm11, %v3582_v53, -1e+30 }
 0x61e   : > { %v3586_v49 = vsel %vm3585_vm12, %v3584_v12, -inf }
 0x61f   : > { %3587 = vmax.xlane.f32.xlu1 %v3586_v49 }
 0x6ac   : > { %v3588_v42 = vpop.xlane.xlu1 %3587 }
 0x6ad   : > { %v3589_v3 = vsub.f32 %v3584_v12, %v3588_v42 }
 0x6af   : > { %v3590_v31 = vmul.f32 1.442695, %v3589_v3 }
 0x6b1   : > { %6269 = vpow2.f32 %v3590_v31 }
 0x6bb   : > { %v6270_v29 = vpop.eup %6269 }
 0x6bc   : > { %v3592_v47 = vsel %vm3585_vm12, %v6270_v29, 0.0 }
 0x6bd   : > { %3593 = vadd.xlane.f32.xlu0 %v3592_v47 }
 0x74a   : > { %v3594_v30 = vpop.xlane.xlu0 %3593 }
 0x74b   : > { %6271 = vrcp.f32 %v3594_v30 }
 0x755   : > { %v6272_v15 = vpop.eup %6271 }
 0x756   : > { %v8508_v5 = vmul.f32 %v6272_v15, %v6270_v29 }
 0x758   : > { %v3613_v52 = vrot.slane %v8508_v5, %v8466_v1  ;;  %5052 = vst.msk [vmem:[%s5051_s15] sm:$0xff] %vm3585_vm12, %v8508_v5  ;;  %v3606_v56 = vcombine.high %v8508_v5, %v8508_v5  ;;  %s9178_s15 = sld [smem:[#allocation170_spill]] }
 0x75a   : > { %v3629_v26 = vrot.slane %v3613_v52, %v8466_v1  ;;  %v3621_v8 = vcombine.high %v3613_v52, %v3613_v52  ;;  %v3620_v61 = vrot.slane %v3606_v56, %v8466_v1 }
 0x75c   : > { %v3663_v50 = vpack.c.bf16 %v3629_v26, %v3629_v26  ;;  %v3651_v51 = vcombine.high %v3629_v26, %v3629_v26  ;;  %v3643_v9 = vrot.slane %v3621_v8, %v8466_v1  ;;  %v3636_v32 = vrot.slane %v3620_v61, %v8466_v1 }
 0x75d   : > { %v3622_v19 = vcombine.high %v3620_v61, %v3620_v61 }
 0x75e   : > { %5775 = vmatmul.mubr.msk.bf16.vlgmr.msra.gmra.mrb[12].mxu1 %vm3585_vm12, %v3663_v50  ;;  %v3665_v41 = vpack.c.bf16 %v3651_v51, %v3651_v51  ;;  %v3664_v23 = vpack.c.bf16 %v3643_v9, %v3643_v9  ;;  %v3667_v44 = vpack.c.bf16 %v3636_v32, %v3636_v32  ;;  %v3653_v62 = vcombine.high %v3643_v9, %v3643_v9 }
 0x75f   : > { %5779 = vmatpush3.bf16.msra.mxu1 %v3730_v40  ;;  %5780 = vmatprep.mubr.msk.bf16.mxu1 %vm6661_vm3, %v9026_v14  ;;  %v3652_v11 = vcombine.high %v3636_v32, %v3636_v32  ;;  %v3650_v34 = vrot.slane %v3622_v19, %v8466_v1  ;;  %v6124_v1 = vld [vmem:[#allocation22 + $0xc] ss:$16 sps:$4 sm:$0xff]  }
 0x760   : > { %5787 = vmatmul.mubr.msk.bf16.vlgmr.msra.gmra.mrb[12].mxu0 %vm3585_vm12, %v3665_v41  ;;  %5790 = vmatprep.subr.bf16.mxu1 %v9026_v14  ;;  %v3666_v36 = vpack.c.bf16 %v3653_v62, %v3653_v62 }
 0x761   : > { %5797 = vmatpush3.bf16.msra.mxu0 %v3868_v54  ;;  %5798 = vmatprep.mubr.msk.bf16.mxu0 %vm6661_vm3, %v9026_v14  ;;  %v3669_v18 = vpack.c.bf16 %v3652_v11, %v3652_v11  ;;  %v3668_v48 = vpack.c.bf16 %v3650_v34, %v3650_v34  ;;  %v3654_v17 = vcombine.high %v3650_v34, %v3650_v34 }
 0x762   : > { %5808 = vmatprep.subr.bf16.mxu0 %v9026_v14 }
 0x763   : > { %v3670_v4 = vpack.c.bf16 %v3654_v17, %v3654_v17 }
 0x766   : > { %5781 = vmatmul.mubr.msk.bf16.vlgmr.msra.gmra.mrb[16].mxu1 %vm3585_vm12, %v3664_v23 }
 0x767   : > { %5791 = vmatpush3.bf16.msra.mxu1 %v3822_v24  ;;  %5792 = vmatprep.mubr.msk.bf16.mxu1 %vm6661_vm3, %v9026_v14 }
 0x768   : > { %5799 = vmatmul.mubr.msk.bf16.vlgmr.msra.gmra.mrb[16].mxu0 %vm3585_vm12, %v3667_v44  ;;  %5802 = vmatprep.subr.bf16.mxu1 %v9026_v14 }
 0x769   : > { %5809 = vmatpush3.bf16.msra.mxu0 %v3960_v37  ;;  %5810 = vmatprep.mubr.msk.bf16.mxu0 %vm6661_vm3, %v9026_v14 }
 0x76a   : > { %4194 = vmatprep.subr.bf16.mxu0 %v6121_v58 }
 0x76e   : > { %5793 = vmatmul.mubr.msk.bf16.vlgmr.msra.gmra.mrb[20].mxu1 %vm3585_vm12, %v3666_v36 }
 0x76f   : > { %5803 = vmatpush3.bf16.msra.mxu1 %v3914_v55  ;;  %5804 = vmatprep.mubr.msk.bf16.mxu1 %vm6661_vm3, %v9026_v14 }
 0x770   : > { %5811 = vmatmul.mubr.msk.bf16.vlgmr.msra.gmra.mrb[20].mxu0 %vm3585_vm12, %v3669_v18  ;;  %5814 = vmatprep.subr.bf16.mxu1 %v9026_v14 }
 0x771   : > { %4226 = vmatprep.mubr.bf16.mxu0 %v9170_v16  ;;  %4195 = vmatpush1.bf16.msra.mxu0 %v6119_v45 }
 0x772   : > { %4196 = vmatprep.subr.bf16.mxu0 %v6127_v10 }
 0x775   : > { %4197 = vmatpush1.bf16.msra.mxu0 %v6125_v46 }
 0x776   : > { %5805 = vmatmul.mubr.msk.bf16.vlgmr.msra.gmra.mrb[24].mxu1 %vm3585_vm12, %v3668_v48  ;;  %4436 = vmatprep.subr.bf16.mxu0 %v6133_v6 }
 0x777   : > { %5815 = vmatpush3.bf16.msra.mxu1 %v4006_v35  ;;  %5816 = vmatprep.mubr.msk.bf16.mxu1 %vm6661_vm3, %v9026_v14 }
 0x778   : > { %4235 = vmatprep.subr.bf16.mxu1 %v6124_v1 }
 0x77e   : > { %5817 = vmatmul.mubr.msk.bf16.vlgmr.msra.gmra.mrb[28].mxu1 %vm3585_vm12, %v3670_v4 }
 0x77f   : > { %4267 = vmatprep.mubr.bf16.mxu1 %v9170_v16  ;;  %4236 = vmatpush1.bf16.msra.mxu1 %v6122_v20 }
 0x780   : > { %4237 = vmatprep.subr.bf16.mxu1 %v6130_v13 }
 0x783   : > { %4238 = vmatpush1.bf16.msra.mxu1 %v6128_v22 }
 0x784   : > { %4477 = vmatprep.subr.bf16.mxu1 %v6136_v2 }
 0x831   : > { %v3720_v38 = vpop.f32.mrb[12].mxu1 }
 0x832   : > { %v5776_v33 = vpop.f32.mrb[13].mxu1  ;;  %v4072_v43 = vpack.c.bf16 %v3720_v38, %v3720_v38 }
 0x833   : > { %v3723_v53 = vpop.f32.mrb[14].mxu1  ;;  %v3812_v12 = vpop.f32.mrb[12].mxu0 }
 0x834   : > { %v5777_v49 = vpop.f32.mrb[15].mxu1  ;;  %v5788_v42 = vpop.f32.mrb[13].mxu0  ;;  %v4074_v29 = vpack.c.bf16 %v3812_v12, %v3812_v12  ;;  %v4058_v30 = vrot.slane %v3812_v12, 6  ;;  %v4128_v8 = vunpack.c.l.b16 %v4072_v43 }
 0x835   : > { %v3815_v3 = vpop.f32.mrb[14].mxu0 }
 0x836   : > { %v5789_v31 = vpop.f32.mrb[15].mxu0  ;;  %v4130_v15 = vunpack.c.l.b16 %v4074_v29 }
 0x838   : > { %v4138_v61 = vrot.slane %v4130_v15, 6 }
 0x839   : > { %v3766_v47 = vpop.f32.mrb[16].mxu1 }
 0x83a   : > { %v4056_v27 = vrot.slane %v3766_v47, 7  ;;  %v4073_v21 = vpack.c.bf16 %v3766_v47, %v3766_v47  ;;  %v5782_v59 = vpop.f32.mrb[17].mxu1 }
 0x83b   : > { %v3769_v52 = vpop.f32.mrb[18].mxu1  ;;  %v3904_v63 = vpop.f32.mrb[16].mxu0 }
 0x83c   : > { %v4057_v26 = vsel %vm3569_vm4, %v4056_v27, %v3720_v38  ;;  %v4129_v56 = vunpack.c.l.b16 %v4073_v21  ;;  %v5783_v0 = vpop.f32.mrb[19].mxu1  ;;  %v5800_v50 = vpop.f32.mrb[17].mxu0  ;;  %v4076_v9 = vpack.c.bf16 %v3904_v63, %v3904_v63  ;;  %v4062_v37 = vrot.slane %v3904_v63, 4  ;;  %v6131_v63 = vld [vmem:[#allocation20] ss:$16 sps:$4 sm:$0xff]  }
 0x83d   : > { %v3907_v40 = vpop.f32.mrb[18].mxu0  ;;  %v4059_v51 = vsel %vm3571_vm5, %v4058_v30, %v4057_v26  ;;  %v6134_v26 = vld [vmem:[#allocation20 + $0x8] ss:$16 sps:$4 sm:$0xff]   ;;  %v6139_v0 = vld [vmem:[#allocation20 + $0x24] ss:$16 sps:$4 sm:$0xff]  }
 0x83e   : > { %v4136_v41 = vrot.slane %v4129_v56, 7  ;;  %v5801_v54 = vpop.f32.mrb[19].mxu0  ;;  %v4132_v62 = vunpack.c.l.b16 %v4076_v9  ;;  %v6142_v50 = vld [vmem:[#allocation20 + $0x2c] ss:$16 sps:$4 sm:$0xff]   ;;  %v6137_v40 = vld [vmem:[#allocation20 + $0x20] ss:$16 sps:$4 sm:$0xff]  }
 0x83f   : > { %v6143_v54 = vld [vmem:[#allocation20 + $0x40] ss:$16 sps:$4 sm:$0xff]   ;;  %v6151_v9 = vld [vmem:[#allocation20 + $0x64] ss:$16 sps:$4 sm:$0xff]  }
 0x840   : > { %v4137_v60 = vsel %vm3569_vm4, %v4136_v41, %v4128_v8  ;;  %v4142_v17 = vrot.slane %v4132_v62, 4  ;;  %v6145_v8 = vld [vmem:[#allocation20 + $0x44] ss:$16 sps:$4 sm:$0xff]   ;;  %v6148_v41 = vld [vmem:[#allocation20 + $0x4c] ss:$16 sps:$4 sm:$0xff]  }
 0x841   : > { %v3858_v32 = vpop.f32.mrb[20].mxu1  ;;  %v4139_v28 = vsel %vm3571_vm5, %v4138_v61, %v4137_v60  ;;  %v6146_v61 = vld [vmem:[#allocation20 + $0x48] ss:$16 sps:$4 sm:$0xff]   ;;  %v6154_v60 = vld [vmem:[#allocation20 + $0x6c] ss:$16 sps:$4 sm:$0xff]  }
 0x842   : > { %v4060_v23 = vrot.slane %v3858_v32, 5  ;;  %v4075_v24 = vpack.c.bf16 %v3858_v32, %v3858_v32  ;;  %v5794_v44 = vpop.f32.mrb[21].mxu1  ;;  %v6149_v32 = vld [vmem:[#allocation20 + $0x60] ss:$16 sps:$4 sm:$0xff]   ;;  %v6163_v62 = vld [vmem:[#allocation20 + $0xa4] ss:$16 sps:$4 sm:$0xff]  }
 0x843   : > { %v3861_v39 = vpop.f32.mrb[22].mxu1  ;;  %v3996_v11 = vpop.f32.mrb[20].mxu0  ;;  %v6155_v44 = vld [vmem:[#allocation20 + $0x80] ss:$16 sps:$4 sm:$0xff]  }
 0x844   : > { %v4061_v36 = vsel %vm3573_vm6, %v4060_v23, %v4059_v51  ;;  %v4131_v55 = vunpack.c.l.b16 %v4075_v24  ;;  %v5795_v19 = vpop.f32.mrb[23].mxu1  ;;  %v5812_v18 = vpop.f32.mrb[21].mxu0  ;;  %v4078_v4 = vpack.c.bf16 %v3996_v11, %v3996_v11  ;;  %v4066_v46 = vrot.slane %v3996_v11, 2  ;;  %v6140_v51 = vld [vmem:[#allocation20 + $0x28] ss:$16 sps:$4 sm:$0xff]  }
 0x845   : > { %v3999_v34 = vpop.f32.mrb[22].mxu0  ;;  %v4063_v57 = vsel %vm3575_vm7, %v4062_v37, %v4061_v36  ;;  %v6157_v23 = vld [vmem:[#allocation20 + $0x84] ss:$16 sps:$4 sm:$0xff]   ;;  %v6160_v24 = vld [vmem:[#allocation20 + $0x8c] ss:$16 sps:$4 sm:$0xff]  }
 0x846   : > { %v4140_v48 = vrot.slane %v4131_v55, 5  ;;  %v5813_v35 = vpop.f32.mrb[23].mxu0  ;;  %v4134_v22 = vunpack.c.l.b16 %v4078_v4  ;;  %v6158_v37 = vld [vmem:[#allocation20 + $0x88] ss:$16 sps:$4 sm:$0xff]   ;;  %v6166_v39 = vld [vmem:[#allocation20 + $0xac] ss:$16 sps:$4 sm:$0xff]  }
 0x847   : > { %v6161_v11 = vld [vmem:[#allocation20 + $0xa0] ss:$16 sps:$4 sm:$0xff]   ;;  %v6164_v36 = vld [vmem:[#allocation20 + $0xa8] ss:$16 sps:$4 sm:$0xff]   ;;  %v6169_v55 = vld [vmem:[#allocation20 + $0xc4] ss:$16 sps:$4 sm:$0xff]  }
 0x848   : > { %v4141_v58 = vsel %vm3573_vm6, %v4140_v48, %v4139_v28  ;;  %v4146_v49 = vrot.slane %v4134_v22, 2  ;;  %v6152_v28 = vld [vmem:[#allocation20 + $0x68] ss:$16 sps:$4 sm:$0xff]   ;;  %v6172_v19 = vld [vmem:[#allocation20 + $0xcc] ss:$16 sps:$4 sm:$0xff]  }
 0x849   : > { %v3950_v1 = vpop.f32.mrb[24].mxu1  ;;  %v4143_v45 = vsel %vm3575_vm7, %v4142_v17, %v4141_v58  ;;  %v6167_v18 = vld [vmem:[#allocation20 + $0xc0] ss:$16 sps:$4 sm:$0xff]   ;;  %v6170_v34 = vld [vmem:[#allocation20 + $0xc8] ss:$16 sps:$4 sm:$0xff]  }
 0x84a   : > { %v4064_v20 = vrot.slane %v3950_v1, 3  ;;  %v4077_v10 = vpack.c.bf16 %v3950_v1, %v3950_v1  ;;  %v5806_v13 = vpop.f32.mrb[25].mxu1  ;;  %v6178_v48 = vld [vmem:[#allocation20 + $0xec] ss:$16 sps:$4 sm:$0xff]   ;;  %v6173_v35 = vld [vmem:[#allocation20 + $0xe0] ss:$16 sps:$4 sm:$0xff]  }
 0x84b   : > { %v3953_v6 = vpop.f32.mrb[26].mxu1  ;;  %v6176_v17 = vld [vmem:[#allocation20 + $0xe8] ss:$16 sps:$4 sm:$0xff]   ;;  %v6181_v4 = vld [vmem:[#allocation23 + $0x4] ss:$16 sps:$4 sm:$0xff]  }
 0x84c   : > { %v4065_v2 = vsel %vm3577_vm8, %v4064_v20, %v4063_v57  ;;  %v4133_v38 = vunpack.c.l.b16 %v4077_v10  ;;  %v5807_v33 = vpop.f32.mrb[27].mxu1  ;;  %v6175_v57 = vld [vmem:[#allocation20 + $0xe4] ss:$16 sps:$4 sm:$0xff]   ;;  %v6184_v58 = vld [vmem:[#allocation23 + $0xc] ss:$16 sps:$4 sm:$0xff]  }
 0x84d   : > { %v4067_v53 = vsel %vm3579_vm9, %v4066_v46, %v4065_v2  ;;  %v6179_v1 = vld [vmem:[#allocation23] ss:$16 sps:$4 sm:$0xff]   ;;  %v6187_v20 = vld [vmem:[#allocation23 + $0x24] ss:$16 sps:$4 sm:$0xff]   ;;  %v6190_v10 = vld [vmem:[#allocation23 + $0x2c] ss:$16 sps:$4 sm:$0xff]  }
 0x84e   : > { %v4144_v12 = vrot.slane %v4133_v38, 3  ;;  %v9171_v13 = vld [vmem:[#allocation66_spill] sm:$0xff]  ;;  %v6185_v46 = vld [vmem:[#allocation23 + $0x20] ss:$16 sps:$4 sm:$0xff]   ;;  %v6193_v6 = vld [vmem:[#allocation23 + $0x44] ss:$16 sps:$4 sm:$0xff]  }
 0x84f   : > { %v6188_v22 = vld [vmem:[#allocation23 + $0x28] ss:$16 sps:$4 sm:$0xff]   ;;  %v6196_v2 = vld [vmem:[#allocation23 + $0x4c] ss:$16 sps:$4 sm:$0xff]   ;;  %v6191_v38 = vld [vmem:[#allocation23 + $0x40] ss:$16 sps:$4 sm:$0xff]  }
 0x850   : > { %v4145_v42 = vsel %vm3577_vm8, %v4144_v12, %v4143_v45  ;;  %v6182_v45 = vld [vmem:[#allocation23 + $0x8] ss:$16 sps:$4 sm:$0xff]   ;;  %v6202_v12 = vld [vmem:[#allocation23 + $0x6c] ss:$16 sps:$4 sm:$0xff]  }
 0x851   : > { %v4042_v3 = vpop.f32.mrb[28].mxu1  ;;  %v4147_v31 = vsel %vm3579_vm9, %v4146_v49, %v4145_v42  ;;  %v6194_v33 = vld [vmem:[#allocation23 + $0x48] ss:$16 sps:$4 sm:$0xff]   ;;  %v6197_v49 = vld [vmem:[#allocation23 + $0x60] ss:$16 sps:$4 sm:$0xff]  }
 0x852   : > { %v4068_v29 = vrot.slane %v4042_v3, 1  ;;  %v4079_v47 = vpack.c.bf16 %v4042_v3, %v4042_v3  ;;  %v5818_v43 = vpop.f32.mrb[29].mxu1  ;;  %v6200_v42 = vld [vmem:[#allocation23 + $0x68] ss:$16 sps:$4 sm:$0xff]   ;;  %v6205_v3 = vld [vmem:[#allocation23 + $0x84] ss:$16 sps:$4 sm:$0xff]  }
 0x853   : > { %v4045_v27 = vpop.f32.mrb[30].mxu1  ;;  %v6214_v43 = vld [vmem:[#allocation23 + $0xac] ss:$16 sps:$4 sm:$0xff]  }
 0x854   : > { %v4069_v21 = vsel %vm3581_vm10, %v4068_v29, %v4067_v53  ;;  %v4135_v59 = vunpack.c.l.b16 %v4079_v47  ;;  %v5819_v30 = vpop.f32.mrb[31].mxu1  ;;  %v6199_v53 = vld [vmem:[#allocation23 + $0x64] ss:$16 sps:$4 sm:$0xff]   ;;  %v6203_v29 = vld [vmem:[#allocation23 + $0x80] ss:$16 sps:$4 sm:$0xff]  }
 0x855   : > { %4071 = vst.msk [vmem:[#allocation6] sm:$0xff] %vm1134_vm2, %v4069_v21  ;;  %v6211_v47 = vld [vmem:[#allocation23 + $0xa4] ss:$16 sps:$4 sm:$0xff]   ;;  %v6209_v27 = vld [vmem:[#allocation23 + $0xa0] ss:$16 sps:$4 sm:$0xff]  }
 0x856   : > { %v4148_v15 = vrot.slane %v4135_v59, 1  ;;  %v6212_v21 = vld [vmem:[#allocation23 + $0xa8] ss:$16 sps:$4 sm:$0xff]   ;;  %v6217_v59 = vld [vmem:[#allocation23 + $0xc4] ss:$16 sps:$4 sm:$0xff]  }
 0x857   : > { %v6220_v30 = vld [vmem:[#allocation23 + $0xcc] ss:$16 sps:$4 sm:$0xff]  }
 0x858   : > { %v4149_v52 = vsel %vm3581_vm10, %v4148_v15, %v4147_v31  ;;  %v6208_v31 = vld [vmem:[#allocation23 + $0x8c] ss:$16 sps:$4 sm:$0xff]   ;;  %v6215_v15 = vld [vmem:[#allocation23 + $0xc0] ss:$16 sps:$4 sm:$0xff]  }
 0x859   : > { %v8574_v56 = vpack.c.b16 %v4149_v52, %v4149_v52  ;;  %v6218_v52 = vld [vmem:[#allocation23 + $0xc8] ss:$16 sps:$4 sm:$0xff]  }
 0x85b   : > { %5590 = vmatmul.mubr.msk.bf16.vlgmr.msra.gmra.mrb[24].mxu0 %vm1134_vm2, %v8574_v56  ;;  %5591 = vmatmul.mubr.msk.bf16.vlgmr.msra.gmra.mrb[32].mxu1 %vm1134_vm2, %v8574_v56 }
 0x85c   : > { %4437 = vmatpush1.bf16.msra.mxu0 %v6131_v63  ;;  %4478 = vmatpush1.bf16.msra.mxu1 %v6134_v26  ;;  %v6223_v63 = vld [vmem:[#allocation23 + $0xe4] ss:$16 sps:$4 sm:$0xff]   ;;  %v6226_v26 = vld [vmem:[#allocation23 + $0xec] ss:$16 sps:$4 sm:$0xff]  }
 0x85d   : > { %4438 = vmatprep.subr.bf16.mxu0 %v6139_v0  ;;  %4479 = vmatprep.subr.bf16.mxu1 %v6142_v50  ;;  %v6221_v0 = vld [vmem:[#allocation23 + $0xe0] ss:$16 sps:$4 sm:$0xff]   ;;  %v6224_v50 = vld [vmem:[#allocation23 + $0xe8] ss:$16 sps:$4 sm:$0xff]  }
 0x85e   : > { %4468 = vmatprep.mubr.bf16.mxu0 %v9170_v16  ;;  %4509 = vmatprep.mubr.bf16.mxu1 %v9170_v16 }
 0x860   : > { %4439 = vmatpush1.bf16.msra.mxu0 %v6137_v40  ;;  %4480 = vmatpush1.bf16.msra.mxu1 %v6140_v51  ;;  %v4518_v40 = vld [vmem:[#allocation4] sm:$0xff] }
 0x861   : > { %4440 = vmatprep.subr.bf16.mxu0 %v6145_v8  ;;  %4481 = vmatprep.subr.bf16.mxu1 %v6148_v41  ;;  %v4519_v51 = vpack.c.bf16 %v4518_v40, %v4518_v40  ;;  %v6227_v8 = vld [vmem:[%s9172_s16] sm:$0xff]   ;;  %v6228_v41 = vld [vmem:[%s9172_s16 + $0x8] sm:$0xff]  }
 0x864   : > { %4441 = vmatpush1.bf16.msra.mxu0 %v6143_v54  ;;  %4482 = vmatpush1.bf16.msra.mxu1 %v6146_v61  ;;  %v6229_v54 = vld [vmem:[%s9173_s14] sm:$0xff]   ;;  %v6230_v61 = vld [vmem:[%s9173_s14 + $0x8] sm:$0xff]  }
 0x865   : > { %4442 = vmatprep.subr.bf16.mxu0 %v6151_v9  ;;  %4483 = vmatprep.subr.bf16.mxu1 %v6154_v60  ;;  %v6231_v9 = vld [vmem:[%s9173_s14 + $0x10] sm:$0xff]   ;;  %v6233_v60 = vld [vmem:[%s9173_s14 + $0x20] sm:$0xff]  }
 0x868   : > { %4443 = vmatpush1.bf16.msra.mxu0 %v6149_v32  ;;  %4484 = vmatpush1.bf16.msra.mxu1 %v6152_v28  ;;  %v6234_v32 = vld [vmem:[%s9173_s14 + $0x28] sm:$0xff]   ;;  %v6235_v28 = vld [vmem:[%s9173_s14 + $0x30] sm:$0xff]  }
 0x869   : > { %4444 = vmatprep.subr.bf16.mxu0 %v6157_v23  ;;  %4485 = vmatprep.subr.bf16.mxu1 %v6160_v24  ;;  %v6236_v23 = vld [vmem:[%s9173_s14 + $0x38] sm:$0xff]  }
 0x86c   : > { %4445 = vmatpush1.bf16.msra.mxu0 %v6155_v44  ;;  %4486 = vmatpush1.bf16.msra.mxu1 %v6158_v37 }
 0x86d   : > { %4446 = vmatprep.subr.bf16.mxu0 %v6163_v62  ;;  %4487 = vmatprep.subr.bf16.mxu1 %v6166_v39 }
 0x870   : > { %4447 = vmatpush1.bf16.msra.mxu0 %v6161_v11  ;;  %4488 = vmatpush1.bf16.msra.mxu1 %v6164_v36 }
 0x871   : > { %4448 = vmatprep.subr.bf16.mxu0 %v6169_v55  ;;  %4489 = vmatprep.subr.bf16.mxu1 %v6172_v19 }
 0x874   : > { %4449 = vmatpush1.bf16.msra.mxu0 %v6167_v18  ;;  %4490 = vmatpush1.bf16.msra.mxu1 %v6170_v34 }
 0x875   : > { %4450 = vmatprep.subr.bf16.mxu0 %v6175_v57  ;;  %4491 = vmatprep.subr.bf16.mxu1 %v6178_v48 }
 0x878   : > { %4451 = vmatpush1.bf16.msra.mxu0 %v6173_v35  ;;  %4492 = vmatpush1.bf16.msra.mxu1 %v6176_v17 }
 0x879   : > { %4712 = vmatprep.subr.bf16.mxu0 %v6181_v4  ;;  %4753 = vmatprep.subr.bf16.mxu1 %v6184_v58 }
 0x87b   : > { %4469 = vmatmul.mubr.bf16.vlgmr.msra.gmra.mrb[28].mxu0 %v9171_v13  ;;  %4510 = vmatmul.mubr.bf16.vlgmr.msra.gmra.mrb[36].mxu1 %v9171_v13 }
 0x87c   : > { %4713 = vmatpush1.bf16.msra.mxu0 %v6179_v1  ;;  %4754 = vmatpush1.bf16.msra.mxu1 %v6182_v45 }
 0x87d   : > { %4714 = vmatprep.subr.bf16.mxu0 %v6187_v20  ;;  %4755 = vmatprep.subr.bf16.mxu1 %v6190_v10  ;;  %v4798_v20 = vld [vmem:[%s9174_s20] sm:$0xf] }
 0x87e   : > { %4744 = vmatprep.mubr.bf16.mxu0 %v9170_v16  ;;  %4785 = vmatprep.mubr.bf16.mxu1 %v9170_v16  ;;  %v6206_v16 = vld [vmem:[#allocation23 + $0x88] ss:$16 sps:$4 sm:$0xff]   ;;  %v4803_v10 = vrot.slane %v4798_v20, %v9166_v25  ;;  %v4815_v25 = vrot.slane %v4798_v20, %v9159_v7 }
 0x880   : > { %4715 = vmatpush1.bf16.msra.mxu0 %v6185_v46  ;;  %4756 = vmatpush1.bf16.msra.mxu1 %v6188_v22  ;;  %v9175_v22 = vld [vmem:[#allocation39_spill] sm:$0xff] }
 0x881   : > { %4716 = vmatprep.subr.bf16.mxu0 %v6193_v6  ;;  %4757 = vmatprep.subr.bf16.mxu1 %v6196_v2  ;;  %v4807_v6 = vrot.slane %v4798_v20, %v9175_v22 }
 0x884   : > { %4717 = vmatpush1.bf16.msra.mxu0 %v6191_v38  ;;  %4758 = vmatpush1.bf16.msra.mxu1 %v6194_v33 }
 0x885   : > { %4718 = vmatprep.subr.bf16.mxu0 %v6199_v53  ;;  %4759 = vmatprep.subr.bf16.mxu1 %v6202_v12 }
 0x888   : > { %4719 = vmatpush1.bf16.msra.mxu0 %v6197_v49  ;;  %4760 = vmatpush1.bf16.msra.mxu1 %v6200_v42 }
 0x889   : > { %4720 = vmatprep.subr.bf16.mxu0 %v6205_v3  ;;  %4761 = vmatprep.subr.bf16.mxu1 %v6208_v31 }
 0x88c   : > { %4721 = vmatpush1.bf16.msra.mxu0 %v6203_v29  ;;  %4762 = vmatpush1.bf16.msra.mxu1 %v6206_v16 }
 0x88d   : > { %4722 = vmatprep.subr.bf16.mxu0 %v6211_v47  ;;  %4763 = vmatprep.subr.bf16.mxu1 %v6214_v43 }
 0x890   : > { %4723 = vmatpush1.bf16.msra.mxu0 %v6209_v27  ;;  %4764 = vmatpush1.bf16.msra.mxu1 %v6212_v21 }
 0x891   : > { %4724 = vmatprep.subr.bf16.mxu0 %v6217_v59  ;;  %4765 = vmatprep.subr.bf16.mxu1 %v6220_v30 }
 0x894   : > { %4725 = vmatpush1.bf16.msra.mxu0 %v6215_v15  ;;  %4766 = vmatpush1.bf16.msra.mxu1 %v6218_v52  ;;  %v9176_v52 = vld [vmem:[#allocation44_spill] sm:$0xff] }
 0x895   : > { %4726 = vmatprep.subr.bf16.mxu0 %v6223_v63  ;;  %4767 = vmatprep.subr.bf16.mxu1 %v6226_v26  ;;  %v4811_v63 = vrot.slane %v4798_v20, %v9176_v52 }
 0x898   : > { %4727 = vmatpush1.bf16.msra.mxu0 %v6221_v0  ;;  %4768 = vmatpush1.bf16.msra.mxu1 %v6224_v50 }
 0x899   : > { %5820 = vmatprep.subr.bf16.mxu0 %v9026_v14  ;;  %5828 = vmatprep.subr.bf16.mxu1 %v9026_v14 }
 0x89b   : > { %4745 = vmatmul.mubr.bf16.vlgmr.msra.gmra.mrb[32].mxu0 %v4519_v51  ;;  %4786 = vmatmul.mubr.bf16.vlgmr.msra.gmra.mrb[40].mxu1 %v4519_v51 }
 0x89c   : > { %5821 = vmatpush3.bf16.msra.mxu0 %v6227_v8  ;;  %5824 = vmatprep.mubr.msk.bf16.mxu0 %vm6661_vm3, %v9026_v14 }
 0x89d   : > { %5822 = vmatprep.subr.bf16.mxu0 %v9026_v14  ;;  %5844 = vmatprep.mubr.msk.bf16.mxu1 %vm6661_vm3, %v9026_v14 }
 0x89e   : > { %5829 = vmatpush3.bf16.msra.mxu1 %v6229_v54 }
 0x89f   : > { %5830 = vmatprep.subr.bf16.mxu1 %v9026_v14 }
 0x8a0   : > { %5823 = vmatpush3.bf16.msra.mxu0 %v6228_v41 }
 0x8a2   : > { %5831 = vmatpush3.bf16.msra.mxu1 %v6230_v61  ;;  %v4843_v61 = vld [vmem:[#allocation5] sm:$0xff] }
 0x8a3   : > { %5825 = vmatmul.mubr.msk.bf16.vlgmr.msra.gmra.mrb[36].mxu0 %vm1134_vm2, %v8574_v56  ;;  %5832 = vmatprep.subr.bf16.mxu1 %v9026_v14  ;;  %v6232_v56 = vld [vmem:[%s9173_s14 + $0x18] sm:$0xff]  }
 0x8a6   : > { %5833 = vmatpush3.bf16.msra.mxu1 %v6231_v9 }
 0x8a7   : > { %5834 = vmatprep.subr.bf16.mxu1 %v9026_v14 }
 0x8aa   : > { %5835 = vmatpush3.bf16.msra.mxu1 %v6232_v56 }
 0x8ab   : > { %5836 = vmatprep.subr.bf16.mxu1 %v9026_v14 }
 0x8ae   : > { %5837 = vmatpush3.bf16.msra.mxu1 %v6233_v60 }
 0x8af   : > { %5838 = vmatprep.subr.bf16.mxu1 %v9026_v14 }
 0x8b2   : > { %5839 = vmatpush3.bf16.msra.mxu1 %v6234_v32 }
 0x8b3   : > { %5840 = vmatprep.subr.bf16.mxu1 %v9026_v14 }
 0x8b6   : > { %5841 = vmatpush3.bf16.msra.mxu1 %v6235_v28 }
 0x8b7   : > { %5842 = vmatprep.subr.bf16.mxu1 %v9026_v14 }
 0x8ba   : > { %5843 = vmatpush3.bf16.msra.mxu1 %v6236_v23 }
 0x92e   : > { %v4228_v24 = vpop.f32.mrb[24].mxu0  ;;  %v4269_v44 = vpop.f32.mrb[32].mxu1 }
 0x92f   : > { %v4230_v37 = vpop.f32.mrb[25].mxu0  ;;  %v4271_v62 = vpop.f32.mrb[33].mxu1 }
 0x930   : > { %v4232_v39 = vpop.f32.mrb[26].mxu0  ;;  %v4273_v11 = vpop.f32.mrb[34].mxu1 }
 0x931   : > { %v4233_v36 = vpop.f32.mrb[27].mxu0  ;;  %v4274_v55 = vpop.f32.mrb[35].mxu1 }
 0x932   : > { %v3603_v55 = vld [vmem:[#allocation8] sm:$0xff] }
 0x94e   : > { %v4470_v19 = vpop.f32.mrb[28].mxu0  ;;  %v4511_v18 = vpop.f32.mrb[36].mxu1 }
 0x94f   : > { %v4471_v34 = vadd.f32 %v4470_v19, %v4228_v24  ;;  %v4512_v57 = vadd.f32 %v4511_v18, %v4269_v44  ;;  %v4472_v48 = vpop.f32.mrb[29].mxu0  ;;  %v4513_v35 = vpop.f32.mrb[37].mxu1 }
 0x950   : > { %v4473_v17 = vadd.f32 %v4472_v48, %v4230_v37  ;;  %v4514_v4 = vadd.f32 %v4513_v35, %v4271_v62  ;;  %v4474_v58 = vpop.f32.mrb[30].mxu0  ;;  %v4515_v1 = vpop.f32.mrb[38].mxu1  ;;  %v5671_v37 = vld [vmem:[%s9177_s26] ss:$0 sm:$0xff]  ;;  %s5048_s26 = scalar_lea.vmem %s7168_s1, %s8504_s13 [#allocation27] }
 0x951   : > { %v4475_v14 = vpop.f32.mrb[31].mxu0  ;;  %v4516_v45 = vpop.f32.mrb[39].mxu1 }
 0x952   : > { %v5043_v45 = vstv %s5042_s28 }
 0x96e   : > { %v4746_v13 = vpop.f32.mrb[32].mxu0  ;;  %v4787_v46 = vpop.f32.mrb[40].mxu1 }
 0x96f   : > { %v4794_v2 = vadd.f32 %v4746_v13, %v4471_v34  ;;  %v4796_v38 = vadd.f32 %v4787_v46, %v4512_v57  ;;  %v4748_v33 = vpop.f32.mrb[33].mxu0  ;;  %v4789_v53 = vpop.f32.mrb[41].mxu1  ;;  %v5670_v57 = vld [vmem:[%s9178_s15] ss:$0 sm:$0xff]  ;;  %s5069_s15 = scalar_lea.vmem (%p9180_p12), %s9181_s6, %s7150_s18 }
 0x970   : > { %v4795_v12 = vadd.f32 %v4748_v33, %v4473_v17  ;;  %v4797_v49 = vadd.f32 %v4789_v53, %v4514_v4  ;;  %v4750_v42 = vpop.f32.mrb[34].mxu0  ;;  %v4791_v3 = vpop.f32.mrb[42].mxu1 }
 0x971   : > { %v4820_v31 = vadd.f32 %v4803_v10, %v4794_v2  ;;  %v4751_v29 = vpop.f32.mrb[35].mxu0  ;;  %v4792_v16 = vpop.f32.mrb[43].mxu1  ;;  %v4822_v50 = vadd.f32 %v4811_v63, %v4796_v38 }
 0x972   : > { %v4821_v47 = vadd.f32 %v4807_v6, %v4795_v12  ;;  %v4823_v30 = vadd.f32 %v4815_v25, %v4797_v49 }
 0x973   : > { %v5656_v43 = vmul.f32 -1.442695, %v4820_v31 }
 0x974   : > { %v5657_v27 = vmul.f32 -1.442695, %v4821_v47  ;;  %v5658_v0 = vmul.f32 -1.442695, %v4823_v30 }
 0x975   : > { %6273 = vpow2.f32 %v5656_v43 }
 0x976   : > { %6275 = vpow2.f32 %v5657_v27  ;;  %v4918_v21 = vpop.f32.mrb[36].mxu0 }
 0x977   : > { %v5826_v59 = vpop.f32.mrb[37].mxu0  ;;  %6277 = vpow2.f32 %v5658_v0 }
 0x978   : > { %v4921_v15 = vpop.f32.mrb[38].mxu0  ;;  %6279 = vtanh.f32 %v4822_v50 }
 0x979   : > { %v5827_v26 = vpop.f32.mrb[39].mxu0 }
 0x97f   : > { %v6274_v40 = vpop.eup %6273 }
 0x980   : > { %v6276_v51 = vpop.eup %6275  ;;  %v4827_v8 = vadd.f32 1.0, %v6274_v40 }
 0x981   : > { %v4833_v41 = vadd.f32 1.0, %v6276_v51  ;;  %v6278_v7 = vpop.eup %6277 }
 0x982   : > { %6281 = vrcp.f32 %v4827_v8  ;;  %v6280_v54 = vpop.eup %6279  ;;  %v4840_v32 = vadd.f32 1.0, %v6278_v7 }
 0x983   : > { %6283 = vrcp.f32 %v4833_v41 }
 0x984   : > { %6285 = vrcp.f32 %v4840_v32 }
 0x98c   : > { %v6282_v9 = vpop.eup %6281 }
 0x98d   : > { %v6284_v56 = vpop.eup %6283  ;;  %v4845_v60 = vmul.f32 %v6282_v9, %v6280_v54 }
 0x98e   : > { %v4844_v28 = vmul.f32 %v6284_v56, %v4843_v61  ;;  %v6286_v24 = vpop.eup %6285 }
 0x990   : > { %v4846_v23 = vadd.f32 %v4845_v60, %v4844_v28 }
 0x992   : > { %4849 = vst [vmem:[#allocation5] sm:$0xff] %v4846_v23  ;;  %6287 = vtanh.f32 %v4846_v23 }
 0x99c   : > { %v6288_v44 = vpop.eup %6287 }
 0x99d   : > { %v4848_v62 = vmul.f32 %v6288_v44, %v6286_v24 }
 0x99f   : > { %v5027_v39 = vmul.f32 %v5671_v37, %v4848_v62  ;;  %4850 = vst [vmem:[#allocation4] sm:$0xff] %v4848_v62  ;;  %v4851_v11 = vpack.c.bf16 %v4848_v62, %v4848_v62 }
 0x9a1   : > { %5028 = vadd.xlane.f32.xlu1 %v5027_v39  ;;  %5845 = vmatmul.mubr.bf16.vlgmr.msra.gmra.mrb[44].mxu1 %v4851_v11 }
 0x9b2   : > { %3598 = vrot.lane.b32.xlu1 %v8508_v5, %s6663_s9  ;;  %v5672_v5 = vld [vmem:[%s9179_s17] ss:$0 sm:$0xff] }
 0xa2e   : > { %v5029_v36 = vpop.xlane.xlu1 %5028 }
 0xa32   : > { %v3599_v19 = vpop.permute.xlu1 %3598 }
 0xa33   : > { %3602 = vst.msk [vmem:[#allocation7] sm:$0xff] %vm3601_vm14, %v3599_v19  ;;  %v3604_v18 = vadd.f32 %v3603_v55, %v3599_v19 }
 0xa35   : > { %3605 = vst.msk [vmem:[#allocation8] sm:$0xff] %vm3601_vm14, %v3604_v18 }
 0xa74   : > { %v5006_v34 = vpop.f32.mrb[44].mxu1 }
 0xa75   : > { %v5007_v48 = vadd.f32 %v5006_v34, %v4918_v21  ;;  %v5846_v35 = vpop.f32.mrb[45].mxu1 }
 0xa76   : > { %v5009_v17 = vpop.f32.mrb[46].mxu1 }
 0xa77   : > { %v5019_v4 = vadd.f32 %v5670_v57, %v5007_v48  ;;  %v5847_v58 = vpop.f32.mrb[47].mxu1 }
 0xa79   : > { %5047 = vst.msk [vmem:[%s5046_s4] sm:$0xff] %vm3585_vm12, %v5019_v4  ;;  %v5037_v1 = vmul.f32 %v5672_v5, %v5019_v4 }
 0xa7b   : > { %v5038_v14 = vsel %vm3585_vm12, %v5037_v1, 0.0 }
 0xa7c   : > { %5039 = vadd.xlane.f32.xlu0 %v5038_v14 }
 0xa80   : > { %v5107_v46 = vld [vmem:[%s7166_s5] sm:$0xff] (%p9180_p12)  ;;  %v5109_v22 = vld [vmem:[%s7166_s5 + $0x8] sm:$0xff] (%p9180_p12)  ;;  %v5111_v6 = vld [vmem:[%s7166_s5 + $0x10] sm:$0xff] (%p9180_p12) }
 0xa81   : > { %5108 = vst [vmem:[%s5069_s15] sm:$0xff] (%p9180_p12), %v5107_v46  ;;  %5110 = vst [vmem:[%s5069_s15 + $0x10] sm:$0xff] (%p9180_p12), %v5109_v22  ;;  %v5113_v2 = vld [vmem:[%s7166_s5 + $0x18] sm:$0xff] (%p9180_p12)  ;;  %v5115_v38 = vld [vmem:[%s7166_s5 + $0x20] sm:$0xff] (%p9180_p12) }
 0xa82   : > { %5112 = vst [vmem:[%s5069_s15 + $0x20] sm:$0xff] (%p9180_p12), %v5111_v6  ;;  %v5117_v33 = vld [vmem:[%s7166_s5 + $0x28] sm:$0xff] (%p9180_p12)  ;;  %5114 = vst [vmem:[%s5069_s15 + $0x30] sm:$0xff] (%p9180_p12), %v5113_v2 }
 0xa83   : > { %5116 = vst [vmem:[%s5069_s15 + $0x40] sm:$0xff] (%p9180_p12), %v5115_v38  ;;  %5118 = vst [vmem:[%s5069_s15 + $0x50] sm:$0xff] (%p9180_p12), %v5117_v33 }
 0xb08   : > { %5067 = sbr.rel (!%p9180_p12) target bundleno = 2831 (0xb0f), region = 152 }
 0xb09   : > { %v5040_v20 = vpop.xlane.xlu0 %5039 }
 0xb0a   : > { %v5041_v10 = vadd.f32 %v5040_v20, %v5029_v36 }
 0xb0c   : > { %v5044_v13 = vadd.f32 %v5043_v45, %v5041_v10 }
 0xb0e   : > { %5050 = vst.msk [vmem:[%s5048_s26] sm:$0xff] %vm5049_vm15, %v5044_v13 }
 0xb0f PF: > { %p9182_p13 = scmp.ne.s32.totalorder %s8877_s29, 0 }
 0xb10   : > { %s9183_s27 = sld [smem:[#allocation174_spill]] (%p9182_p13) }
 0xb11   : > { %5124 = sbr.rel (!%p9182_p13) target bundleno = 2842 (0xb1a), region = 190 }
 0xb15   : > { %v5164_v53 = vld [vmem:[%s7168_s1] sm:$0xff] (%p9182_p13)  ;;  %v5166_v12 = vld [vmem:[%s7168_s1 + $0x8] sm:$0xff] (%p9182_p13)  ;;  %v5168_v49 = vld [vmem:[%s7168_s1 + $0x10] sm:$0xff] (%p9182_p13) }
 0xb16   : > { %s5126_s20 = scalar_lea.vmem (%p9182_p13), %s9183_s27, %s7150_s18  ;;  %v5170_v42 = vld [vmem:[%s7168_s1 + $0x18] sm:$0xff] (%p9182_p13)  ;;  %v5172_v3 = vld [vmem:[%s7168_s1 + $0x20] sm:$0xff] (%p9182_p13)  ;;  %v5174_v31 = vld [vmem:[%s7168_s1 + $0x28] sm:$0xff] (%p9182_p13) }
 0xb17   : > { %5165 = vst [vmem:[%s5126_s20] sm:$0xff] (%p9182_p13), %v5164_v53  ;;  %5167 = vst [vmem:[%s5126_s20 + $0x10] sm:$0xff] (%p9182_p13), %v5166_v12 }
 0xb18   : > { %5169 = vst [vmem:[%s5126_s20 + $0x20] sm:$0xff] %v5168_v49  ;;  %5171 = vst [vmem:[%s5126_s20 + $0x30] sm:$0xff] %v5170_v42 }
 0xb19   : > { %5173 = vst [vmem:[%s5126_s20 + $0x40] sm:$0xff] %v5172_v3  ;;  %5175 = vst [vmem:[%s5126_s20 + $0x50] sm:$0xff] %v5174_v31 }
 0xb1a PF: > { %p9184_p0 = scmp.ne.s32.totalorder %s8877_s29, 0 }
 0xb1b   : > { %s9185_s28 = sld [smem:[#allocation175_spill]] (%p9184_p0)  ;;  %v5221_v29 = vld [vmem:[%s7170_s22] sm:$0xff] (%p9184_p0)  ;;  %v5223_v16 = vld [vmem:[%s7170_s22 + $0x8] sm:$0xff] (%p9184_p0)  ;;  %v5225_v47 = vld [vmem:[%s7170_s22 + $0x10] sm:$0xff] (%p9184_p0) }
 0xb1c   : > { %5181 = sbr.rel (!%p9184_p0) target bundleno = 2853 (0xb25), region = 228  ;;  %v5227_v43 = vld [vmem:[%s7170_s22 + $0x18] sm:$0xff] (%p9184_p0)  ;;  %v5229_v27 = vld [vmem:[%s7170_s22 + $0x20] sm:$0xff] (%p9184_p0)  ;;  %v5231_v25 = vld [vmem:[%s7170_s22 + $0x28] sm:$0xff] (%p9184_p0) }
 0xb21   : > { %s5183_s26 = scalar_lea.vmem (%p9184_p0), %s9185_s28, %s7150_s18 }
 0xb22   : > { %5222 = vst [vmem:[%s5183_s26] sm:$0xff] (%p9184_p0), %v5221_v29  ;;  %5224 = vst [vmem:[%s5183_s26 + $0x10] sm:$0xff] (%p9184_p0), %v5223_v16 }
 0xb23   : > { %5226 = vst [vmem:[%s5183_s26 + $0x20] sm:$0xff] %v5225_v47  ;;  %5228 = vst [vmem:[%s5183_s26 + $0x30] sm:$0xff] %v5227_v43 }
 0xb24   : > { %5230 = vst [vmem:[%s5183_s26 + $0x40] sm:$0xff] %v5229_v27  ;;  %5232 = vst [vmem:[%s5183_s26 + $0x50] sm:$0xff] %v5231_v25 }
 0xb25 PF: > { %s44_s25 = sadd.s32 1, %s6641_s25   ;;  %s9186_s6 = smov %s6609_s2 }
 0xb26   : > { %p41_p2 = scmp.ge.s32.totalorder %s44_s25, 14   ;;  %s9187_s2 = smov %s7075_s30 }
 0xb27   : > { %s9188_s29 = smov %s6617_s0  ;;  %s9189_s0 = smov %s6621_s7 }
 0xb28   : > { %s9190_s7 = smov %s7078_s23  ;;  %s9191_s20 = smov %s6633_s21 }
 0xb29   : > { %s9192_s30 = smov %s6637_s3  ;;  %s9193_s21 = smov %s9196_s11 }
 0xb2a   : > { %s9194_s3 = smov %s9200_s12  ;;  %43 = sbr.rel (!%p41_p2) target bundleno = 36 (0x24), region = 331 }
 0xb31   :  { %5262 = vsyncpa [#allocation13], 1 }
 0xb32   :  { %5264 = vsyncpa [#allocation13 + $0x1], 1 }
 0xb33   :  { %5265 = vsyncpa [#allocation15], 1 }
 0xb34   :  { %5266 = vsyncpa [#allocation18], 1 }
 0xb35   :  { %5267 = vsyncpa [#allocation21], 1 }
 0xb36   :  { %5268 = vsyncpa [#allocation24], 1 }

</bundles_post_ra>
